<compile_context>
chip_gen: v6e
topology: v6e:2x2x1
jax: 0.10.0
libtpu: 0.0.40
codegen_flags: <defaults>
</compile_context>

<pallas_src>
import functools
import math

import jax
import jax.numpy as jnp
from jax.experimental import pallas as pl
from jax.experimental.pallas import tpu as pltpu

# ----------------------------- configuration --------------------------------
ATTR_NUMS = [3, 5]      # number of attribute values per attribute
DIM_CHUNK = 40          # attribute-embedding size (orig 340); divisible by 10 heads
POOL_HEADS = 10         # attention_pooler num_heads (as in the module)
HIDDEN = 32             # ViT hidden_dim (orig 768)
MLP_DIM = 64            # ViT MLP dim
VIT_LAYERS = 2          # number of encoder blocks (orig 12)
VIT_HEADS = 4           # ViT self-attention heads
PATCH = 8               # patch size (orig 16)
IMG = 16                # image spatial size (orig 224)
BATCH = 2
LN_EPS = 1e-6

_SQRT_HALF = 0.7071067811865476


# ------------------------------ in-kernel helpers ----------------------------
def _ln(x, g, b, eps):
    mu = jnp.mean(x, axis=-1, keepdims=True)
    var = jnp.mean(jnp.square(x - mu), axis=-1, keepdims=True)
    return (x - mu) * jax.lax.rsqrt(var + eps) * g + b


def _erf_f32(x):
    # TODO(synk): lax.erf has no guaranteed Mosaic lowering; use the
    # Abramowitz & Stegun 7.1.26 rational approximation (max abs err 1.5e-7,
    # i.e. at f32 round-off) built only from exp/mul/add/div/select.
    ax = jnp.abs(x)
    t = 1.0 / (1.0 + 0.3275911 * ax)
    poly = t * (0.254829592 + t * (-0.284496736 + t * (1.421413741
               + t * (-1.453152027 + t * 1.061405429))))
    y = 1.0 - poly * jnp.exp(-(ax * ax))
    return jnp.where(x >= 0, y, -y)


def _gelu_exact(x):
    # matches nn.GELU() (erf formulation) to f32 precision
    return 0.5 * x * (1.0 + _erf_f32(x * _SQRT_HALF))


def _mha_rows(q, k, v, num_heads):
    """q: (L, D) already scale-folded, k/v: (S, D). Heads via static lane slices."""
    D = q.shape[-1]
    hd = D // num_heads
    heads = []
    for h in range(num_heads):
        sl = slice(h * hd, (h + 1) * hd)
        qh, kh, vh = q[:, sl], k[:, sl], v[:, sl]
        s = jax.lax.dot_general(qh, kh, (((1,), (1,)), ((), ())),
                                preferred_element_type=jnp.float32)
        s = s - jnp.max(s, axis=-1, keepdims=True)
        p = jnp.exp(s)
        p = p * pl.reciprocal(jnp.sum(p, axis=-1, keepdims=True), approx=True)
        heads.append(jnp.dot(p, vh, preferred_element_type=jnp.float32))
    return jnp.concatenate(heads, axis=-1)


# ------------------------------ Pallas kernels -------------------------------
def _embed_kernel(patch_ref, w_ref, bias_ref, cls_ref, pos_ref, o_ref):
    # patch_ref: (n, np, C*P*P); w: (C*P*P, H); bias/cls: (1, H); pos: (np+1, H)
    w = w_ref[...]
    bias = bias_ref[...]
    cls_row = cls_ref[...] + pos_ref[0:1, :]
    pos_rest = pos_ref[1:, :]
    for b in range(o_ref.shape[0]):
        emb = jnp.dot(patch_ref[b], w, preferred_element_type=jnp.float32) + bias
        o_ref[b] = jnp.concatenate([cls_row, emb + pos_rest], axis=0)


def _encoder_block_kernel(x_ref, ln1g_ref, ln1b_ref, wqkv_ref, bqkv_ref,
                          wo_ref, bo_ref, ln2g_ref, ln2b_ref,
                          w1_ref, b1_ref, w2_ref, b2_ref, o_ref,
                          *, num_heads, eps):
    E = x_ref.shape[-1]
    wqkv, bqkv = wqkv_ref[...], bqkv_ref[...]
    wo, bo = wo_ref[...], bo_ref[...]
    w1, b1 = w1_ref[...], b1_ref[...]
    w2, b2 = w2_ref[...], b2_ref[...]
    g1, be1 = ln1g_ref[...], ln1b_ref[...]
    g2, be2 = ln2g_ref[...], ln2b_ref[...]
    for b in range(x_ref.shape[0]):
        xb = x_ref[b]                                                  # (S, E)
        y = _ln(xb, g1, be1, eps)
        qkv = jnp.dot(y, wqkv, preferred_element_type=jnp.float32) + bqkv   # (S, 3E)
        q = qkv[:, :E]            # attention scale pre-folded into wq/bq
        k = qkv[:, E:2 * E]
        v = qkv[:, 2 * E:]
        attn = _mha_rows(q, k, v, num_heads)
        attn = jnp.dot(attn, wo, preferred_element_type=jnp.float32) + bo
        x1 = xb + attn
        y2 = _ln(x1, g2, be2, eps)
        h1 = jnp.dot(y2, w1, preferred_element_type=jnp.float32) + b1
        h1 = _gelu_exact(h1)
        mlp = jnp.dot(h1, w2, preferred_element_type=jnp.float32) + b2
        o_ref[b] = x1 + mlp


def _pool_head_kernel(x_ref, encg_ref, encb_ref, q_ref, wq_ref, wkv_ref, wo_ref,
                      postg_ref, postb_ref, clsw_ref, clsb_ref,
                      feat_ref, logits_ref, *, num_heads, eps, attr_nums):
    D = q_ref.shape[-1]
    # query projection shared across batch (scale pre-folded into wq, bias=False)
    qp = jnp.dot(q_ref[...], wq_ref[...], preferred_element_type=jnp.float32)  # (L, D)
    wkv, wo = wkv_ref[...], wo_ref[...]
    encg, encb = encg_ref[...], encb_ref[...]
    postg, postb = postg_ref[...], postb_ref[...]
    clsw, clsb = clsw_ref[...], clsb_ref[...]
    offs = [0]
    for a in attr_nums:
        offs.append(offs[-1] + a)
    for b in range(x_ref.shape[0]):
        xb = _ln(x_ref[b], encg, encb, eps)                            # final encoder LN
        kv = jnp.dot(xb, wkv, preferred_element_type=jnp.float32)      # (S, 2D)
        k, v = kv[:, :D], kv[:, D:]
        o = _mha_rows(qp, k, v, num_heads)                             # (L, D)
        o = jnp.dot(o, wo, preferred_element_type=jnp.float32)         # out proj, no bias
        feat = _ln(o, postg, postb, eps)                               # post LayerNorm
        feat_ref[b] = feat
        full = jnp.dot(feat, clsw, preferred_element_type=jnp.float32) + clsb  # (L, A)
        pieces = [full[i:i + 1, offs[i]:offs[i + 1]] for i in range(len(attr_nums))]
        logits_ref[b:b + 1, :] = jnp.concatenate(pieces, axis=1)


# ------------------------------ pallas_call wrappers --------------------------
def _full_spec(shape):
    zeros = (0,) * len(shape)
    return pl.BlockSpec(shape, lambda i: zeros)


_ARB = pltpu.CompilerParams(dimension_semantics=("arbitrary",))


def patch_embed(patches, conv_w, conv_b, class_token, pos_embedding):
    n, npatch, _ = patches.shape
    H = conv_w.shape[1]
    S = npatch + 1
    return pl.pallas_call(
        _embed_kernel,
        grid=(1,),
        in_specs=[_full_spec(patches.shape), _full_spec(conv_w.shape),
                  _full_spec(conv_b.shape), _full_spec(class_token.shape),
                  _full_spec(pos_embedding.shape)],
        out_specs=_full_spec((n, S, H)),
        out_shape=jax.ShapeDtypeStruct((n, S, H), jnp.float32),
        compiler_params=_ARB,
    )(patches, conv_w, conv_b, class_token, pos_embedding)


def encoder_block(x, blk):
    kernel = functools.partial(_encoder_block_kernel, num_heads=VIT_HEADS, eps=LN_EPS)
    args = (x, blk['ln1_g'], blk['ln1_b'], blk['wqkv'], blk['bqkv'],
            blk['wo'], blk['bo'], blk['ln2_g'], blk['ln2_b'],
            blk['w1'], blk['b1'], blk['w2'], blk['b2'])
    return pl.pallas_call(
        kernel,
        grid=(1,),
        in_specs=[_full_spec(a.shape) for a in args],
        out_specs=_full_spec(x.shape),
        out_shape=jax.ShapeDtypeStruct(x.shape, jnp.float32),
        compiler_params=_ARB,
    )(*args)


def pool_and_classify(x, p):
    n = x.shape[0]
    L, D = p['attr_queries'].shape
    A = p['cls_w'].shape[1]
    kernel = functools.partial(_pool_head_kernel, num_heads=POOL_HEADS, eps=LN_EPS,
                               attr_nums=tuple(ATTR_NUMS))
    args = (x, p['enc_ln_g'], p['enc_ln_b'], p['attr_queries'], p['pool_wq'],
            p['pool_wkv'], p['pool_wo'], p['post_ln_g'], p['post_ln_b'],
            p['cls_w'], p['cls_b'])
    return pl.pallas_call(
        kernel,
        grid=(1,),
        in_specs=[_full_spec(a.shape) for a in args],
        out_specs=[_full_spec((n, L, D)), _full_spec((n, A))],
        out_shape=(jax.ShapeDtypeStruct((n, L, D), jnp.float32),
                   jax.ShapeDtypeStruct((n, A), jnp.float32)),
        compiler_params=_ARB,
    )(*args)


# ------------------------------ forward pass ----------------------------------
@jax.jit
def extractor_ap_forward(img, params):
    # img is NCHW (n, 3, H, W), matching the PyTorch conv input.
    n, C, Himg, Wimg = img.shape
    nh, nw = Himg // PATCH, Wimg // PATCH

    # _process_input: conv with stride == kernel  ==  patch-flatten + matmul
    patches = img.reshape(n, C, nh, PATCH, nw, PATCH)
    patches = patches.transpose(0, 2, 4, 1, 3, 5).reshape(n, nh * nw, C * PATCH * PATCH)

    x = patch_embed(patches, params['conv_w'], params['conv_b'],
                    params['class_token'], params['pos_embedding'])   # (n, S, HIDDEN)

    for blk in params['blocks']:        # one fused Pallas kernel per block
        x = encoder_block(x, blk)

    feat, logits = pool_and_classify(x, params)   # (n, L, D), (n, sum(ATTR_NUMS))

    offs = [0]
    for a in ATTR_NUMS:
        offs.append(offs[-1] + a)
    dis_feat = [feat[:, i, :] for i in range(len(ATTR_NUMS))]
    attr_classification_out = [logits[:, offs[i]:offs[i + 1]] for i in range(len(ATTR_NUMS))]
    return dis_feat, attr_classification_out


# ------------------------------ parameters ------------------------------------
def init_params(key):
    """Module-style parameters (separate q/k/v, per-attribute classifiers)."""
    ks = iter(jax.random.split(key, 128))

    def nrm(shape, std=0.02):
        return (std * jax.random.normal(next(ks), shape)).astype(jnp.float32)

    def zeros(*shape):
        return jnp.zeros(shape, jnp.float32)

    def ones(*shape):
        return jnp.ones(shape, jnp.float32)

    seq_len = (IMG // PATCH) ** 2 + 1
    params = {
        'conv_w': nrm((3 * PATCH * PATCH, HIDDEN)),
        'conv_b': zeros(HIDDEN),
        'class_token': nrm((1, 1, HIDDEN)),
        'pos_embedding': nrm((1, seq_len, HIDDEN)),
        'enc_ln_g': ones(HIDDEN),
        'enc_ln_b': zeros(HIDDEN),
        'attr_queries': jax.random.normal(next(ks), (len(ATTR_NUMS), DIM_CHUNK)).astype(jnp.float32),
        'pooler': {   # MultiheadAttention(dim_chunk, 10, kdim=vdim=HIDDEN, bias=False)
            'wq': nrm((DIM_CHUNK, DIM_CHUNK)),
            'wk': nrm((HIDDEN, DIM_CHUNK)),
            'wv': nrm((HIDDEN, DIM_CHUNK)),
            'wo': nrm((DIM_CHUNK, DIM_CHUNK)),
        },
        'post_ln_g': ones(DIM_CHUNK),
        'post_ln_b': zeros(DIM_CHUNK),
        'cls_w': [nrm((DIM_CHUNK, a)) for a in ATTR_NUMS],
        'cls_b': [zeros(a) for a in ATTR_NUMS],
    }
    blocks = []
    for _ in range(VIT_LAYERS):
        blocks.append({
            'ln1_g': ones(HIDDEN), 'ln1_b': zeros(HIDDEN),
            'attn': {
                'wq': nrm((HIDDEN, HIDDEN)), 'bq': zeros(HIDDEN),
                'wk': nrm((HIDDEN, HIDDEN)), 'bk': zeros(HIDDEN),
                'wv': nrm((HIDDEN, HIDDEN)), 'bv': zeros(HIDDEN),
                'wo': nrm((HIDDEN, HIDDEN)), 'bo': zeros(HIDDEN),
            },
            'ln2_g': ones(HIDDEN), 'ln2_b': zeros(HIDDEN),
            'mlp_w1': nrm((HIDDEN, MLP_DIM)), 'mlp_b1': zeros(MLP_DIM),
            'mlp_w2': nrm((MLP_DIM, HIDDEN)), 'mlp_b2': zeros(HIDDEN),
        })
    params['blocks'] = blocks
    return params


def prepare_params(p):
    """Host-side, one-time weight fusion: fused QKV (scale folded into Wq/bq),
    fused pooler K|V, fused classifier weights, 2-D biases/gains."""
    scale = 1.0 / math.sqrt(HIDDEN // VIT_HEADS)
    blocks = []
    for blk in p['blocks']:
        a = blk['attn']
        blocks.append(dict(
            ln1_g=blk['ln1_g'][None, :], ln1_b=blk['ln1_b'][None, :],
            wqkv=jnp.concatenate([a['wq'] * scale, a['wk'], a['wv']], axis=1),
            bqkv=jnp.concatenate([a['bq'] * scale, a['bk'], a['bv']])[None, :],
            wo=a['wo'], bo=a['bo'][None, :],
            ln2_g=blk['ln2_g'][None, :], ln2_b=blk['ln2_b'][None, :],
            w1=blk['mlp_w1'], b1=blk['mlp_b1'][None, :],
            w2=blk['mlp_w2'], b2=blk['mlp_b2'][None, :],
        ))
    pool_scale = 1.0 / math.sqrt(DIM_CHUNK // POOL_HEADS)
    return dict(
        conv_w=p['conv_w'], conv_b=p['conv_b'][None, :],
        class_token=p['class_token'].reshape(1, HIDDEN),
        pos_embedding=p['pos_embedding'].reshape(-1, HIDDEN),
        blocks=blocks,
        enc_ln_g=p['enc_ln_g'][None, :], enc_ln_b=p['enc_ln_b'][None, :],
        attr_queries=p['attr_queries'],
        pool_wq=p['pooler']['wq'] * pool_scale,
        pool_wkv=jnp.concatenate([p['pooler']['wk'], p['pooler']['wv']], axis=1),
        pool_wo=p['pooler']['wo'],
        post_ln_g=p['post_ln_g'][None, :], post_ln_b=p['post_ln_b'][None, :],
        cls_w=jnp.concatenate(p['cls_w'], axis=1),
        cls_b=jnp.concatenate(p['cls_b'])[None, :],
    )


# ----------------------------------- main ------------------------------------
if __name__ == "__main__":
    key = jax.random.PRNGKey(0)
    pkey, xkey = jax.random.split(key)
    params = prepare_params(init_params(pkey))

    img = jax.random.normal(xkey, (BATCH, 3, IMG, IMG), dtype=jnp.float32)

    dis_feat, attr_out = extractor_ap_forward(img, params)
    jax.block_until_ready(dis_feat)
    jax.block_until_ready(attr_out)

    assert len(dis_feat) == len(ATTR_NUMS)
    assert len(attr_out) == len(ATTR_NUMS)
    for f in dis_feat:
        assert f.shape == (BATCH, DIM_CHUNK)
        assert bool(jnp.all(jnp.isfinite(f)))
    for logits, a in zip(attr_out, ATTR_NUMS):
        assert logits.shape == (BATCH, a)
        assert bool(jnp.all(jnp.isfinite(logits)))
    print("KERNEL_OK")
</pallas_src>

<mosaic_0001>
module attributes {stable_mosaic.version = 11 : i64} {
  func.func @_encoder_block_kernel(%arg0: i32, %arg1: memref<2x5x32xf32, #tpu.memory_space<vmem>>, %arg2: memref<1x32xf32, #tpu.memory_space<vmem>>, %arg3: memref<1x32xf32, #tpu.memory_space<vmem>>, %arg4: memref<32x96xf32, #tpu.memory_space<vmem>>, %arg5: memref<1x96xf32, #tpu.memory_space<vmem>>, %arg6: memref<32x32xf32, #tpu.memory_space<vmem>>, %arg7: memref<1x32xf32, #tpu.memory_space<vmem>>, %arg8: memref<1x32xf32, #tpu.memory_space<vmem>>, %arg9: memref<1x32xf32, #tpu.memory_space<vmem>>, %arg10: memref<32x64xf32, #tpu.memory_space<vmem>>, %arg11: memref<1x64xf32, #tpu.memory_space<vmem>>, %arg12: memref<64x32xf32, #tpu.memory_space<vmem>>, %arg13: memref<1x32xf32, #tpu.memory_space<vmem>>, %arg14: memref<2x5x32xf32, #tpu.memory_space<vmem>>) attributes {dimension_semantics = [#tpu.dimension_semantics<arbitrary>], iteration_bounds = array<i64: 1>, scalar_prefetch = 0 : i64, scratch_operands = 0 : i64, tpu.core_type = #tpu.core_type<tc>, window_params = [{pipeline_mode = #tpu.pipeline_mode<synchronous>, transform_indices = @transform_0, window_bounds = array<i64: 2, 5, 32>}, {pipeline_mode = #tpu.pipeline_mode<synchronous>, transform_indices = @transform_1, window_bounds = array<i64: 1, 32>}, {pipeline_mode = #tpu.pipeline_mode<synchronous>, transform_indices = @transform_2, window_bounds = array<i64: 1, 32>}, {pipeline_mode = #tpu.pipeline_mode<synchronous>, transform_indices = @transform_3, window_bounds = array<i64: 32, 96>}, {pipeline_mode = #tpu.pipeline_mode<synchronous>, transform_indices = @transform_4, window_bounds = array<i64: 1, 96>}, {pipeline_mode = #tpu.pipeline_mode<synchronous>, transform_indices = @transform_5, window_bounds = array<i64: 32, 32>}, {pipeline_mode = #tpu.pipeline_mode<synchronous>, transform_indices = @transform_6, window_bounds = array<i64: 1, 32>}, {pipeline_mode = #tpu.pipeline_mode<synchronous>, transform_indices = @transform_7, window_bounds = array<i64: 1, 32>}, {pipeline_mode = #tpu.pipeline_mode<synchronous>, transform_indices = @transform_8, window_bounds = array<i64: 1, 32>}, {pipeline_mode = #tpu.pipeline_mode<synchronous>, transform_indices = @transform_9, window_bounds = array<i64: 32, 64>}, {pipeline_mode = #tpu.pipeline_mode<synchronous>, transform_indices = @transform_10, window_bounds = array<i64: 1, 64>}, {pipeline_mode = #tpu.pipeline_mode<synchronous>, transform_indices = @transform_11, window_bounds = array<i64: 64, 32>}, {pipeline_mode = #tpu.pipeline_mode<synchronous>, transform_indices = @transform_12, window_bounds = array<i64: 1, 32>}, {pipeline_mode = #tpu.pipeline_mode<synchronous>, transform_indices = @transform_13, window_bounds = array<i64: 2, 5, 32>}]} {
    %c0 = arith.constant 0 : index
    %c0_0 = arith.constant 0 : index
    %0 = vector.load %arg4[%c0, %c0_0] : memref<32x96xf32, #tpu.memory_space<vmem>>, vector<32x96xf32>
    %c0_1 = arith.constant 0 : index
    %c0_2 = arith.constant 0 : index
    %1 = vector.load %arg5[%c0_1, %c0_2] : memref<1x96xf32, #tpu.memory_space<vmem>>, vector<1x96xf32>
    %c0_3 = arith.constant 0 : index
    %c0_4 = arith.constant 0 : index
    %2 = vector.load %arg6[%c0_3, %c0_4] : memref<32x32xf32, #tpu.memory_space<vmem>>, vector<32x32xf32>
    %c0_5 = arith.constant 0 : index
    %c0_6 = arith.constant 0 : index
    %3 = vector.load %arg7[%c0_5, %c0_6] : memref<1x32xf32, #tpu.memory_space<vmem>>, vector<1x32xf32>
    %c0_7 = arith.constant 0 : index
    %c0_8 = arith.constant 0 : index
    %4 = vector.load %arg10[%c0_7, %c0_8] : memref<32x64xf32, #tpu.memory_space<vmem>>, vector<32x64xf32>
    %c0_9 = arith.constant 0 : index
    %c0_10 = arith.constant 0 : index
    %5 = vector.load %arg11[%c0_9, %c0_10] : memref<1x64xf32, #tpu.memory_space<vmem>>, vector<1x64xf32>
    %c0_11 = arith.constant 0 : index
    %c0_12 = arith.constant 0 : index
    %6 = vector.load %arg12[%c0_11, %c0_12] : memref<64x32xf32, #tpu.memory_space<vmem>>, vector<64x32xf32>
    %c0_13 = arith.constant 0 : index
    %c0_14 = arith.constant 0 : index
    %7 = vector.load %arg13[%c0_13, %c0_14] : memref<1x32xf32, #tpu.memory_space<vmem>>, vector<1x32xf32>
    %c0_15 = arith.constant 0 : index
    %c0_16 = arith.constant 0 : index
    %8 = vector.load %arg2[%c0_15, %c0_16] : memref<1x32xf32, #tpu.memory_space<vmem>>, vector<1x32xf32>
    %c0_17 = arith.constant 0 : index
    %c0_18 = arith.constant 0 : index
    %9 = vector.load %arg3[%c0_17, %c0_18] : memref<1x32xf32, #tpu.memory_space<vmem>>, vector<1x32xf32>
    %c0_19 = arith.constant 0 : index
    %c0_20 = arith.constant 0 : index
    %10 = vector.load %arg8[%c0_19, %c0_20] : memref<1x32xf32, #tpu.memory_space<vmem>>, vector<1x32xf32>
    %c0_21 = arith.constant 0 : index
    %c0_22 = arith.constant 0 : index
    %11 = vector.load %arg9[%c0_21, %c0_22] : memref<1x32xf32, #tpu.memory_space<vmem>>, vector<1x32xf32>
    %c0_23 = arith.constant 0 : index
    %c0_24 = arith.constant 0 : index
    %c0_25 = arith.constant 0 : index
    %12 = vector.load %arg1[%c0_23, %c0_24, %c0_25] : memref<2x5x32xf32, #tpu.memory_space<vmem>>, vector<1x5x32xf32>
    %13 = vector.shape_cast %12 : vector<1x5x32xf32> to vector<5x32xf32>
    %cst = arith.constant dense<0.000000e+00> : vector<5xf32>
    %14 = vector.multi_reduction <add>, %13, %cst [1] : vector<5x32xf32> to vector<5xf32>
    %15 = vector.shape_cast %14 : vector<5xf32> to vector<5x1xf32>
    %cst_26 = arith.constant 3.200000e+01 : f32
    %16 = vector.broadcast %cst_26 : f32 to vector<5x1xf32>
    %17 = arith.divf %15, %16 : vector<5x1xf32>
    %18 = vector.broadcast %17 : vector<5x1xf32> to vector<5x32xf32>
    %19 = arith.subf %13, %18 : vector<5x32xf32>
    %20 = arith.mulf %19, %19 : vector<5x32xf32>
    %cst_27 = arith.constant dense<0.000000e+00> : vector<5xf32>
    %21 = vector.multi_reduction <add>, %20, %cst_27 [1] : vector<5x32xf32> to vector<5xf32>
    %22 = vector.shape_cast %21 : vector<5xf32> to vector<5x1xf32>
    %cst_28 = arith.constant 3.200000e+01 : f32
    %23 = vector.broadcast %cst_28 : f32 to vector<5x1xf32>
    %24 = arith.divf %22, %23 : vector<5x1xf32>
    %25 = vector.broadcast %17 : vector<5x1xf32> to vector<5x32xf32>
    %26 = arith.subf %13, %25 : vector<5x32xf32>
    %cst_29 = arith.constant 9.99999997E-7 : f32
    %27 = vector.broadcast %cst_29 : f32 to vector<5x1xf32>
    %28 = arith.addf %24, %27 : vector<5x1xf32>
    %29 = math.rsqrt %28 : vector<5x1xf32>
    %30 = vector.broadcast %29 : vector<5x1xf32> to vector<5x32xf32>
    %31 = arith.mulf %26, %30 : vector<5x32xf32>
    %32 = vector.broadcast %8 : vector<1x32xf32> to vector<5x32xf32>
    %33 = arith.mulf %31, %32 : vector<5x32xf32>
    %34 = vector.broadcast %9 : vector<1x32xf32> to vector<5x32xf32>
    %35 = arith.addf %33, %34 : vector<5x32xf32>
    %cst_30 = arith.constant dense<0.000000e+00> : vector<5x96xf32>
    %36 = tpu.matmul %35, %0, %cst_30 {dimension_numbers = #tpu.dot_dimension_numbers<[1], [0], [0], [1], [0, 0, 1, 1], [], []>} : vector<5x32xf32>, vector<32x96xf32>, vector<5x96xf32> -> vector<5x96xf32>
    %37 = vector.broadcast %1 : vector<1x96xf32> to vector<5x96xf32>
    %38 = arith.addf %36, %37 : vector<5x96xf32>
    %39 = vector.extract_strided_slice %38 {offsets = [0, 0], sizes = [5, 32], strides = [1, 1]} : vector<5x96xf32> to vector<5x32xf32>
    %40 = vector.extract_strided_slice %38 {offsets = [0, 32], sizes = [5, 32], strides = [1, 1]} : vector<5x96xf32> to vector<5x32xf32>
    %41 = vector.extract_strided_slice %38 {offsets = [0, 64], sizes = [5, 32], strides = [1, 1]} : vector<5x96xf32> to vector<5x32xf32>
    %42 = vector.extract_strided_slice %39 {offsets = [0, 0], sizes = [5, 8], strides = [1, 1]} : vector<5x32xf32> to vector<5x8xf32>
    %43 = vector.extract_strided_slice %40 {offsets = [0, 0], sizes = [5, 8], strides = [1, 1]} : vector<5x32xf32> to vector<5x8xf32>
    %44 = vector.extract_strided_slice %41 {offsets = [0, 0], sizes = [5, 8], strides = [1, 1]} : vector<5x32xf32> to vector<5x8xf32>
    %cst_31 = arith.constant dense<0.000000e+00> : vector<5x5xf32>
    %45 = tpu.matmul %42, %43, %cst_31 {dimension_numbers = #tpu.dot_dimension_numbers<[1], [1], [0], [0], [0, 0, 1, 0], [], []>} : vector<5x8xf32>, vector<5x8xf32>, vector<5x5xf32> -> vector<5x5xf32>
    %cst_32 = arith.constant dense<0xFF800000> : vector<5xf32>
    %46 = vector.multi_reduction <maximumf>, %45, %cst_32 [1] : vector<5x5xf32> to vector<5xf32>
    %47 = vector.shape_cast %46 : vector<5xf32> to vector<5x1xf32>
    %48 = vector.broadcast %47 : vector<5x1xf32> to vector<5x5xf32>
    %49 = arith.subf %45, %48 : vector<5x5xf32>
    %50 = math.exp %49 : vector<5x5xf32>
    %cst_33 = arith.constant dense<0.000000e+00> : vector<5xf32>
    %51 = vector.multi_reduction <add>, %50, %cst_33 [1] : vector<5x5xf32> to vector<5xf32>
    %52 = vector.shape_cast %51 : vector<5xf32> to vector<5x1xf32>
    %53 = tpu.reciprocal %52 {approx = true} : vector<5x1xf32> -> vector<5x1xf32>
    %54 = vector.broadcast %53 : vector<5x1xf32> to vector<5x5xf32>
    %55 = arith.mulf %50, %54 : vector<5x5xf32>
    %cst_34 = arith.constant dense<0.000000e+00> : vector<5x8xf32>
    %56 = tpu.matmul %55, %44, %cst_34 {dimension_numbers = #tpu.dot_dimension_numbers<[1], [0], [0], [1], [0, 0, 1, 1], [], []>} : vector<5x5xf32>, vector<5x8xf32>, vector<5x8xf32> -> vector<5x8xf32>
    %57 = vector.extract_strided_slice %39 {offsets = [0, 8], sizes = [5, 8], strides = [1, 1]} : vector<5x32xf32> to vector<5x8xf32>
    %58 = vector.extract_strided_slice %40 {offsets = [0, 8], sizes = [5, 8], strides = [1, 1]} : vector<5x32xf32> to vector<5x8xf32>
    %59 = vector.extract_strided_slice %41 {offsets = [0, 8], sizes = [5, 8], strides = [1, 1]} : vector<5x32xf32> to vector<5x8xf32>
    %cst_35 = arith.constant dense<0.000000e+00> : vector<5x5xf32>
    %60 = tpu.matmul %57, %58, %cst_35 {dimension_numbers = #tpu.dot_dimension_numbers<[1], [1], [0], [0], [0, 0, 1, 0], [], []>} : vector<5x8xf32>, vector<5x8xf32>, vector<5x5xf32> -> vector<5x5xf32>
    %cst_36 = arith.constant dense<0xFF800000> : vector<5xf32>
    %61 = vector.multi_reduction <maximumf>, %60, %cst_36 [1] : vector<5x5xf32> to vector<5xf32>
    %62 = vector.shape_cast %61 : vector<5xf32> to vector<5x1xf32>
    %63 = vector.broadcast %62 : vector<5x1xf32> to vector<5x5xf32>
    %64 = arith.subf %60, %63 : vector<5x5xf32>
    %65 = math.exp %64 : vector<5x5xf32>
    %cst_37 = arith.constant dense<0.000000e+00> : vector<5xf32>
    %66 = vector.multi_reduction <add>, %65, %cst_37 [1] : vector<5x5xf32> to vector<5xf32>
    %67 = vector.shape_cast %66 : vector<5xf32> to vector<5x1xf32>
    %68 = tpu.reciprocal %67 {approx = true} : vector<5x1xf32> -> vector<5x1xf32>
    %69 = vector.broadcast %68 : vector<5x1xf32> to vector<5x5xf32>
    %70 = arith.mulf %65, %69 : vector<5x5xf32>
    %cst_38 = arith.constant dense<0.000000e+00> : vector<5x8xf32>
    %71 = tpu.matmul %70, %59, %cst_38 {dimension_numbers = #tpu.dot_dimension_numbers<[1], [0], [0], [1], [0, 0, 1, 1], [], []>} : vector<5x5xf32>, vector<5x8xf32>, vector<5x8xf32> -> vector<5x8xf32>
    %72 = vector.extract_strided_slice %39 {offsets = [0, 16], sizes = [5, 8], strides = [1, 1]} : vector<5x32xf32> to vector<5x8xf32>
    %73 = vector.extract_strided_slice %40 {offsets = [0, 16], sizes = [5, 8], strides = [1, 1]} : vector<5x32xf32> to vector<5x8xf32>
    %74 = vector.extract_strided_slice %41 {offsets = [0, 16], sizes = [5, 8], strides = [1, 1]} : vector<5x32xf32> to vector<5x8xf32>
    %cst_39 = arith.constant dense<0.000000e+00> : vector<5x5xf32>
    %75 = tpu.matmul %72, %73, %cst_39 {dimension_numbers = #tpu.dot_dimension_numbers<[1], [1], [0], [0], [0, 0, 1, 0], [], []>} : vector<5x8xf32>, vector<5x8xf32>, vector<5x5xf32> -> vector<5x5xf32>
    %cst_40 = arith.constant dense<0xFF800000> : vector<5xf32>
    %76 = vector.multi_reduction <maximumf>, %75, %cst_40 [1] : vector<5x5xf32> to vector<5xf32>
    %77 = vector.shape_cast %76 : vector<5xf32> to vector<5x1xf32>
    %78 = vector.broadcast %77 : vector<5x1xf32> to vector<5x5xf32>
    %79 = arith.subf %75, %78 : vector<5x5xf32>
    %80 = math.exp %79 : vector<5x5xf32>
    %cst_41 = arith.constant dense<0.000000e+00> : vector<5xf32>
    %81 = vector.multi_reduction <add>, %80, %cst_41 [1] : vector<5x5xf32> to vector<5xf32>
    %82 = vector.shape_cast %81 : vector<5xf32> to vector<5x1xf32>
    %83 = tpu.reciprocal %82 {approx = true} : vector<5x1xf32> -> vector<5x1xf32>
    %84 = vector.broadcast %83 : vector<5x1xf32> to vector<5x5xf32>
    %85 = arith.mulf %80, %84 : vector<5x5xf32>
    %cst_42 = arith.constant dense<0.000000e+00> : vector<5x8xf32>
    %86 = tpu.matmul %85, %74, %cst_42 {dimension_numbers = #tpu.dot_dimension_numbers<[1], [0], [0], [1], [0, 0, 1, 1], [], []>} : vector<5x5xf32>, vector<5x8xf32>, vector<5x8xf32> -> vector<5x8xf32>
    %87 = vector.extract_strided_slice %39 {offsets = [0, 24], sizes = [5, 8], strides = [1, 1]} : vector<5x32xf32> to vector<5x8xf32>
    %88 = vector.extract_strided_slice %40 {offsets = [0, 24], sizes = [5, 8], strides = [1, 1]} : vector<5x32xf32> to vector<5x8xf32>
    %89 = vector.extract_strided_slice %41 {offsets = [0, 24], sizes = [5, 8], strides = [1, 1]} : vector<5x32xf32> to vector<5x8xf32>
    %cst_43 = arith.constant dense<0.000000e+00> : vector<5x5xf32>
    %90 = tpu.matmul %87, %88, %cst_43 {dimension_numbers = #tpu.dot_dimension_numbers<[1], [1], [0], [0], [0, 0, 1, 0], [], []>} : vector<5x8xf32>, vector<5x8xf32>, vector<5x5xf32> -> vector<5x5xf32>
    %cst_44 = arith.constant dense<0xFF800000> : vector<5xf32>
    %91 = vector.multi_reduction <maximumf>, %90, %cst_44 [1] : vector<5x5xf32> to vector<5xf32>
    %92 = vector.shape_cast %91 : vector<5xf32> to vector<5x1xf32>
    %93 = vector.broadcast %92 : vector<5x1xf32> to vector<5x5xf32>
    %94 = arith.subf %90, %93 : vector<5x5xf32>
    %95 = math.exp %94 : vector<5x5xf32>
    %cst_45 = arith.constant dense<0.000000e+00> : vector<5xf32>
    %96 = vector.multi_reduction <add>, %95, %cst_45 [1] : vector<5x5xf32> to vector<5xf32>
    %97 = vector.shape_cast %96 : vector<5xf32> to vector<5x1xf32>
    %98 = tpu.reciprocal %97 {approx = true} : vector<5x1xf32> -> vector<5x1xf32>
    %99 = vector.broadcast %98 : vector<5x1xf32> to vector<5x5xf32>
    %100 = arith.mulf %95, %99 : vector<5x5xf32>
    %cst_46 = arith.constant dense<0.000000e+00> : vector<5x8xf32>
    %101 = tpu.matmul %100, %89, %cst_46 {dimension_numbers = #tpu.dot_dimension_numbers<[1], [0], [0], [1], [0, 0, 1, 1], [], []>} : vector<5x5xf32>, vector<5x8xf32>, vector<5x8xf32> -> vector<5x8xf32>
    %102 = tpu.concatenate %56, %71, %86, %101 in 1 : vector<5x8xf32>, vector<5x8xf32>, vector<5x8xf32>, vector<5x8xf32> -> vector<5x32xf32>
    %cst_47 = arith.constant dense<0.000000e+00> : vector<5x32xf32>
    %103 = tpu.matmul %102, %2, %cst_47 {dimension_numbers = #tpu.dot_dimension_numbers<[1], [0], [0], [1], [0, 0, 1, 1], [], []>} : vector<5x32xf32>, vector<32x32xf32>, vector<5x32xf32> -> vector<5x32xf32>
    %104 = vector.broadcast %3 : vector<1x32xf32> to vector<5x32xf32>
    %105 = arith.addf %103, %104 : vector<5x32xf32>
    %106 = arith.addf %13, %105 : vector<5x32xf32>
    %cst_48 = arith.constant dense<0.000000e+00> : vector<5xf32>
    %107 = vector.multi_reduction <add>, %106, %cst_48 [1] : vector<5x32xf32> to vector<5xf32>
    %108 = vector.shape_cast %107 : vector<5xf32> to vector<5x1xf32>
    %cst_49 = arith.constant 3.200000e+01 : f32
    %109 = vector.broadcast %cst_49 : f32 to vector<5x1xf32>
    %110 = arith.divf %108, %109 : vector<5x1xf32>
    %111 = vector.broadcast %110 : vector<5x1xf32> to vector<5x32xf32>
    %112 = arith.subf %106, %111 : vector<5x32xf32>
    %113 = arith.mulf %112, %112 : vector<5x32xf32>
    %cst_50 = arith.constant dense<0.000000e+00> : vector<5xf32>
    %114 = vector.multi_reduction <add>, %113, %cst_50 [1] : vector<5x32xf32> to vector<5xf32>
    %115 = vector.shape_cast %114 : vector<5xf32> to vector<5x1xf32>
    %cst_51 = arith.constant 3.200000e+01 : f32
    %116 = vector.broadcast %cst_51 : f32 to vector<5x1xf32>
    %117 = arith.divf %115, %116 : vector<5x1xf32>
    %118 = vector.broadcast %110 : vector<5x1xf32> to vector<5x32xf32>
    %119 = arith.subf %106, %118 : vector<5x32xf32>
    %cst_52 = arith.constant 9.99999997E-7 : f32
    %120 = vector.broadcast %cst_52 : f32 to vector<5x1xf32>
    %121 = arith.addf %117, %120 : vector<5x1xf32>
    %122 = math.rsqrt %121 : vector<5x1xf32>
    %123 = vector.broadcast %122 : vector<5x1xf32> to vector<5x32xf32>
    %124 = arith.mulf %119, %123 : vector<5x32xf32>
    %125 = vector.broadcast %10 : vector<1x32xf32> to vector<5x32xf32>
    %126 = arith.mulf %124, %125 : vector<5x32xf32>
    %127 = vector.broadcast %11 : vector<1x32xf32> to vector<5x32xf32>
    %128 = arith.addf %126, %127 : vector<5x32xf32>
    %cst_53 = arith.constant dense<0.000000e+00> : vector<5x64xf32>
    %129 = tpu.matmul %128, %4, %cst_53 {dimension_numbers = #tpu.dot_dimension_numbers<[1], [0], [0], [1], [0, 0, 1, 1], [], []>} : vector<5x32xf32>, vector<32x64xf32>, vector<5x64xf32> -> vector<5x64xf32>
    %130 = vector.broadcast %5 : vector<1x64xf32> to vector<5x64xf32>
    %131 = arith.addf %129, %130 : vector<5x64xf32>
    %cst_54 = arith.constant 5.000000e-01 : f32
    %132 = vector.broadcast %cst_54 : f32 to vector<5x64xf32>
    %133 = arith.mulf %132, %131 : vector<5x64xf32>
    %cst_55 = arith.constant 0.707106769 : f32
    %134 = vector.broadcast %cst_55 : f32 to vector<5x64xf32>
    %135 = arith.mulf %131, %134 : vector<5x64xf32>
    %136 = math.absf %135 : vector<5x64xf32>
    %cst_56 = arith.constant 0.327591091 : f32
    %137 = vector.broadcast %cst_56 : f32 to vector<5x64xf32>
    %138 = arith.mulf %137, %136 : vector<5x64xf32>
    %cst_57 = arith.constant 1.000000e+00 : f32
    %139 = vector.broadcast %cst_57 : f32 to vector<5x64xf32>
    %140 = arith.addf %139, %138 : vector<5x64xf32>
    %cst_58 = arith.constant 1.000000e+00 : f32
    %141 = vector.broadcast %cst_58 : f32 to vector<5x64xf32>
    %142 = arith.divf %141, %140 : vector<5x64xf32>
    %cst_59 = arith.constant 1.06140542 : f32
    %143 = vector.broadcast %cst_59 : f32 to vector<5x64xf32>
    %144 = arith.mulf %142, %143 : vector<5x64xf32>
    %cst_60 = arith.constant -1.45315206 : f32
    %145 = vector.broadcast %cst_60 : f32 to vector<5x64xf32>
    %146 = arith.addf %145, %144 : vector<5x64xf32>
    %147 = arith.mulf %142, %146 : vector<5x64xf32>
    %cst_61 = arith.constant 1.42141378 : f32
    %148 = vector.broadcast %cst_61 : f32 to vector<5x64xf32>
    %149 = arith.addf %148, %147 : vector<5x64xf32>
    %150 = arith.mulf %142, %149 : vector<5x64xf32>
    %cst_62 = arith.constant -0.284496725 : f32
    %151 = vector.broadcast %cst_62 : f32 to vector<5x64xf32>
    %152 = arith.addf %151, %150 : vector<5x64xf32>
    %153 = arith.mulf %142, %152 : vector<5x64xf32>
    %cst_63 = arith.constant 0.254829586 : f32
    %154 = vector.broadcast %cst_63 : f32 to vector<5x64xf32>
    %155 = arith.addf %154, %153 : vector<5x64xf32>
    %156 = arith.mulf %142, %155 : vector<5x64xf32>
    %157 = arith.mulf %136, %136 : vector<5x64xf32>
    %cst_64 = arith.constant 0.000000e+00 : f32
    %158 = vector.broadcast %cst_64 : f32 to vector<5x64xf32>
    %159 = arith.subf %158, %157 : vector<5x64xf32>
    %160 = math.exp %159 : vector<5x64xf32>
    %161 = arith.mulf %156, %160 : vector<5x64xf32>
    %cst_65 = arith.constant 1.000000e+00 : f32
    %162 = vector.broadcast %cst_65 : f32 to vector<5x64xf32>
    %163 = arith.subf %162, %161 : vector<5x64xf32>
    %cst_66 = arith.constant 0.000000e+00 : f32
    %164 = vector.broadcast %cst_66 : f32 to vector<5x64xf32>
    %165 = arith.cmpf oge, %135, %164 : vector<5x64xf32>
    %cst_67 = arith.constant 0.000000e+00 : f32
    %166 = vector.broadcast %cst_67 : f32 to vector<5x64xf32>
    %167 = arith.subf %166, %163 : vector<5x64xf32>
    %168 = arith.select %165, %163, %167 : vector<5x64xi1>, vector<5x64xf32>
    %cst_68 = arith.constant 1.000000e+00 : f32
    %169 = vector.broadcast %cst_68 : f32 to vector<5x64xf32>
    %170 = arith.addf %169, %168 : vector<5x64xf32>
    %171 = arith.mulf %133, %170 : vector<5x64xf32>
    %cst_69 = arith.constant dense<0.000000e+00> : vector<5x32xf32>
    %172 = tpu.matmul %171, %6, %cst_69 {dimension_numbers = #tpu.dot_dimension_numbers<[1], [0], [0], [1], [0, 0, 1, 1], [], []>} : vector<5x64xf32>, vector<64x32xf32>, vector<5x32xf32> -> vector<5x32xf32>
    %173 = vector.broadcast %7 : vector<1x32xf32> to vector<5x32xf32>
    %174 = arith.addf %172, %173 : vector<5x32xf32>
    %175 = arith.addf %106, %174 : vector<5x32xf32>
    %c0_70 = arith.constant 0 : index
    %c0_71 = arith.constant 0 : index
    %c0_72 = arith.constant 0 : index
    %176 = vector.load %arg14[%c0_70, %c0_71, %c0_72] : memref<2x5x32xf32, #tpu.memory_space<vmem>>, vector<1x5x32xf32>
    %177 = vector.shape_cast %176 : vector<1x5x32xf32> to vector<5x32xf32>
    %178 = vector.shape_cast %175 : vector<5x32xf32> to vector<1x5x32xf32>
    tpu.vector_store %arg14[%c0_70, %c0_71, %c0_72], %178 {strides = array<i32>} : memref<2x5x32xf32, #tpu.memory_space<vmem>>, vector<1x5x32xf32>,
    %c1 = arith.constant 1 : index
    %c0_73 = arith.constant 0 : index
    %c0_74 = arith.constant 0 : index
    %179 = vector.load %arg1[%c1, %c0_73, %c0_74] : memref<2x5x32xf32, #tpu.memory_space<vmem>>, vector<1x5x32xf32>
    %180 = vector.shape_cast %179 : vector<1x5x32xf32> to vector<5x32xf32>
    %cst_75 = arith.constant dense<0.000000e+00> : vector<5xf32>
    %181 = vector.multi_reduction <add>, %180, %cst_75 [1] : vector<5x32xf32> to vector<5xf32>
    %182 = vector.shape_cast %181 : vector<5xf32> to vector<5x1xf32>
    %cst_76 = arith.constant 3.200000e+01 : f32
    %183 = vector.broadcast %cst_76 : f32 to vector<5x1xf32>
    %184 = arith.divf %182, %183 : vector<5x1xf32>
    %185 = vector.broadcast %184 : vector<5x1xf32> to vector<5x32xf32>
    %186 = arith.subf %180, %185 : vector<5x32xf32>
    %187 = arith.mulf %186, %186 : vector<5x32xf32>
    %cst_77 = arith.constant dense<0.000000e+00> : vector<5xf32>
    %188 = vector.multi_reduction <add>, %187, %cst_77 [1] : vector<5x32xf32> to vector<5xf32>
    %189 = vector.shape_cast %188 : vector<5xf32> to vector<5x1xf32>
    %cst_78 = arith.constant 3.200000e+01 : f32
    %190 = vector.broadcast %cst_78 : f32 to vector<5x1xf32>
    %191 = arith.divf %189, %190 : vector<5x1xf32>
    %192 = vector.broadcast %184 : vector<5x1xf32> to vector<5x32xf32>
    %193 = arith.subf %180, %192 : vector<5x32xf32>
    %cst_79 = arith.constant 9.99999997E-7 : f32
    %194 = vector.broadcast %cst_79 : f32 to vector<5x1xf32>
    %195 = arith.addf %191, %194 : vector<5x1xf32>
    %196 = math.rsqrt %195 : vector<5x1xf32>
    %197 = vector.broadcast %196 : vector<5x1xf32> to vector<5x32xf32>
    %198 = arith.mulf %193, %197 : vector<5x32xf32>
    %199 = vector.broadcast %8 : vector<1x32xf32> to vector<5x32xf32>
    %200 = arith.mulf %198, %199 : vector<5x32xf32>
    %201 = vector.broadcast %9 : vector<1x32xf32> to vector<5x32xf32>
    %202 = arith.addf %200, %201 : vector<5x32xf32>
    %cst_80 = arith.constant dense<0.000000e+00> : vector<5x96xf32>
    %203 = tpu.matmul %202, %0, %cst_80 {dimension_numbers = #tpu.dot_dimension_numbers<[1], [0], [0], [1], [0, 0, 1, 1], [], []>} : vector<5x32xf32>, vector<32x96xf32>, vector<5x96xf32> -> vector<5x96xf32>
    %204 = vector.broadcast %1 : vector<1x96xf32> to vector<5x96xf32>
    %205 = arith.addf %203, %204 : vector<5x96xf32>
    %206 = vector.extract_strided_slice %205 {offsets = [0, 0], sizes = [5, 32], strides = [1, 1]} : vector<5x96xf32> to vector<5x32xf32>
    %207 = vector.extract_strided_slice %205 {offsets = [0, 32], sizes = [5, 32], strides = [1, 1]} : vector<5x96xf32> to vector<5x32xf32>
    %208 = vector.extract_strided_slice %205 {offsets = [0, 64], sizes = [5, 32], strides = [1, 1]} : vector<5x96xf32> to vector<5x32xf32>
    %209 = vector.extract_strided_slice %206 {offsets = [0, 0], sizes = [5, 8], strides = [1, 1]} : vector<5x32xf32> to vector<5x8xf32>
    %210 = vector.extract_strided_slice %207 {offsets = [0, 0], sizes = [5, 8], strides = [1, 1]} : vector<5x32xf32> to vector<5x8xf32>
    %211 = vector.extract_strided_slice %208 {offsets = [0, 0], sizes = [5, 8], strides = [1, 1]} : vector<5x32xf32> to vector<5x8xf32>
    %cst_81 = arith.constant dense<0.000000e+00> : vector<5x5xf32>
    %212 = tpu.matmul %209, %210, %cst_81 {dimension_numbers = #tpu.dot_dimension_numbers<[1], [1], [0], [0], [0, 0, 1, 0], [], []>} : vector<5x8xf32>, vector<5x8xf32>, vector<5x5xf32> -> vector<5x5xf32>
    %cst_82 = arith.constant dense<0xFF800000> : vector<5xf32>
    %213 = vector.multi_reduction <maximumf>, %212, %cst_82 [1] : vector<5x5xf32> to vector<5xf32>
    %214 = vector.shape_cast %213 : vector<5xf32> to vector<5x1xf32>
    %215 = vector.broadcast %214 : vector<5x1xf32> to vector<5x5xf32>
    %216 = arith.subf %212, %215 : vector<5x5xf32>
    %217 = math.exp %216 : vector<5x5xf32>
    %cst_83 = arith.constant dense<0.000000e+00> : vector<5xf32>
    %218 = vector.multi_reduction <add>, %217, %cst_83 [1] : vector<5x5xf32> to vector<5xf32>
    %219 = vector.shape_cast %218 : vector<5xf32> to vector<5x1xf32>
    %220 = tpu.reciprocal %219 {approx = true} : vector<5x1xf32> -> vector<5x1xf32>
    %221 = vector.broadcast %220 : vector<5x1xf32> to vector<5x5xf32>
    %222 = arith.mulf %217, %221 : vector<5x5xf32>
    %cst_84 = arith.constant dense<0.000000e+00> : vector<5x8xf32>
    %223 = tpu.matmul %222, %211, %cst_84 {dimension_numbers = #tpu.dot_dimension_numbers<[1], [0], [0], [1], [0, 0, 1, 1], [], []>} : vector<5x5xf32>, vector<5x8xf32>, vector<5x8xf32> -> vector<5x8xf32>
    %224 = vector.extract_strided_slice %206 {offsets = [0, 8], sizes = [5, 8], strides = [1, 1]} : vector<5x32xf32> to vector<5x8xf32>
    %225 = vector.extract_strided_slice %207 {offsets = [0, 8], sizes = [5, 8], strides = [1, 1]} : vector<5x32xf32> to vector<5x8xf32>
    %226 = vector.extract_strided_slice %208 {offsets = [0, 8], sizes = [5, 8], strides = [1, 1]} : vector<5x32xf32> to vector<5x8xf32>
    %cst_85 = arith.constant dense<0.000000e+00> : vector<5x5xf32>
    %227 = tpu.matmul %224, %225, %cst_85 {dimension_numbers = #tpu.dot_dimension_numbers<[1], [1], [0], [0], [0, 0, 1, 0], [], []>} : vector<5x8xf32>, vector<5x8xf32>, vector<5x5xf32> -> vector<5x5xf32>
    %cst_86 = arith.constant dense<0xFF800000> : vector<5xf32>
    %228 = vector.multi_reduction <maximumf>, %227, %cst_86 [1] : vector<5x5xf32> to vector<5xf32>
    %229 = vector.shape_cast %228 : vector<5xf32> to vector<5x1xf32>
    %230 = vector.broadcast %229 : vector<5x1xf32> to vector<5x5xf32>
    %231 = arith.subf %227, %230 : vector<5x5xf32>
    %232 = math.exp %231 : vector<5x5xf32>
    %cst_87 = arith.constant dense<0.000000e+00> : vector<5xf32>
    %233 = vector.multi_reduction <add>, %232, %cst_87 [1] : vector<5x5xf32> to vector<5xf32>
    %234 = vector.shape_cast %233 : vector<5xf32> to vector<5x1xf32>
    %235 = tpu.reciprocal %234 {approx = true} : vector<5x1xf32> -> vector<5x1xf32>
    %236 = vector.broadcast %235 : vector<5x1xf32> to vector<5x5xf32>
    %237 = arith.mulf %232, %236 : vector<5x5xf32>
    %cst_88 = arith.constant dense<0.000000e+00> : vector<5x8xf32>
    %238 = tpu.matmul %237, %226, %cst_88 {dimension_numbers = #tpu.dot_dimension_numbers<[1], [0], [0], [1], [0, 0, 1, 1], [], []>} : vector<5x5xf32>, vector<5x8xf32>, vector<5x8xf32> -> vector<5x8xf32>
    %239 = vector.extract_strided_slice %206 {offsets = [0, 16], sizes = [5, 8], strides = [1, 1]} : vector<5x32xf32> to vector<5x8xf32>
    %240 = vector.extract_strided_slice %207 {offsets = [0, 16], sizes = [5, 8], strides = [1, 1]} : vector<5x32xf32> to vector<5x8xf32>
    %241 = vector.extract_strided_slice %208 {offsets = [0, 16], sizes = [5, 8], strides = [1, 1]} : vector<5x32xf32> to vector<5x8xf32>
    %cst_89 = arith.constant dense<0.000000e+00> : vector<5x5xf32>
    %242 = tpu.matmul %239, %240, %cst_89 {dimension_numbers = #tpu.dot_dimension_numbers<[1], [1], [0], [0], [0, 0, 1, 0], [], []>} : vector<5x8xf32>, vector<5x8xf32>, vector<5x5xf32> -> vector<5x5xf32>
    %cst_90 = arith.constant dense<0xFF800000> : vector<5xf32>
    %243 = vector.multi_reduction <maximumf>, %242, %cst_90 [1] : vector<5x5xf32> to vector<5xf32>
    %244 = vector.shape_cast %243 : vector<5xf32> to vector<5x1xf32>
    %245 = vector.broadcast %244 : vector<5x1xf32> to vector<5x5xf32>
    %246 = arith.subf %242, %245 : vector<5x5xf32>
    %247 = math.exp %246 : vector<5x5xf32>
    %cst_91 = arith.constant dense<0.000000e+00> : vector<5xf32>
    %248 = vector.multi_reduction <add>, %247, %cst_91 [1] : vector<5x5xf32> to vector<5xf32>
    %249 = vector.shape_cast %248 : vector<5xf32> to vector<5x1xf32>
    %250 = tpu.reciprocal %249 {approx = true} : vector<5x1xf32> -> vector<5x1xf32>
    %251 = vector.broadcast %250 : vector<5x1xf32> to vector<5x5xf32>
    %252 = arith.mulf %247, %251 : vector<5x5xf32>
    %cst_92 = arith.constant dense<0.000000e+00> : vector<5x8xf32>
    %253 = tpu.matmul %252, %241, %cst_92 {dimension_numbers = #tpu.dot_dimension_numbers<[1], [0], [0], [1], [0, 0, 1, 1], [], []>} : vector<5x5xf32>, vector<5x8xf32>, vector<5x8xf32> -> vector<5x8xf32>
    %254 = vector.extract_strided_slice %206 {offsets = [0, 24], sizes = [5, 8], strides = [1, 1]} : vector<5x32xf32> to vector<5x8xf32>
    %255 = vector.extract_strided_slice %207 {offsets = [0, 24], sizes = [5, 8], strides = [1, 1]} : vector<5x32xf32> to vector<5x8xf32>
    %256 = vector.extract_strided_slice %208 {offsets = [0, 24], sizes = [5, 8], strides = [1, 1]} : vector<5x32xf32> to vector<5x8xf32>
    %cst_93 = arith.constant dense<0.000000e+00> : vector<5x5xf32>
    %257 = tpu.matmul %254, %255, %cst_93 {dimension_numbers = #tpu.dot_dimension_numbers<[1], [1], [0], [0], [0, 0, 1, 0], [], []>} : vector<5x8xf32>, vector<5x8xf32>, vector<5x5xf32> -> vector<5x5xf32>
    %cst_94 = arith.constant dense<0xFF800000> : vector<5xf32>
    %258 = vector.multi_reduction <maximumf>, %257, %cst_94 [1] : vector<5x5xf32> to vector<5xf32>
    %259 = vector.shape_cast %258 : vector<5xf32> to vector<5x1xf32>
    %260 = vector.broadcast %259 : vector<5x1xf32> to vector<5x5xf32>
    %261 = arith.subf %257, %260 : vector<5x5xf32>
    %262 = math.exp %261 : vector<5x5xf32>
    %cst_95 = arith.constant dense<0.000000e+00> : vector<5xf32>
    %263 = vector.multi_reduction <add>, %262, %cst_95 [1] : vector<5x5xf32> to vector<5xf32>
    %264 = vector.shape_cast %263 : vector<5xf32> to vector<5x1xf32>
    %265 = tpu.reciprocal %264 {approx = true} : vector<5x1xf32> -> vector<5x1xf32>
    %266 = vector.broadcast %265 : vector<5x1xf32> to vector<5x5xf32>
    %267 = arith.mulf %262, %266 : vector<5x5xf32>
    %cst_96 = arith.constant dense<0.000000e+00> : vector<5x8xf32>
    %268 = tpu.matmul %267, %256, %cst_96 {dimension_numbers = #tpu.dot_dimension_numbers<[1], [0], [0], [1], [0, 0, 1, 1], [], []>} : vector<5x5xf32>, vector<5x8xf32>, vector<5x8xf32> -> vector<5x8xf32>
    %269 = tpu.concatenate %223, %238, %253, %268 in 1 : vector<5x8xf32>, vector<5x8xf32>, vector<5x8xf32>, vector<5x8xf32> -> vector<5x32xf32>
    %cst_97 = arith.constant dense<0.000000e+00> : vector<5x32xf32>
    %270 = tpu.matmul %269, %2, %cst_97 {dimension_numbers = #tpu.dot_dimension_numbers<[1], [0], [0], [1], [0, 0, 1, 1], [], []>} : vector<5x32xf32>, vector<32x32xf32>, vector<5x32xf32> -> vector<5x32xf32>
    %271 = vector.broadcast %3 : vector<1x32xf32> to vector<5x32xf32>
    %272 = arith.addf %270, %271 : vector<5x32xf32>
    %273 = arith.addf %180, %272 : vector<5x32xf32>
    %cst_98 = arith.constant dense<0.000000e+00> : vector<5xf32>
    %274 = vector.multi_reduction <add>, %273, %cst_98 [1] : vector<5x32xf32> to vector<5xf32>
    %275 = vector.shape_cast %274 : vector<5xf32> to vector<5x1xf32>
    %cst_99 = arith.constant 3.200000e+01 : f32
    %276 = vector.broadcast %cst_99 : f32 to vector<5x1xf32>
    %277 = arith.divf %275, %276 : vector<5x1xf32>
    %278 = vector.broadcast %277 : vector<5x1xf32> to vector<5x32xf32>
    %279 = arith.subf %273, %278 : vector<5x32xf32>
    %280 = arith.mulf %279, %279 : vector<5x32xf32>
    %cst_100 = arith.constant dense<0.000000e+00> : vector<5xf32>
    %281 = vector.multi_reduction <add>, %280, %cst_100 [1] : vector<5x32xf32> to vector<5xf32>
    %282 = vector.shape_cast %281 : vector<5xf32> to vector<5x1xf32>
    %cst_101 = arith.constant 3.200000e+01 : f32
    %283 = vector.broadcast %cst_101 : f32 to vector<5x1xf32>
    %284 = arith.divf %282, %283 : vector<5x1xf32>
    %285 = vector.broadcast %277 : vector<5x1xf32> to vector<5x32xf32>
    %286 = arith.subf %273, %285 : vector<5x32xf32>
    %cst_102 = arith.constant 9.99999997E-7 : f32
    %287 = vector.broadcast %cst_102 : f32 to vector<5x1xf32>
    %288 = arith.addf %284, %287 : vector<5x1xf32>
    %289 = math.rsqrt %288 : vector<5x1xf32>
    %290 = vector.broadcast %289 : vector<5x1xf32> to vector<5x32xf32>
    %291 = arith.mulf %286, %290 : vector<5x32xf32>
    %292 = vector.broadcast %10 : vector<1x32xf32> to vector<5x32xf32>
    %293 = arith.mulf %291, %292 : vector<5x32xf32>
    %294 = vector.broadcast %11 : vector<1x32xf32> to vector<5x32xf32>
    %295 = arith.addf %293, %294 : vector<5x32xf32>
    %cst_103 = arith.constant dense<0.000000e+00> : vector<5x64xf32>
    %296 = tpu.matmul %295, %4, %cst_103 {dimension_numbers = #tpu.dot_dimension_numbers<[1], [0], [0], [1], [0, 0, 1, 1], [], []>} : vector<5x32xf32>, vector<32x64xf32>, vector<5x64xf32> -> vector<5x64xf32>
    %297 = vector.broadcast %5 : vector<1x64xf32> to vector<5x64xf32>
    %298 = arith.addf %296, %297 : vector<5x64xf32>
    %cst_104 = arith.constant 5.000000e-01 : f32
    %299 = vector.broadcast %cst_104 : f32 to vector<5x64xf32>
    %300 = arith.mulf %299, %298 : vector<5x64xf32>
    %cst_105 = arith.constant 0.707106769 : f32
    %301 = vector.broadcast %cst_105 : f32 to vector<5x64xf32>
    %302 = arith.mulf %298, %301 : vector<5x64xf32>
    %303 = math.absf %302 : vector<5x64xf32>
    %cst_106 = arith.constant 0.327591091 : f32
    %304 = vector.broadcast %cst_106 : f32 to vector<5x64xf32>
    %305 = arith.mulf %304, %303 : vector<5x64xf32>
    %cst_107 = arith.constant 1.000000e+00 : f32
    %306 = vector.broadcast %cst_107 : f32 to vector<5x64xf32>
    %307 = arith.addf %306, %305 : vector<5x64xf32>
    %cst_108 = arith.constant 1.000000e+00 : f32
    %308 = vector.broadcast %cst_108 : f32 to vector<5x64xf32>
    %309 = arith.divf %308, %307 : vector<5x64xf32>
    %cst_109 = arith.constant 1.06140542 : f32
    %310 = vector.broadcast %cst_109 : f32 to vector<5x64xf32>
    %311 = arith.mulf %309, %310 : vector<5x64xf32>
    %cst_110 = arith.constant -1.45315206 : f32
    %312 = vector.broadcast %cst_110 : f32 to vector<5x64xf32>
    %313 = arith.addf %312, %311 : vector<5x64xf32>
    %314 = arith.mulf %309, %313 : vector<5x64xf32>
    %cst_111 = arith.constant 1.42141378 : f32
    %315 = vector.broadcast %cst_111 : f32 to vector<5x64xf32>
    %316 = arith.addf %315, %314 : vector<5x64xf32>
    %317 = arith.mulf %309, %316 : vector<5x64xf32>
    %cst_112 = arith.constant -0.284496725 : f32
    %318 = vector.broadcast %cst_112 : f32 to vector<5x64xf32>
    %319 = arith.addf %318, %317 : vector<5x64xf32>
    %320 = arith.mulf %309, %319 : vector<5x64xf32>
    %cst_113 = arith.constant 0.254829586 : f32
    %321 = vector.broadcast %cst_113 : f32 to vector<5x64xf32>
    %322 = arith.addf %321, %320 : vector<5x64xf32>
    %323 = arith.mulf %309, %322 : vector<5x64xf32>
    %324 = arith.mulf %303, %303 : vector<5x64xf32>
    %cst_114 = arith.constant 0.000000e+00 : f32
    %325 = vector.broadcast %cst_114 : f32 to vector<5x64xf32>
    %326 = arith.subf %325, %324 : vector<5x64xf32>
    %327 = math.exp %326 : vector<5x64xf32>
    %328 = arith.mulf %323, %327 : vector<5x64xf32>
    %cst_115 = arith.constant 1.000000e+00 : f32
    %329 = vector.broadcast %cst_115 : f32 to vector<5x64xf32>
    %330 = arith.subf %329, %328 : vector<5x64xf32>
    %cst_116 = arith.constant 0.000000e+00 : f32
    %331 = vector.broadcast %cst_116 : f32 to vector<5x64xf32>
    %332 = arith.cmpf oge, %302, %331 : vector<5x64xf32>
    %cst_117 = arith.constant 0.000000e+00 : f32
    %333 = vector.broadcast %cst_117 : f32 to vector<5x64xf32>
    %334 = arith.subf %333, %330 : vector<5x64xf32>
    %335 = arith.select %332, %330, %334 : vector<5x64xi1>, vector<5x64xf32>
    %cst_118 = arith.constant 1.000000e+00 : f32
    %336 = vector.broadcast %cst_118 : f32 to vector<5x64xf32>
    %337 = arith.addf %336, %335 : vector<5x64xf32>
    %338 = arith.mulf %300, %337 : vector<5x64xf32>
    %cst_119 = arith.constant dense<0.000000e+00> : vector<5x32xf32>
    %339 = tpu.matmul %338, %6, %cst_119 {dimension_numbers = #tpu.dot_dimension_numbers<[1], [0], [0], [1], [0, 0, 1, 1], [], []>} : vector<5x64xf32>, vector<64x32xf32>, vector<5x32xf32> -> vector<5x32xf32>
    %340 = vector.broadcast %7 : vector<1x32xf32> to vector<5x32xf32>
    %341 = arith.addf %339, %340 : vector<5x32xf32>
    %342 = arith.addf %273, %341 : vector<5x32xf32>
    %c1_120 = arith.constant 1 : index
    %c0_121 = arith.constant 0 : index
    %c0_122 = arith.constant 0 : index
    %343 = vector.load %arg14[%c1_120, %c0_121, %c0_122] : memref<2x5x32xf32, #tpu.memory_space<vmem>>, vector<1x5x32xf32>
    %344 = vector.shape_cast %343 : vector<1x5x32xf32> to vector<5x32xf32>
    %345 = vector.shape_cast %342 : vector<5x32xf32> to vector<1x5x32xf32>
    tpu.vector_store %arg14[%c1_120, %c0_121, %c0_122], %345 {strides = array<i32>} : memref<2x5x32xf32, #tpu.memory_space<vmem>>, vector<1x5x32xf32>,
    return
  }
  func.func @transform_0(%arg0: i32) -> (i32, i32, i32) {
    %c0_i32 = arith.constant 0 : i32
    %c0_i32_0 = arith.constant 0 : i32
    %c0_i32_1 = arith.constant 0 : i32
    %c0_i32_2 = arith.constant 0 : i32
    return %c0_i32, %c0_i32_0, %c0_i32_1 : i32, i32, i32
  }
  func.func @transform_1(%arg0: i32) -> (i32, i32) {
    %c0_i32 = arith.constant 0 : i32
    %c0_i32_0 = arith.constant 0 : i32
    %c0_i32_1 = arith.constant 0 : i32
    return %c0_i32, %c0_i32_0 : i32, i32
  }
  func.func @transform_2(%arg0: i32) -> (i32, i32) {
    %c0_i32 = arith.constant 0 : i32
    %c0_i32_0 = arith.constant 0 : i32
    %c0_i32_1 = arith.constant 0 : i32
    return %c0_i32, %c0_i32_0 : i32, i32
  }
  func.func @transform_3(%arg0: i32) -> (i32, i32) {
    %c0_i32 = arith.constant 0 : i32
    %c0_i32_0 = arith.constant 0 : i32
    %c0_i32_1 = arith.constant 0 : i32
    return %c0_i32, %c0_i32_0 : i32, i32
  }
  func.func @transform_4(%arg0: i32) -> (i32, i32) {
    %c0_i32 = arith.constant 0 : i32
    %c0_i32_0 = arith.constant 0 : i32
    %c0_i32_1 = arith.constant 0 : i32
    return %c0_i32, %c0_i32_0 : i32, i32
  }
  func.func @transform_5(%arg0: i32) -> (i32, i32) {
    %c0_i32 = arith.constant 0 : i32
    %c0_i32_0 = arith.constant 0 : i32
    %c0_i32_1 = arith.constant 0 : i32
    return %c0_i32, %c0_i32_0 : i32, i32
  }
  func.func @transform_6(%arg0: i32) -> (i32, i32) {
    %c0_i32 = arith.constant 0 : i32
    %c0_i32_0 = arith.constant 0 : i32
    %c0_i32_1 = arith.constant 0 : i32
    return %c0_i32, %c0_i32_0 : i32, i32
  }
  func.func @transform_7(%arg0: i32) -> (i32, i32) {
    %c0_i32 = arith.constant 0 : i32
    %c0_i32_0 = arith.constant 0 : i32
    %c0_i32_1 = arith.constant 0 : i32
    return %c0_i32, %c0_i32_0 : i32, i32
  }
  func.func @transform_8(%arg0: i32) -> (i32, i32) {
    %c0_i32 = arith.constant 0 : i32
    %c0_i32_0 = arith.constant 0 : i32
    %c0_i32_1 = arith.constant 0 : i32
    return %c0_i32, %c0_i32_0 : i32, i32
  }
  func.func @transform_9(%arg0: i32) -> (i32, i32) {
    %c0_i32 = arith.constant 0 : i32
    %c0_i32_0 = arith.constant 0 : i32
    %c0_i32_1 = arith.constant 0 : i32
    return %c0_i32, %c0_i32_0 : i32, i32
  }
  func.func @transform_10(%arg0: i32) -> (i32, i32) {
    %c0_i32 = arith.constant 0 : i32
    %c0_i32_0 = arith.constant 0 : i32
    %c0_i32_1 = arith.constant 0 : i32
    return %c0_i32, %c0_i32_0 : i32, i32
  }
  func.func @transform_11(%arg0: i32) -> (i32, i32) {
    %c0_i32 = arith.constant 0 : i32
    %c0_i32_0 = arith.constant 0 : i32
    %c0_i32_1 = arith.constant 0 : i32
    return %c0_i32, %c0_i32_0 : i32, i32
  }
  func.func @transform_12(%arg0: i32) -> (i32, i32) {
    %c0_i32 = arith.constant 0 : i32
    %c0_i32_0 = arith.constant 0 : i32
    %c0_i32_1 = arith.constant 0 : i32
    return %c0_i32, %c0_i32_0 : i32, i32
  }
  func.func @transform_13(%arg0: i32) -> (i32, i32, i32) {
    %c0_i32 = arith.constant 0 : i32
    %c0_i32_0 = arith.constant 0 : i32
    %c0_i32_1 = arith.constant 0 : i32
    %c0_i32_2 = arith.constant 0 : i32
    return %c0_i32, %c0_i32_0, %c0_i32_1 : i32, i32, i32
  }
}

module attributes {stable_mosaic.version = 11 : i64} {
  func.func @_embed_kernel(%arg0: i32, %arg1: memref<2x4x192xf32, #tpu.memory_space<vmem>>, %arg2: memref<192x32xf32, #tpu.memory_space<vmem>>, %arg3: memref<1x32xf32, #tpu.memory_space<vmem>>, %arg4: memref<1x32xf32, #tpu.memory_space<vmem>>, %arg5: memref<5x32xf32, #tpu.memory_space<vmem>>, %arg6: memref<2x5x32xf32, #tpu.memory_space<vmem>>) attributes {dimension_semantics = [#tpu.dimension_semantics<arbitrary>], iteration_bounds = array<i64: 1>, scalar_prefetch = 0 : i64, scratch_operands = 0 : i64, tpu.core_type = #tpu.core_type<tc>, window_params = [{pipeline_mode = #tpu.pipeline_mode<synchronous>, transform_indices = @transform_0, window_bounds = array<i64: 2, 4, 192>}, {pipeline_mode = #tpu.pipeline_mode<synchronous>, transform_indices = @transform_1, window_bounds = array<i64: 192, 32>}, {pipeline_mode = #tpu.pipeline_mode<synchronous>, transform_indices = @transform_2, window_bounds = array<i64: 1, 32>}, {pipeline_mode = #tpu.pipeline_mode<synchronous>, transform_indices = @transform_3, window_bounds = array<i64: 1, 32>}, {pipeline_mode = #tpu.pipeline_mode<synchronous>, transform_indices = @transform_4, window_bounds = array<i64: 5, 32>}, {pipeline_mode = #tpu.pipeline_mode<synchronous>, transform_indices = @transform_5, window_bounds = array<i64: 2, 5, 32>}]} {
    %c0 = arith.constant 0 : index
    %c0_0 = arith.constant 0 : index
    %0 = vector.load %arg2[%c0, %c0_0] : memref<192x32xf32, #tpu.memory_space<vmem>>, vector<192x32xf32>
    %c0_1 = arith.constant 0 : index
    %c0_2 = arith.constant 0 : index
    %1 = vector.load %arg3[%c0_1, %c0_2] : memref<1x32xf32, #tpu.memory_space<vmem>>, vector<1x32xf32>
    %c0_3 = arith.constant 0 : index
    %c0_4 = arith.constant 0 : index
    %2 = vector.load %arg4[%c0_3, %c0_4] : memref<1x32xf32, #tpu.memory_space<vmem>>, vector<1x32xf32>
    %c0_5 = arith.constant 0 : index
    %c0_6 = arith.constant 0 : index
    %3 = vector.load %arg5[%c0_5, %c0_6] : memref<5x32xf32, #tpu.memory_space<vmem>>, vector<1x32xf32>
    %4 = arith.addf %2, %3 : vector<1x32xf32>
    %c1 = arith.constant 1 : index
    %c0_7 = arith.constant 0 : index
    %5 = vector.load %arg5[%c1, %c0_7] : memref<5x32xf32, #tpu.memory_space<vmem>>, vector<4x32xf32>
    %c0_8 = arith.constant 0 : index
    %c0_9 = arith.constant 0 : index
    %c0_10 = arith.constant 0 : index
    %6 = vector.load %arg1[%c0_8, %c0_9, %c0_10] : memref<2x4x192xf32, #tpu.memory_space<vmem>>, vector<1x4x192xf32>
    %7 = vector.shape_cast %6 : vector<1x4x192xf32> to vector<4x192xf32>
    %cst = arith.constant dense<0.000000e+00> : vector<4x32xf32>
    %8 = tpu.matmul %7, %0, %cst {dimension_numbers = #tpu.dot_dimension_numbers<[1], [0], [0], [1], [0, 0, 1, 1], [], []>} : vector<4x192xf32>, vector<192x32xf32>, vector<4x32xf32> -> vector<4x32xf32>
    %9 = vector.broadcast %1 : vector<1x32xf32> to vector<4x32xf32>
    %10 = arith.addf %8, %9 : vector<4x32xf32>
    %11 = arith.addf %10, %5 : vector<4x32xf32>
    %12 = tpu.concatenate %4, %11 in 0 : vector<1x32xf32>, vector<4x32xf32> -> vector<5x32xf32>
    %c0_11 = arith.constant 0 : index
    %c0_12 = arith.constant 0 : index
    %c0_13 = arith.constant 0 : index
    %13 = vector.load %arg6[%c0_11, %c0_12, %c0_13] : memref<2x5x32xf32, #tpu.memory_space<vmem>>, vector<1x5x32xf32>
    %14 = vector.shape_cast %13 : vector<1x5x32xf32> to vector<5x32xf32>
    %15 = vector.shape_cast %12 : vector<5x32xf32> to vector<1x5x32xf32>
    tpu.vector_store %arg6[%c0_11, %c0_12, %c0_13], %15 {strides = array<i32>} : memref<2x5x32xf32, #tpu.memory_space<vmem>>, vector<1x5x32xf32>,
    %c1_14 = arith.constant 1 : index
    %c0_15 = arith.constant 0 : index
    %c0_16 = arith.constant 0 : index
    %16 = vector.load %arg1[%c1_14, %c0_15, %c0_16] : memref<2x4x192xf32, #tpu.memory_space<vmem>>, vector<1x4x192xf32>
    %17 = vector.shape_cast %16 : vector<1x4x192xf32> to vector<4x192xf32>
    %cst_17 = arith.constant dense<0.000000e+00> : vector<4x32xf32>
    %18 = tpu.matmul %17, %0, %cst_17 {dimension_numbers = #tpu.dot_dimension_numbers<[1], [0], [0], [1], [0, 0, 1, 1], [], []>} : vector<4x192xf32>, vector<192x32xf32>, vector<4x32xf32> -> vector<4x32xf32>
    %19 = vector.broadcast %1 : vector<1x32xf32> to vector<4x32xf32>
    %20 = arith.addf %18, %19 : vector<4x32xf32>
    %21 = arith.addf %20, %5 : vector<4x32xf32>
    %22 = tpu.concatenate %4, %21 in 0 : vector<1x32xf32>, vector<4x32xf32> -> vector<5x32xf32>
    %c1_18 = arith.constant 1 : index
    %c0_19 = arith.constant 0 : index
    %c0_20 = arith.constant 0 : index
    %23 = vector.load %arg6[%c1_18, %c0_19, %c0_20] : memref<2x5x32xf32, #tpu.memory_space<vmem>>, vector<1x5x32xf32>
    %24 = vector.shape_cast %23 : vector<1x5x32xf32> to vector<5x32xf32>
    %25 = vector.shape_cast %22 : vector<5x32xf32> to vector<1x5x32xf32>
    tpu.vector_store %arg6[%c1_18, %c0_19, %c0_20], %25 {strides = array<i32>} : memref<2x5x32xf32, #tpu.memory_space<vmem>>, vector<1x5x32xf32>,
    return
  }
  func.func @transform_0(%arg0: i32) -> (i32, i32, i32) {
    %c0_i32 = arith.constant 0 : i32
    %c0_i32_0 = arith.constant 0 : i32
    %c0_i32_1 = arith.constant 0 : i32
    %c0_i32_2 = arith.constant 0 : i32
    return %c0_i32, %c0_i32_0, %c0_i32_1 : i32, i32, i32
  }
  func.func @transform_1(%arg0: i32) -> (i32, i32) {
    %c0_i32 = arith.constant 0 : i32
    %c0_i32_0 = arith.constant 0 : i32
    %c0_i32_1 = arith.constant 0 : i32
    return %c0_i32, %c0_i32_0 : i32, i32
  }
  func.func @transform_2(%arg0: i32) -> (i32, i32) {
    %c0_i32 = arith.constant 0 : i32
    %c0_i32_0 = arith.constant 0 : i32
    %c0_i32_1 = arith.constant 0 : i32
    return %c0_i32, %c0_i32_0 : i32, i32
  }
  func.func @transform_3(%arg0: i32) -> (i32, i32) {
    %c0_i32 = arith.constant 0 : i32
    %c0_i32_0 = arith.constant 0 : i32
    %c0_i32_1 = arith.constant 0 : i32
    return %c0_i32, %c0_i32_0 : i32, i32
  }
  func.func @transform_4(%arg0: i32) -> (i32, i32) {
    %c0_i32 = arith.constant 0 : i32
    %c0_i32_0 = arith.constant 0 : i32
    %c0_i32_1 = arith.constant 0 : i32
    return %c0_i32, %c0_i32_0 : i32, i32
  }
  func.func @transform_5(%arg0: i32) -> (i32, i32, i32) {
    %c0_i32 = arith.constant 0 : i32
    %c0_i32_0 = arith.constant 0 : i32
    %c0_i32_1 = arith.constant 0 : i32
    %c0_i32_2 = arith.constant 0 : i32
    return %c0_i32, %c0_i32_0, %c0_i32_1 : i32, i32, i32
  }
}

module attributes {stable_mosaic.version = 11 : i64} {
  func.func @_pool_head_kernel(%arg0: i32, %arg1: memref<2x5x32xf32, #tpu.memory_space<vmem>>, %arg2: memref<1x32xf32, #tpu.memory_space<vmem>>, %arg3: memref<1x32xf32, #tpu.memory_space<vmem>>, %arg4: memref<2x40xf32, #tpu.memory_space<vmem>>, %arg5: memref<40x40xf32, #tpu.memory_space<vmem>>, %arg6: memref<32x80xf32, #tpu.memory_space<vmem>>, %arg7: memref<40x40xf32, #tpu.memory_space<vmem>>, %arg8: memref<1x40xf32, #tpu.memory_space<vmem>>, %arg9: memref<1x40xf32, #tpu.memory_space<vmem>>, %arg10: memref<40x8xf32, #tpu.memory_space<vmem>>, %arg11: memref<1x8xf32, #tpu.memory_space<vmem>>, %arg12: memref<2x2x40xf32, #tpu.memory_space<vmem>>, %arg13: memref<2x8xf32, #tpu.memory_space<vmem>>) attributes {dimension_semantics = [#tpu.dimension_semantics<arbitrary>], iteration_bounds = array<i64: 1>, scalar_prefetch = 0 : i64, scratch_operands = 0 : i64, tpu.core_type = #tpu.core_type<tc>, window_params = [{pipeline_mode = #tpu.pipeline_mode<synchronous>, transform_indices = @transform_0, window_bounds = array<i64: 2, 5, 32>}, {pipeline_mode = #tpu.pipeline_mode<synchronous>, transform_indices = @transform_1, window_bounds = array<i64: 1, 32>}, {pipeline_mode = #tpu.pipeline_mode<synchronous>, transform_indices = @transform_2, window_bounds = array<i64: 1, 32>}, {pipeline_mode = #tpu.pipeline_mode<synchronous>, transform_indices = @transform_3, window_bounds = array<i64: 2, 40>}, {pipeline_mode = #tpu.pipeline_mode<synchronous>, transform_indices = @transform_4, window_bounds = array<i64: 40, 40>}, {pipeline_mode = #tpu.pipeline_mode<synchronous>, transform_indices = @transform_5, window_bounds = array<i64: 32, 80>}, {pipeline_mode = #tpu.pipeline_mode<synchronous>, transform_indices = @transform_6, window_bounds = array<i64: 40, 40>}, {pipeline_mode = #tpu.pipeline_mode<synchronous>, transform_indices = @transform_7, window_bounds = array<i64: 1, 40>}, {pipeline_mode = #tpu.pipeline_mode<synchronous>, transform_indices = @transform_8, window_bounds = array<i64: 1, 40>}, {pipeline_mode = #tpu.pipeline_mode<synchronous>, transform_indices = @transform_9, window_bounds = array<i64: 40, 8>}, {pipeline_mode = #tpu.pipeline_mode<synchronous>, transform_indices = @transform_10, window_bounds = array<i64: 1, 8>}, {pipeline_mode = #tpu.pipeline_mode<synchronous>, transform_indices = @transform_11, window_bounds = array<i64: 2, 2, 40>}, {pipeline_mode = #tpu.pipeline_mode<synchronous>, transform_indices = @transform_12, window_bounds = array<i64: 2, 8>}]} {
    %c0 = arith.constant 0 : index
    %c0_0 = arith.constant 0 : index
    %0 = vector.load %arg4[%c0, %c0_0] : memref<2x40xf32, #tpu.memory_space<vmem>>, vector<2x40xf32>
    %c0_1 = arith.constant 0 : index
    %c0_2 = arith.constant 0 : index
    %1 = vector.load %arg5[%c0_1, %c0_2] : memref<40x40xf32, #tpu.memory_space<vmem>>, vector<40x40xf32>
    %cst = arith.constant dense<0.000000e+00> : vector<2x40xf32>
    %2 = tpu.matmul %0, %1, %cst {dimension_numbers = #tpu.dot_dimension_numbers<[1], [0], [0], [1], [0, 0, 1, 1], [], []>} : vector<2x40xf32>, vector<40x40xf32>, vector<2x40xf32> -> vector<2x40xf32>
    %c0_3 = arith.constant 0 : index
    %c0_4 = arith.constant 0 : index
    %3 = vector.load %arg6[%c0_3, %c0_4] : memref<32x80xf32, #tpu.memory_space<vmem>>, vector<32x80xf32>
    %c0_5 = arith.constant 0 : index
    %c0_6 = arith.constant 0 : index
    %4 = vector.load %arg7[%c0_5, %c0_6] : memref<40x40xf32, #tpu.memory_space<vmem>>, vector<40x40xf32>
    %c0_7 = arith.constant 0 : index
    %c0_8 = arith.constant 0 : index
    %5 = vector.load %arg2[%c0_7, %c0_8] : memref<1x32xf32, #tpu.memory_space<vmem>>, vector<1x32xf32>
    %c0_9 = arith.constant 0 : index
    %c0_10 = arith.constant 0 : index
    %6 = vector.load %arg3[%c0_9, %c0_10] : memref<1x32xf32, #tpu.memory_space<vmem>>, vector<1x32xf32>
    %c0_11 = arith.constant 0 : index
    %c0_12 = arith.constant 0 : index
    %7 = vector.load %arg8[%c0_11, %c0_12] : memref<1x40xf32, #tpu.memory_space<vmem>>, vector<1x40xf32>
    %c0_13 = arith.constant 0 : index
    %c0_14 = arith.constant 0 : index
    %8 = vector.load %arg9[%c0_13, %c0_14] : memref<1x40xf32, #tpu.memory_space<vmem>>, vector<1x40xf32>
    %c0_15 = arith.constant 0 : index
    %c0_16 = arith.constant 0 : index
    %9 = vector.load %arg10[%c0_15, %c0_16] : memref<40x8xf32, #tpu.memory_space<vmem>>, vector<40x8xf32>
    %c0_17 = arith.constant 0 : index
    %c0_18 = arith.constant 0 : index
    %10 = vector.load %arg11[%c0_17, %c0_18] : memref<1x8xf32, #tpu.memory_space<vmem>>, vector<1x8xf32>
    %c0_19 = arith.constant 0 : index
    %c0_20 = arith.constant 0 : index
    %c0_21 = arith.constant 0 : index
    %11 = vector.load %arg1[%c0_19, %c0_20, %c0_21] : memref<2x5x32xf32, #tpu.memory_space<vmem>>, vector<1x5x32xf32>
    %12 = vector.shape_cast %11 : vector<1x5x32xf32> to vector<5x32xf32>
    %cst_22 = arith.constant dense<0.000000e+00> : vector<5xf32>
    %13 = vector.multi_reduction <add>, %12, %cst_22 [1] : vector<5x32xf32> to vector<5xf32>
    %14 = vector.shape_cast %13 : vector<5xf32> to vector<5x1xf32>
    %cst_23 = arith.constant 3.200000e+01 : f32
    %15 = vector.broadcast %cst_23 : f32 to vector<5x1xf32>
    %16 = arith.divf %14, %15 : vector<5x1xf32>
    %17 = vector.broadcast %16 : vector<5x1xf32> to vector<5x32xf32>
    %18 = arith.subf %12, %17 : vector<5x32xf32>
    %19 = arith.mulf %18, %18 : vector<5x32xf32>
    %cst_24 = arith.constant dense<0.000000e+00> : vector<5xf32>
    %20 = vector.multi_reduction <add>, %19, %cst_24 [1] : vector<5x32xf32> to vector<5xf32>
    %21 = vector.shape_cast %20 : vector<5xf32> to vector<5x1xf32>
    %cst_25 = arith.constant 3.200000e+01 : f32
    %22 = vector.broadcast %cst_25 : f32 to vector<5x1xf32>
    %23 = arith.divf %21, %22 : vector<5x1xf32>
    %24 = vector.broadcast %16 : vector<5x1xf32> to vector<5x32xf32>
    %25 = arith.subf %12, %24 : vector<5x32xf32>
    %cst_26 = arith.constant 9.99999997E-7 : f32
    %26 = vector.broadcast %cst_26 : f32 to vector<5x1xf32>
    %27 = arith.addf %23, %26 : vector<5x1xf32>
    %28 = math.rsqrt %27 : vector<5x1xf32>
    %29 = vector.broadcast %28 : vector<5x1xf32> to vector<5x32xf32>
    %30 = arith.mulf %25, %29 : vector<5x32xf32>
    %31 = vector.broadcast %5 : vector<1x32xf32> to vector<5x32xf32>
    %32 = arith.mulf %30, %31 : vector<5x32xf32>
    %33 = vector.broadcast %6 : vector<1x32xf32> to vector<5x32xf32>
    %34 = arith.addf %32, %33 : vector<5x32xf32>
    %cst_27 = arith.constant dense<0.000000e+00> : vector<5x80xf32>
    %35 = tpu.matmul %34, %3, %cst_27 {dimension_numbers = #tpu.dot_dimension_numbers<[1], [0], [0], [1], [0, 0, 1, 1], [], []>} : vector<5x32xf32>, vector<32x80xf32>, vector<5x80xf32> -> vector<5x80xf32>
    %36 = vector.extract_strided_slice %35 {offsets = [0, 0], sizes = [5, 40], strides = [1, 1]} : vector<5x80xf32> to vector<5x40xf32>
    %37 = vector.extract_strided_slice %35 {offsets = [0, 40], sizes = [5, 40], strides = [1, 1]} : vector<5x80xf32> to vector<5x40xf32>
    %38 = vector.extract_strided_slice %2 {offsets = [0, 0], sizes = [2, 4], strides = [1, 1]} : vector<2x40xf32> to vector<2x4xf32>
    %39 = vector.extract_strided_slice %36 {offsets = [0, 0], sizes = [5, 4], strides = [1, 1]} : vector<5x40xf32> to vector<5x4xf32>
    %40 = vector.extract_strided_slice %37 {offsets = [0, 0], sizes = [5, 4], strides = [1, 1]} : vector<5x40xf32> to vector<5x4xf32>
    %cst_28 = arith.constant dense<0.000000e+00> : vector<2x5xf32>
    %41 = tpu.matmul %38, %39, %cst_28 {dimension_numbers = #tpu.dot_dimension_numbers<[1], [1], [0], [0], [0, 0, 1, 0], [], []>} : vector<2x4xf32>, vector<5x4xf32>, vector<2x5xf32> -> vector<2x5xf32>
    %cst_29 = arith.constant dense<0xFF800000> : vector<2xf32>
    %42 = vector.multi_reduction <maximumf>, %41, %cst_29 [1] : vector<2x5xf32> to vector<2xf32>
    %43 = vector.shape_cast %42 : vector<2xf32> to vector<2x1xf32>
    %44 = vector.broadcast %43 : vector<2x1xf32> to vector<2x5xf32>
    %45 = arith.subf %41, %44 : vector<2x5xf32>
    %46 = math.exp %45 : vector<2x5xf32>
    %cst_30 = arith.constant dense<0.000000e+00> : vector<2xf32>
    %47 = vector.multi_reduction <add>, %46, %cst_30 [1] : vector<2x5xf32> to vector<2xf32>
    %48 = vector.shape_cast %47 : vector<2xf32> to vector<2x1xf32>
    %49 = tpu.reciprocal %48 {approx = true} : vector<2x1xf32> -> vector<2x1xf32>
    %50 = vector.broadcast %49 : vector<2x1xf32> to vector<2x5xf32>
    %51 = arith.mulf %46, %50 : vector<2x5xf32>
    %cst_31 = arith.constant dense<0.000000e+00> : vector<2x4xf32>
    %52 = tpu.matmul %51, %40, %cst_31 {dimension_numbers = #tpu.dot_dimension_numbers<[1], [0], [0], [1], [0, 0, 1, 1], [], []>} : vector<2x5xf32>, vector<5x4xf32>, vector<2x4xf32> -> vector<2x4xf32>
    %53 = vector.extract_strided_slice %2 {offsets = [0, 4], sizes = [2, 4], strides = [1, 1]} : vector<2x40xf32> to vector<2x4xf32>
    %54 = vector.extract_strided_slice %36 {offsets = [0, 4], sizes = [5, 4], strides = [1, 1]} : vector<5x40xf32> to vector<5x4xf32>
    %55 = vector.extract_strided_slice %37 {offsets = [0, 4], sizes = [5, 4], strides = [1, 1]} : vector<5x40xf32> to vector<5x4xf32>
    %cst_32 = arith.constant dense<0.000000e+00> : vector<2x5xf32>
    %56 = tpu.matmul %53, %54, %cst_32 {dimension_numbers = #tpu.dot_dimension_numbers<[1], [1], [0], [0], [0, 0, 1, 0], [], []>} : vector<2x4xf32>, vector<5x4xf32>, vector<2x5xf32> -> vector<2x5xf32>
    %cst_33 = arith.constant dense<0xFF800000> : vector<2xf32>
    %57 = vector.multi_reduction <maximumf>, %56, %cst_33 [1] : vector<2x5xf32> to vector<2xf32>
    %58 = vector.shape_cast %57 : vector<2xf32> to vector<2x1xf32>
    %59 = vector.broadcast %58 : vector<2x1xf32> to vector<2x5xf32>
    %60 = arith.subf %56, %59 : vector<2x5xf32>
    %61 = math.exp %60 : vector<2x5xf32>
    %cst_34 = arith.constant dense<0.000000e+00> : vector<2xf32>
    %62 = vector.multi_reduction <add>, %61, %cst_34 [1] : vector<2x5xf32> to vector<2xf32>
    %63 = vector.shape_cast %62 : vector<2xf32> to vector<2x1xf32>
    %64 = tpu.reciprocal %63 {approx = true} : vector<2x1xf32> -> vector<2x1xf32>
    %65 = vector.broadcast %64 : vector<2x1xf32> to vector<2x5xf32>
    %66 = arith.mulf %61, %65 : vector<2x5xf32>
    %cst_35 = arith.constant dense<0.000000e+00> : vector<2x4xf32>
    %67 = tpu.matmul %66, %55, %cst_35 {dimension_numbers = #tpu.dot_dimension_numbers<[1], [0], [0], [1], [0, 0, 1, 1], [], []>} : vector<2x5xf32>, vector<5x4xf32>, vector<2x4xf32> -> vector<2x4xf32>
    %68 = vector.extract_strided_slice %2 {offsets = [0, 8], sizes = [2, 4], strides = [1, 1]} : vector<2x40xf32> to vector<2x4xf32>
    %69 = vector.extract_strided_slice %36 {offsets = [0, 8], sizes = [5, 4], strides = [1, 1]} : vector<5x40xf32> to vector<5x4xf32>
    %70 = vector.extract_strided_slice %37 {offsets = [0, 8], sizes = [5, 4], strides = [1, 1]} : vector<5x40xf32> to vector<5x4xf32>
    %cst_36 = arith.constant dense<0.000000e+00> : vector<2x5xf32>
    %71 = tpu.matmul %68, %69, %cst_36 {dimension_numbers = #tpu.dot_dimension_numbers<[1], [1], [0], [0], [0, 0, 1, 0], [], []>} : vector<2x4xf32>, vector<5x4xf32>, vector<2x5xf32> -> vector<2x5xf32>
    %cst_37 = arith.constant dense<0xFF800000> : vector<2xf32>
    %72 = vector.multi_reduction <maximumf>, %71, %cst_37 [1] : vector<2x5xf32> to vector<2xf32>
    %73 = vector.shape_cast %72 : vector<2xf32> to vector<2x1xf32>
    %74 = vector.broadcast %73 : vector<2x1xf32> to vector<2x5xf32>
    %75 = arith.subf %71, %74 : vector<2x5xf32>
    %76 = math.exp %75 : vector<2x5xf32>
    %cst_38 = arith.constant dense<0.000000e+00> : vector<2xf32>
    %77 = vector.multi_reduction <add>, %76, %cst_38 [1] : vector<2x5xf32> to vector<2xf32>
    %78 = vector.shape_cast %77 : vector<2xf32> to vector<2x1xf32>
    %79 = tpu.reciprocal %78 {approx = true} : vector<2x1xf32> -> vector<2x1xf32>
    %80 = vector.broadcast %79 : vector<2x1xf32> to vector<2x5xf32>
    %81 = arith.mulf %76, %80 : vector<2x5xf32>
    %cst_39 = arith.constant dense<0.000000e+00> : vector<2x4xf32>
    %82 = tpu.matmul %81, %70, %cst_39 {dimension_numbers = #tpu.dot_dimension_numbers<[1], [0], [0], [1], [0, 0, 1, 1], [], []>} : vector<2x5xf32>, vector<5x4xf32>, vector<2x4xf32> -> vector<2x4xf32>
    %83 = vector.extract_strided_slice %2 {offsets = [0, 12], sizes = [2, 4], strides = [1, 1]} : vector<2x40xf32> to vector<2x4xf32>
    %84 = vector.extract_strided_slice %36 {offsets = [0, 12], sizes = [5, 4], strides = [1, 1]} : vector<5x40xf32> to vector<5x4xf32>
    %85 = vector.extract_strided_slice %37 {offsets = [0, 12], sizes = [5, 4], strides = [1, 1]} : vector<5x40xf32> to vector<5x4xf32>
    %cst_40 = arith.constant dense<0.000000e+00> : vector<2x5xf32>
    %86 = tpu.matmul %83, %84, %cst_40 {dimension_numbers = #tpu.dot_dimension_numbers<[1], [1], [0], [0], [0, 0, 1, 0], [], []>} : vector<2x4xf32>, vector<5x4xf32>, vector<2x5xf32> -> vector<2x5xf32>
    %cst_41 = arith.constant dense<0xFF800000> : vector<2xf32>
    %87 = vector.multi_reduction <maximumf>, %86, %cst_41 [1] : vector<2x5xf32> to vector<2xf32>
    %88 = vector.shape_cast %87 : vector<2xf32> to vector<2x1xf32>
    %89 = vector.broadcast %88 : vector<2x1xf32> to vector<2x5xf32>
    %90 = arith.subf %86, %89 : vector<2x5xf32>
    %91 = math.exp %90 : vector<2x5xf32>
    %cst_42 = arith.constant dense<0.000000e+00> : vector<2xf32>
    %92 = vector.multi_reduction <add>, %91, %cst_42 [1] : vector<2x5xf32> to vector<2xf32>
    %93 = vector.shape_cast %92 : vector<2xf32> to vector<2x1xf32>
    %94 = tpu.reciprocal %93 {approx = true} : vector<2x1xf32> -> vector<2x1xf32>
    %95 = vector.broadcast %94 : vector<2x1xf32> to vector<2x5xf32>
    %96 = arith.mulf %91, %95 : vector<2x5xf32>
    %cst_43 = arith.constant dense<0.000000e+00> : vector<2x4xf32>
    %97 = tpu.matmul %96, %85, %cst_43 {dimension_numbers = #tpu.dot_dimension_numbers<[1], [0], [0], [1], [0, 0, 1, 1], [], []>} : vector<2x5xf32>, vector<5x4xf32>, vector<2x4xf32> -> vector<2x4xf32>
    %98 = vector.extract_strided_slice %2 {offsets = [0, 16], sizes = [2, 4], strides = [1, 1]} : vector<2x40xf32> to vector<2x4xf32>
    %99 = vector.extract_strided_slice %36 {offsets = [0, 16], sizes = [5, 4], strides = [1, 1]} : vector<5x40xf32> to vector<5x4xf32>
    %100 = vector.extract_strided_slice %37 {offsets = [0, 16], sizes = [5, 4], strides = [1, 1]} : vector<5x40xf32> to vector<5x4xf32>
    %cst_44 = arith.constant dense<0.000000e+00> : vector<2x5xf32>
    %101 = tpu.matmul %98, %99, %cst_44 {dimension_numbers = #tpu.dot_dimension_numbers<[1], [1], [0], [0], [0, 0, 1, 0], [], []>} : vector<2x4xf32>, vector<5x4xf32>, vector<2x5xf32> -> vector<2x5xf32>
    %cst_45 = arith.constant dense<0xFF800000> : vector<2xf32>
    %102 = vector.multi_reduction <maximumf>, %101, %cst_45 [1] : vector<2x5xf32> to vector<2xf32>
    %103 = vector.shape_cast %102 : vector<2xf32> to vector<2x1xf32>
    %104 = vector.broadcast %103 : vector<2x1xf32> to vector<2x5xf32>
    %105 = arith.subf %101, %104 : vector<2x5xf32>
    %106 = math.exp %105 : vector<2x5xf32>
    %cst_46 = arith.constant dense<0.000000e+00> : vector<2xf32>
    %107 = vector.multi_reduction <add>, %106, %cst_46 [1] : vector<2x5xf32> to vector<2xf32>
    %108 = vector.shape_cast %107 : vector<2xf32> to vector<2x1xf32>
    %109 = tpu.reciprocal %108 {approx = true} : vector<2x1xf32> -> vector<2x1xf32>
    %110 = vector.broadcast %109 : vector<2x1xf32> to vector<2x5xf32>
    %111 = arith.mulf %106, %110 : vector<2x5xf32>
    %cst_47 = arith.constant dense<0.000000e+00> : vector<2x4xf32>
    %112 = tpu.matmul %111, %100, %cst_47 {dimension_numbers = #tpu.dot_dimension_numbers<[1], [0], [0], [1], [0, 0, 1, 1], [], []>} : vector<2x5xf32>, vector<5x4xf32>, vector<2x4xf32> -> vector<2x4xf32>
    %113 = vector.extract_strided_slice %2 {offsets = [0, 20], sizes = [2, 4], strides = [1, 1]} : vector<2x40xf32> to vector<2x4xf32>
    %114 = vector.extract_strided_slice %36 {offsets = [0, 20], sizes = [5, 4], strides = [1, 1]} : vector<5x40xf32> to vector<5x4xf32>
    %115 = vector.extract_strided_slice %37 {offsets = [0, 20], sizes = [5, 4], strides = [1, 1]} : vector<5x40xf32> to vector<5x4xf32>
    %cst_48 = arith.constant dense<0.000000e+00> : vector<2x5xf32>
    %116 = tpu.matmul %113, %114, %cst_48 {dimension_numbers = #tpu.dot_dimension_numbers<[1], [1], [0], [0], [0, 0, 1, 0], [], []>} : vector<2x4xf32>, vector<5x4xf32>, vector<2x5xf32> -> vector<2x5xf32>
    %cst_49 = arith.constant dense<0xFF800000> : vector<2xf32>
    %117 = vector.multi_reduction <maximumf>, %116, %cst_49 [1] : vector<2x5xf32> to vector<2xf32>
    %118 = vector.shape_cast %117 : vector<2xf32> to vector<2x1xf32>
    %119 = vector.broadcast %118 : vector<2x1xf32> to vector<2x5xf32>
    %120 = arith.subf %116, %119 : vector<2x5xf32>
    %121 = math.exp %120 : vector<2x5xf32>
    %cst_50 = arith.constant dense<0.000000e+00> : vector<2xf32>
    %122 = vector.multi_reduction <add>, %121, %cst_50 [1] : vector<2x5xf32> to vector<2xf32>
    %123 = vector.shape_cast %122 : vector<2xf32> to vector<2x1xf32>
    %124 = tpu.reciprocal %123 {approx = true} : vector<2x1xf32> -> vector<2x1xf32>
    %125 = vector.broadcast %124 : vector<2x1xf32> to vector<2x5xf32>
    %126 = arith.mulf %121, %125 : vector<2x5xf32>
    %cst_51 = arith.constant dense<0.000000e+00> : vector<2x4xf32>
    %127 = tpu.matmul %126, %115, %cst_51 {dimension_numbers = #tpu.dot_dimension_numbers<[1], [0], [0], [1], [0, 0, 1, 1], [], []>} : vector<2x5xf32>, vector<5x4xf32>, vector<2x4xf32> -> vector<2x4xf32>
    %128 = vector.extract_strided_slice %2 {offsets = [0, 24], sizes = [2, 4], strides = [1, 1]} : vector<2x40xf32> to vector<2x4xf32>
    %129 = vector.extract_strided_slice %36 {offsets = [0, 24], sizes = [5, 4], strides = [1, 1]} : vector<5x40xf32> to vector<5x4xf32>
    %130 = vector.extract_strided_slice %37 {offsets = [0, 24], sizes = [5, 4], strides = [1, 1]} : vector<5x40xf32> to vector<5x4xf32>
    %cst_52 = arith.constant dense<0.000000e+00> : vector<2x5xf32>
    %131 = tpu.matmul %128, %129, %cst_52 {dimension_numbers = #tpu.dot_dimension_numbers<[1], [1], [0], [0], [0, 0, 1, 0], [], []>} : vector<2x4xf32>, vector<5x4xf32>, vector<2x5xf32> -> vector<2x5xf32>
    %cst_53 = arith.constant dense<0xFF800000> : vector<2xf32>
    %132 = vector.multi_reduction <maximumf>, %131, %cst_53 [1] : vector<2x5xf32> to vector<2xf32>
    %133 = vector.shape_cast %132 : vector<2xf32> to vector<2x1xf32>
    %134 = vector.broadcast %133 : vector<2x1xf32> to vector<2x5xf32>
    %135 = arith.subf %131, %134 : vector<2x5xf32>
    %136 = math.exp %135 : vector<2x5xf32>
    %cst_54 = arith.constant dense<0.000000e+00> : vector<2xf32>
    %137 = vector.multi_reduction <add>, %136, %cst_54 [1] : vector<2x5xf32> to vector<2xf32>
    %138 = vector.shape_cast %137 : vector<2xf32> to vector<2x1xf32>
    %139 = tpu.reciprocal %138 {approx = true} : vector<2x1xf32> -> vector<2x1xf32>
    %140 = vector.broadcast %139 : vector<2x1xf32> to vector<2x5xf32>
    %141 = arith.mulf %136, %140 : vector<2x5xf32>
    %cst_55 = arith.constant dense<0.000000e+00> : vector<2x4xf32>
    %142 = tpu.matmul %141, %130, %cst_55 {dimension_numbers = #tpu.dot_dimension_numbers<[1], [0], [0], [1], [0, 0, 1, 1], [], []>} : vector<2x5xf32>, vector<5x4xf32>, vector<2x4xf32> -> vector<2x4xf32>
    %143 = vector.extract_strided_slice %2 {offsets = [0, 28], sizes = [2, 4], strides = [1, 1]} : vector<2x40xf32> to vector<2x4xf32>
    %144 = vector.extract_strided_slice %36 {offsets = [0, 28], sizes = [5, 4], strides = [1, 1]} : vector<5x40xf32> to vector<5x4xf32>
    %145 = vector.extract_strided_slice %37 {offsets = [0, 28], sizes = [5, 4], strides = [1, 1]} : vector<5x40xf32> to vector<5x4xf32>
    %cst_56 = arith.constant dense<0.000000e+00> : vector<2x5xf32>
    %146 = tpu.matmul %143, %144, %cst_56 {dimension_numbers = #tpu.dot_dimension_numbers<[1], [1], [0], [0], [0, 0, 1, 0], [], []>} : vector<2x4xf32>, vector<5x4xf32>, vector<2x5xf32> -> vector<2x5xf32>
    %cst_57 = arith.constant dense<0xFF800000> : vector<2xf32>
    %147 = vector.multi_reduction <maximumf>, %146, %cst_57 [1] : vector<2x5xf32> to vector<2xf32>
    %148 = vector.shape_cast %147 : vector<2xf32> to vector<2x1xf32>
    %149 = vector.broadcast %148 : vector<2x1xf32> to vector<2x5xf32>
    %150 = arith.subf %146, %149 : vector<2x5xf32>
    %151 = math.exp %150 : vector<2x5xf32>
    %cst_58 = arith.constant dense<0.000000e+00> : vector<2xf32>
    %152 = vector.multi_reduction <add>, %151, %cst_58 [1] : vector<2x5xf32> to vector<2xf32>
    %153 = vector.shape_cast %152 : vector<2xf32> to vector<2x1xf32>
    %154 = tpu.reciprocal %153 {approx = true} : vector<2x1xf32> -> vector<2x1xf32>
    %155 = vector.broadcast %154 : vector<2x1xf32> to vector<2x5xf32>
    %156 = arith.mulf %151, %155 : vector<2x5xf32>
    %cst_59 = arith.constant dense<0.000000e+00> : vector<2x4xf32>
    %157 = tpu.matmul %156, %145, %cst_59 {dimension_numbers = #tpu.dot_dimension_numbers<[1], [0], [0], [1], [0, 0, 1, 1], [], []>} : vector<2x5xf32>, vector<5x4xf32>, vector<2x4xf32> -> vector<2x4xf32>
    %158 = vector.extract_strided_slice %2 {offsets = [0, 32], sizes = [2, 4], strides = [1, 1]} : vector<2x40xf32> to vector<2x4xf32>
    %159 = vector.extract_strided_slice %36 {offsets = [0, 32], sizes = [5, 4], strides = [1, 1]} : vector<5x40xf32> to vector<5x4xf32>
    %160 = vector.extract_strided_slice %37 {offsets = [0, 32], sizes = [5, 4], strides = [1, 1]} : vector<5x40xf32> to vector<5x4xf32>
    %cst_60 = arith.constant dense<0.000000e+00> : vector<2x5xf32>
    %161 = tpu.matmul %158, %159, %cst_60 {dimension_numbers = #tpu.dot_dimension_numbers<[1], [1], [0], [0], [0, 0, 1, 0], [], []>} : vector<2x4xf32>, vector<5x4xf32>, vector<2x5xf32> -> vector<2x5xf32>
    %cst_61 = arith.constant dense<0xFF800000> : vector<2xf32>
    %162 = vector.multi_reduction <maximumf>, %161, %cst_61 [1] : vector<2x5xf32> to vector<2xf32>
    %163 = vector.shape_cast %162 : vector<2xf32> to vector<2x1xf32>
    %164 = vector.broadcast %163 : vector<2x1xf32> to vector<2x5xf32>
    %165 = arith.subf %161, %164 : vector<2x5xf32>
    %166 = math.exp %165 : vector<2x5xf32>
    %cst_62 = arith.constant dense<0.000000e+00> : vector<2xf32>
    %167 = vector.multi_reduction <add>, %166, %cst_62 [1] : vector<2x5xf32> to vector<2xf32>
    %168 = vector.shape_cast %167 : vector<2xf32> to vector<2x1xf32>
    %169 = tpu.reciprocal %168 {approx = true} : vector<2x1xf32> -> vector<2x1xf32>
    %170 = vector.broadcast %169 : vector<2x1xf32> to vector<2x5xf32>
    %171 = arith.mulf %166, %170 : vector<2x5xf32>
    %cst_63 = arith.constant dense<0.000000e+00> : vector<2x4xf32>
    %172 = tpu.matmul %171, %160, %cst_63 {dimension_numbers = #tpu.dot_dimension_numbers<[1], [0], [0], [1], [0, 0, 1, 1], [], []>} : vector<2x5xf32>, vector<5x4xf32>, vector<2x4xf32> -> vector<2x4xf32>
    %173 = vector.extract_strided_slice %2 {offsets = [0, 36], sizes = [2, 4], strides = [1, 1]} : vector<2x40xf32> to vector<2x4xf32>
    %174 = vector.extract_strided_slice %36 {offsets = [0, 36], sizes = [5, 4], strides = [1, 1]} : vector<5x40xf32> to vector<5x4xf32>
    %175 = vector.extract_strided_slice %37 {offsets = [0, 36], sizes = [5, 4], strides = [1, 1]} : vector<5x40xf32> to vector<5x4xf32>
    %cst_64 = arith.constant dense<0.000000e+00> : vector<2x5xf32>
    %176 = tpu.matmul %173, %174, %cst_64 {dimension_numbers = #tpu.dot_dimension_numbers<[1], [1], [0], [0], [0, 0, 1, 0], [], []>} : vector<2x4xf32>, vector<5x4xf32>, vector<2x5xf32> -> vector<2x5xf32>
    %cst_65 = arith.constant dense<0xFF800000> : vector<2xf32>
    %177 = vector.multi_reduction <maximumf>, %176, %cst_65 [1] : vector<2x5xf32> to vector<2xf32>
    %178 = vector.shape_cast %177 : vector<2xf32> to vector<2x1xf32>
    %179 = vector.broadcast %178 : vector<2x1xf32> to vector<2x5xf32>
    %180 = arith.subf %176, %179 : vector<2x5xf32>
    %181 = math.exp %180 : vector<2x5xf32>
    %cst_66 = arith.constant dense<0.000000e+00> : vector<2xf32>
    %182 = vector.multi_reduction <add>, %181, %cst_66 [1] : vector<2x5xf32> to vector<2xf32>
    %183 = vector.shape_cast %182 : vector<2xf32> to vector<2x1xf32>
    %184 = tpu.reciprocal %183 {approx = true} : vector<2x1xf32> -> vector<2x1xf32>
    %185 = vector.broadcast %184 : vector<2x1xf32> to vector<2x5xf32>
    %186 = arith.mulf %181, %185 : vector<2x5xf32>
    %cst_67 = arith.constant dense<0.000000e+00> : vector<2x4xf32>
    %187 = tpu.matmul %186, %175, %cst_67 {dimension_numbers = #tpu.dot_dimension_numbers<[1], [0], [0], [1], [0, 0, 1, 1], [], []>} : vector<2x5xf32>, vector<5x4xf32>, vector<2x4xf32> -> vector<2x4xf32>
    %188 = tpu.concatenate %52, %67, %82, %97, %112, %127, %142, %157, %172, %187 in 1 : vector<2x4xf32>, vector<2x4xf32>, vector<2x4xf32>, vector<2x4xf32>, vector<2x4xf32>, vector<2x4xf32>, vector<2x4xf32>, vector<2x4xf32>, vector<2x4xf32>, vector<2x4xf32> -> vector<2x40xf32>
    %cst_68 = arith.constant dense<0.000000e+00> : vector<2x40xf32>
    %189 = tpu.matmul %188, %4, %cst_68 {dimension_numbers = #tpu.dot_dimension_numbers<[1], [0], [0], [1], [0, 0, 1, 1], [], []>} : vector<2x40xf32>, vector<40x40xf32>, vector<2x40xf32> -> vector<2x40xf32>
    %cst_69 = arith.constant dense<0.000000e+00> : vector<2xf32>
    %190 = vector.multi_reduction <add>, %189, %cst_69 [1] : vector<2x40xf32> to vector<2xf32>
    %191 = vector.shape_cast %190 : vector<2xf32> to vector<2x1xf32>
    %cst_70 = arith.constant 4.000000e+01 : f32
    %192 = vector.broadcast %cst_70 : f32 to vector<2x1xf32>
    %193 = arith.divf %191, %192 : vector<2x1xf32>
    %194 = vector.broadcast %193 : vector<2x1xf32> to vector<2x40xf32>
    %195 = arith.subf %189, %194 : vector<2x40xf32>
    %196 = arith.mulf %195, %195 : vector<2x40xf32>
    %cst_71 = arith.constant dense<0.000000e+00> : vector<2xf32>
    %197 = vector.multi_reduction <add>, %196, %cst_71 [1] : vector<2x40xf32> to vector<2xf32>
    %198 = vector.shape_cast %197 : vector<2xf32> to vector<2x1xf32>
    %cst_72 = arith.constant 4.000000e+01 : f32
    %199 = vector.broadcast %cst_72 : f32 to vector<2x1xf32>
    %200 = arith.divf %198, %199 : vector<2x1xf32>
    %201 = vector.broadcast %193 : vector<2x1xf32> to vector<2x40xf32>
    %202 = arith.subf %189, %201 : vector<2x40xf32>
    %cst_73 = arith.constant 9.99999997E-7 : f32
    %203 = vector.broadcast %cst_73 : f32 to vector<2x1xf32>
    %204 = arith.addf %200, %203 : vector<2x1xf32>
    %205 = math.rsqrt %204 : vector<2x1xf32>
    %206 = vector.broadcast %205 : vector<2x1xf32> to vector<2x40xf32>
    %207 = arith.mulf %202, %206 : vector<2x40xf32>
    %208 = vector.broadcast %7 : vector<1x40xf32> to vector<2x40xf32>
    %209 = arith.mulf %207, %208 : vector<2x40xf32>
    %210 = vector.broadcast %8 : vector<1x40xf32> to vector<2x40xf32>
    %211 = arith.addf %209, %210 : vector<2x40xf32>
    %c0_74 = arith.constant 0 : index
    %c0_75 = arith.constant 0 : index
    %c0_76 = arith.constant 0 : index
    %212 = vector.load %arg12[%c0_74, %c0_75, %c0_76] : memref<2x2x40xf32, #tpu.memory_space<vmem>>, vector<1x2x40xf32>
    %213 = vector.shape_cast %212 : vector<1x2x40xf32> to vector<2x40xf32>
    %214 = vector.shape_cast %211 : vector<2x40xf32> to vector<1x2x40xf32>
    tpu.vector_store %arg12[%c0_74, %c0_75, %c0_76], %214 {strides = array<i32>} : memref<2x2x40xf32, #tpu.memory_space<vmem>>, vector<1x2x40xf32>,
    %cst_77 = arith.constant dense<0.000000e+00> : vector<2x8xf32>
    %215 = tpu.matmul %211, %9, %cst_77 {dimension_numbers = #tpu.dot_dimension_numbers<[1], [0], [0], [1], [0, 0, 1, 1], [], []>} : vector<2x40xf32>, vector<40x8xf32>, vector<2x8xf32> -> vector<2x8xf32>
    %216 = vector.broadcast %10 : vector<1x8xf32> to vector<2x8xf32>
    %217 = arith.addf %215, %216 : vector<2x8xf32>
    %218 = vector.extract_strided_slice %217 {offsets = [0, 0], sizes = [1, 3], strides = [1, 1]} : vector<2x8xf32> to vector<1x3xf32>
    %219 = vector.extract_strided_slice %217 {offsets = [1, 3], sizes = [1, 5], strides = [1, 1]} : vector<2x8xf32> to vector<1x5xf32>
    %220 = tpu.concatenate %218, %219 in 1 : vector<1x3xf32>, vector<1x5xf32> -> vector<1x8xf32>
    %c0_78 = arith.constant 0 : index
    %c0_79 = arith.constant 0 : index
    %221 = vector.load %arg13[%c0_78, %c0_79] : memref<2x8xf32, #tpu.memory_space<vmem>>, vector<1x8xf32>
    tpu.vector_store %arg13[%c0_78, %c0_79], %220 {strides = array<i32>} : memref<2x8xf32, #tpu.memory_space<vmem>>, vector<1x8xf32>,
    %c1 = arith.constant 1 : index
    %c0_80 = arith.constant 0 : index
    %c0_81 = arith.constant 0 : index
    %222 = vector.load %arg1[%c1, %c0_80, %c0_81] : memref<2x5x32xf32, #tpu.memory_space<vmem>>, vector<1x5x32xf32>
    %223 = vector.shape_cast %222 : vector<1x5x32xf32> to vector<5x32xf32>
    %cst_82 = arith.constant dense<0.000000e+00> : vector<5xf32>
    %224 = vector.multi_reduction <add>, %223, %cst_82 [1] : vector<5x32xf32> to vector<5xf32>
    %225 = vector.shape_cast %224 : vector<5xf32> to vector<5x1xf32>
    %cst_83 = arith.constant 3.200000e+01 : f32
    %226 = vector.broadcast %cst_83 : f32 to vector<5x1xf32>
    %227 = arith.divf %225, %226 : vector<5x1xf32>
    %228 = vector.broadcast %227 : vector<5x1xf32> to vector<5x32xf32>
    %229 = arith.subf %223, %228 : vector<5x32xf32>
    %230 = arith.mulf %229, %229 : vector<5x32xf32>
    %cst_84 = arith.constant dense<0.000000e+00> : vector<5xf32>
    %231 = vector.multi_reduction <add>, %230, %cst_84 [1] : vector<5x32xf32> to vector<5xf32>
    %232 = vector.shape_cast %231 : vector<5xf32> to vector<5x1xf32>
    %cst_85 = arith.constant 3.200000e+01 : f32
    %233 = vector.broadcast %cst_85 : f32 to vector<5x1xf32>
    %234 = arith.divf %232, %233 : vector<5x1xf32>
    %235 = vector.broadcast %227 : vector<5x1xf32> to vector<5x32xf32>
    %236 = arith.subf %223, %235 : vector<5x32xf32>
    %cst_86 = arith.constant 9.99999997E-7 : f32
    %237 = vector.broadcast %cst_86 : f32 to vector<5x1xf32>
    %238 = arith.addf %234, %237 : vector<5x1xf32>
    %239 = math.rsqrt %238 : vector<5x1xf32>
    %240 = vector.broadcast %239 : vector<5x1xf32> to vector<5x32xf32>
    %241 = arith.mulf %236, %240 : vector<5x32xf32>
    %242 = vector.broadcast %5 : vector<1x32xf32> to vector<5x32xf32>
    %243 = arith.mulf %241, %242 : vector<5x32xf32>
    %244 = vector.broadcast %6 : vector<1x32xf32> to vector<5x32xf32>
    %245 = arith.addf %243, %244 : vector<5x32xf32>
    %cst_87 = arith.constant dense<0.000000e+00> : vector<5x80xf32>
    %246 = tpu.matmul %245, %3, %cst_87 {dimension_numbers = #tpu.dot_dimension_numbers<[1], [0], [0], [1], [0, 0, 1, 1], [], []>} : vector<5x32xf32>, vector<32x80xf32>, vector<5x80xf32> -> vector<5x80xf32>
    %247 = vector.extract_strided_slice %246 {offsets = [0, 0], sizes = [5, 40], strides = [1, 1]} : vector<5x80xf32> to vector<5x40xf32>
    %248 = vector.extract_strided_slice %246 {offsets = [0, 40], sizes = [5, 40], strides = [1, 1]} : vector<5x80xf32> to vector<5x40xf32>
    %249 = vector.extract_strided_slice %2 {offsets = [0, 0], sizes = [2, 4], strides = [1, 1]} : vector<2x40xf32> to vector<2x4xf32>
    %250 = vector.extract_strided_slice %247 {offsets = [0, 0], sizes = [5, 4], strides = [1, 1]} : vector<5x40xf32> to vector<5x4xf32>
    %251 = vector.extract_strided_slice %248 {offsets = [0, 0], sizes = [5, 4], strides = [1, 1]} : vector<5x40xf32> to vector<5x4xf32>
    %cst_88 = arith.constant dense<0.000000e+00> : vector<2x5xf32>
    %252 = tpu.matmul %249, %250, %cst_88 {dimension_numbers = #tpu.dot_dimension_numbers<[1], [1], [0], [0], [0, 0, 1, 0], [], []>} : vector<2x4xf32>, vector<5x4xf32>, vector<2x5xf32> -> vector<2x5xf32>
    %cst_89 = arith.constant dense<0xFF800000> : vector<2xf32>
    %253 = vector.multi_reduction <maximumf>, %252, %cst_89 [1] : vector<2x5xf32> to vector<2xf32>
    %254 = vector.shape_cast %253 : vector<2xf32> to vector<2x1xf32>
    %255 = vector.broadcast %254 : vector<2x1xf32> to vector<2x5xf32>
    %256 = arith.subf %252, %255 : vector<2x5xf32>
    %257 = math.exp %256 : vector<2x5xf32>
    %cst_90 = arith.constant dense<0.000000e+00> : vector<2xf32>
    %258 = vector.multi_reduction <add>, %257, %cst_90 [1] : vector<2x5xf32> to vector<2xf32>
    %259 = vector.shape_cast %258 : vector<2xf32> to vector<2x1xf32>
    %260 = tpu.reciprocal %259 {approx = true} : vector<2x1xf32> -> vector<2x1xf32>
    %261 = vector.broadcast %260 : vector<2x1xf32> to vector<2x5xf32>
    %262 = arith.mulf %257, %261 : vector<2x5xf32>
    %cst_91 = arith.constant dense<0.000000e+00> : vector<2x4xf32>
    %263 = tpu.matmul %262, %251, %cst_91 {dimension_numbers = #tpu.dot_dimension_numbers<[1], [0], [0], [1], [0, 0, 1, 1], [], []>} : vector<2x5xf32>, vector<5x4xf32>, vector<2x4xf32> -> vector<2x4xf32>
    %264 = vector.extract_strided_slice %2 {offsets = [0, 4], sizes = [2, 4], strides = [1, 1]} : vector<2x40xf32> to vector<2x4xf32>
    %265 = vector.extract_strided_slice %247 {offsets = [0, 4], sizes = [5, 4], strides = [1, 1]} : vector<5x40xf32> to vector<5x4xf32>
    %266 = vector.extract_strided_slice %248 {offsets = [0, 4], sizes = [5, 4], strides = [1, 1]} : vector<5x40xf32> to vector<5x4xf32>
    %cst_92 = arith.constant dense<0.000000e+00> : vector<2x5xf32>
    %267 = tpu.matmul %264, %265, %cst_92 {dimension_numbers = #tpu.dot_dimension_numbers<[1], [1], [0], [0], [0, 0, 1, 0], [], []>} : vector<2x4xf32>, vector<5x4xf32>, vector<2x5xf32> -> vector<2x5xf32>
    %cst_93 = arith.constant dense<0xFF800000> : vector<2xf32>
    %268 = vector.multi_reduction <maximumf>, %267, %cst_93 [1] : vector<2x5xf32> to vector<2xf32>
    %269 = vector.shape_cast %268 : vector<2xf32> to vector<2x1xf32>
    %270 = vector.broadcast %269 : vector<2x1xf32> to vector<2x5xf32>
    %271 = arith.subf %267, %270 : vector<2x5xf32>
    %272 = math.exp %271 : vector<2x5xf32>
    %cst_94 = arith.constant dense<0.000000e+00> : vector<2xf32>
    %273 = vector.multi_reduction <add>, %272, %cst_94 [1] : vector<2x5xf32> to vector<2xf32>
    %274 = vector.shape_cast %273 : vector<2xf32> to vector<2x1xf32>
    %275 = tpu.reciprocal %274 {approx = true} : vector<2x1xf32> -> vector<2x1xf32>
    %276 = vector.broadcast %275 : vector<2x1xf32> to vector<2x5xf32>
    %277 = arith.mulf %272, %276 : vector<2x5xf32>
    %cst_95 = arith.constant dense<0.000000e+00> : vector<2x4xf32>
    %278 = tpu.matmul %277, %266, %cst_95 {dimension_numbers = #tpu.dot_dimension_numbers<[1], [0], [0], [1], [0, 0, 1, 1], [], []>} : vector<2x5xf32>, vector<5x4xf32>, vector<2x4xf32> -> vector<2x4xf32>
    %279 = vector.extract_strided_slice %2 {offsets = [0, 8], sizes = [2, 4], strides = [1, 1]} : vector<2x40xf32> to vector<2x4xf32>
    %280 = vector.extract_strided_slice %247 {offsets = [0, 8], sizes = [5, 4], strides = [1, 1]} : vector<5x40xf32> to vector<5x4xf32>
    %281 = vector.extract_strided_slice %248 {offsets = [0, 8], sizes = [5, 4], strides = [1, 1]} : vector<5x40xf32> to vector<5x4xf32>
    %cst_96 = arith.constant dense<0.000000e+00> : vector<2x5xf32>
    %282 = tpu.matmul %279, %280, %cst_96 {dimension_numbers = #tpu.dot_dimension_numbers<[1], [1], [0], [0], [0, 0, 1, 0], [], []>} : vector<2x4xf32>, vector<5x4xf32>, vector<2x5xf32> -> vector<2x5xf32>
    %cst_97 = arith.constant dense<0xFF800000> : vector<2xf32>
    %283 = vector.multi_reduction <maximumf>, %282, %cst_97 [1] : vector<2x5xf32> to vector<2xf32>
    %284 = vector.shape_cast %283 : vector<2xf32> to vector<2x1xf32>
    %285 = vector.broadcast %284 : vector<2x1xf32> to vector<2x5xf32>
    %286 = arith.subf %282, %285 : vector<2x5xf32>
    %287 = math.exp %286 : vector<2x5xf32>
    %cst_98 = arith.constant dense<0.000000e+00> : vector<2xf32>
    %288 = vector.multi_reduction <add>, %287, %cst_98 [1] : vector<2x5xf32> to vector<2xf32>
    %289 = vector.shape_cast %288 : vector<2xf32> to vector<2x1xf32>
    %290 = tpu.reciprocal %289 {approx = true} : vector<2x1xf32> -> vector<2x1xf32>
    %291 = vector.broadcast %290 : vector<2x1xf32> to vector<2x5xf32>
    %292 = arith.mulf %287, %291 : vector<2x5xf32>
    %cst_99 = arith.constant dense<0.000000e+00> : vector<2x4xf32>
    %293 = tpu.matmul %292, %281, %cst_99 {dimension_numbers = #tpu.dot_dimension_numbers<[1], [0], [0], [1], [0, 0, 1, 1], [], []>} : vector<2x5xf32>, vector<5x4xf32>, vector<2x4xf32> -> vector<2x4xf32>
    %294 = vector.extract_strided_slice %2 {offsets = [0, 12], sizes = [2, 4], strides = [1, 1]} : vector<2x40xf32> to vector<2x4xf32>
    %295 = vector.extract_strided_slice %247 {offsets = [0, 12], sizes = [5, 4], strides = [1, 1]} : vector<5x40xf32> to vector<5x4xf32>
    %296 = vector.extract_strided_slice %248 {offsets = [0, 12], sizes = [5, 4], strides = [1, 1]} : vector<5x40xf32> to vector<5x4xf32>
    %cst_100 = arith.constant dense<0.000000e+00> : vector<2x5xf32>
    %297 = tpu.matmul %294, %295, %cst_100 {dimension_numbers = #tpu.dot_dimension_numbers<[1], [1], [0], [0], [0, 0, 1, 0], [], []>} : vector<2x4xf32>, vector<5x4xf32>, vector<2x5xf32> -> vector<2x5xf32>
    %cst_101 = arith.constant dense<0xFF800000> : vector<2xf32>
    %298 = vector.multi_reduction <maximumf>, %297, %cst_101 [1] : vector<2x5xf32> to vector<2xf32>
    %299 = vector.shape_cast %298 : vector<2xf32> to vector<2x1xf32>
    %300 = vector.broadcast %299 : vector<2x1xf32> to vector<2x5xf32>
    %301 = arith.subf %297, %300 : vector<2x5xf32>
    %302 = math.exp %301 : vector<2x5xf32>
    %cst_102 = arith.constant dense<0.000000e+00> : vector<2xf32>
    %303 = vector.multi_reduction <add>, %302, %cst_102 [1] : vector<2x5xf32> to vector<2xf32>
    %304 = vector.shape_cast %303 : vector<2xf32> to vector<2x1xf32>
    %305 = tpu.reciprocal %304 {approx = true} : vector<2x1xf32> -> vector<2x1xf32>
    %306 = vector.broadcast %305 : vector<2x1xf32> to vector<2x5xf32>
    %307 = arith.mulf %302, %306 : vector<2x5xf32>
    %cst_103 = arith.constant dense<0.000000e+00> : vector<2x4xf32>
    %308 = tpu.matmul %307, %296, %cst_103 {dimension_numbers = #tpu.dot_dimension_numbers<[1], [0], [0], [1], [0, 0, 1, 1], [], []>} : vector<2x5xf32>, vector<5x4xf32>, vector<2x4xf32> -> vector<2x4xf32>
    %309 = vector.extract_strided_slice %2 {offsets = [0, 16], sizes = [2, 4], strides = [1, 1]} : vector<2x40xf32> to vector<2x4xf32>
    %310 = vector.extract_strided_slice %247 {offsets = [0, 16], sizes = [5, 4], strides = [1, 1]} : vector<5x40xf32> to vector<5x4xf32>
    %311 = vector.extract_strided_slice %248 {offsets = [0, 16], sizes = [5, 4], strides = [1, 1]} : vector<5x40xf32> to vector<5x4xf32>
    %cst_104 = arith.constant dense<0.000000e+00> : vector<2x5xf32>
    %312 = tpu.matmul %309, %310, %cst_104 {dimension_numbers = #tpu.dot_dimension_numbers<[1], [1], [0], [0], [0, 0, 1, 0], [], []>} : vector<2x4xf32>, vector<5x4xf32>, vector<2x5xf32> -> vector<2x5xf32>
    %cst_105 = arith.constant dense<0xFF800000> : vector<2xf32>
    %313 = vector.multi_reduction <maximumf>, %312, %cst_105 [1] : vector<2x5xf32> to vector<2xf32>
    %314 = vector.shape_cast %313 : vector<2xf32> to vector<2x1xf32>
    %315 = vector.broadcast %314 : vector<2x1xf32> to vector<2x5xf32>
    %316 = arith.subf %312, %315 : vector<2x5xf32>
    %317 = math.exp %316 : vector<2x5xf32>
    %cst_106 = arith.constant dense<0.000000e+00> : vector<2xf32>
    %318 = vector.multi_reduction <add>, %317, %cst_106 [1] : vector<2x5xf32> to vector<2xf32>
    %319 = vector.shape_cast %318 : vector<2xf32> to vector<2x1xf32>
    %320 = tpu.reciprocal %319 {approx = true} : vector<2x1xf32> -> vector<2x1xf32>
    %321 = vector.broadcast %320 : vector<2x1xf32> to vector<2x5xf32>
    %322 = arith.mulf %317, %321 : vector<2x5xf32>
    %cst_107 = arith.constant dense<0.000000e+00> : vector<2x4xf32>
    %323 = tpu.matmul %322, %311, %cst_107 {dimension_numbers = #tpu.dot_dimension_numbers<[1], [0], [0], [1], [0, 0, 1, 1], [], []>} : vector<2x5xf32>, vector<5x4xf32>, vector<2x4xf32> -> vector<2x4xf32>
    %324 = vector.extract_strided_slice %2 {offsets = [0, 20], sizes = [2, 4], strides = [1, 1]} : vector<2x40xf32> to vector<2x4xf32>
    %325 = vector.extract_strided_slice %247 {offsets = [0, 20], sizes = [5, 4], strides = [1, 1]} : vector<5x40xf32> to vector<5x4xf32>
    %326 = vector.extract_strided_slice %248 {offsets = [0, 20], sizes = [5, 4], strides = [1, 1]} : vector<5x40xf32> to vector<5x4xf32>
    %cst_108 = arith.constant dense<0.000000e+00> : vector<2x5xf32>
    %327 = tpu.matmul %324, %325, %cst_108 {dimension_numbers = #tpu.dot_dimension_numbers<[1], [1], [0], [0], [0, 0, 1, 0], [], []>} : vector<2x4xf32>, vector<5x4xf32>, vector<2x5xf32> -> vector<2x5xf32>
    %cst_109 = arith.constant dense<0xFF800000> : vector<2xf32>
    %328 = vector.multi_reduction <maximumf>, %327, %cst_109 [1] : vector<2x5xf32> to vector<2xf32>
    %329 = vector.shape_cast %328 : vector<2xf32> to vector<2x1xf32>
    %330 = vector.broadcast %329 : vector<2x1xf32> to vector<2x5xf32>
    %331 = arith.subf %327, %330 : vector<2x5xf32>
    %332 = math.exp %331 : vector<2x5xf32>
    %cst_110 = arith.constant dense<0.000000e+00> : vector<2xf32>
    %333 = vector.multi_reduction <add>, %332, %cst_110 [1] : vector<2x5xf32> to vector<2xf32>
    %334 = vector.shape_cast %333 : vector<2xf32> to vector<2x1xf32>
    %335 = tpu.reciprocal %334 {approx = true} : vector<2x1xf32> -> vector<2x1xf32>
    %336 = vector.broadcast %335 : vector<2x1xf32> to vector<2x5xf32>
    %337 = arith.mulf %332, %336 : vector<2x5xf32>
    %cst_111 = arith.constant dense<0.000000e+00> : vector<2x4xf32>
    %338 = tpu.matmul %337, %326, %cst_111 {dimension_numbers = #tpu.dot_dimension_numbers<[1], [0], [0], [1], [0, 0, 1, 1], [], []>} : vector<2x5xf32>, vector<5x4xf32>, vector<2x4xf32> -> vector<2x4xf32>
    %339 = vector.extract_strided_slice %2 {offsets = [0, 24], sizes = [2, 4], strides = [1, 1]} : vector<2x40xf32> to vector<2x4xf32>
    %340 = vector.extract_strided_slice %247 {offsets = [0, 24], sizes = [5, 4], strides = [1, 1]} : vector<5x40xf32> to vector<5x4xf32>
    %341 = vector.extract_strided_slice %248 {offsets = [0, 24], sizes = [5, 4], strides = [1, 1]} : vector<5x40xf32> to vector<5x4xf32>
    %cst_112 = arith.constant dense<0.000000e+00> : vector<2x5xf32>
    %342 = tpu.matmul %339, %340, %cst_112 {dimension_numbers = #tpu.dot_dimension_numbers<[1], [1], [0], [0], [0, 0, 1, 0], [], []>} : vector<2x4xf32>, vector<5x4xf32>, vector<2x5xf32> -> vector<2x5xf32>
    %cst_113 = arith.constant dense<0xFF800000> : vector<2xf32>
    %343 = vector.multi_reduction <maximumf>, %342, %cst_113 [1] : vector<2x5xf32> to vector<2xf32>
    %344 = vector.shape_cast %343 : vector<2xf32> to vector<2x1xf32>
    %345 = vector.broadcast %344 : vector<2x1xf32> to vector<2x5xf32>
    %346 = arith.subf %342, %345 : vector<2x5xf32>
    %347 = math.exp %346 : vector<2x5xf32>
    %cst_114 = arith.constant dense<0.000000e+00> : vector<2xf32>
    %348 = vector.multi_reduction <add>, %347, %cst_114 [1] : vector<2x5xf32> to vector<2xf32>
    %349 = vector.shape_cast %348 : vector<2xf32> to vector<2x1xf32>
    %350 = tpu.reciprocal %349 {approx = true} : vector<2x1xf32> -> vector<2x1xf32>
    %351 = vector.broadcast %350 : vector<2x1xf32> to vector<2x5xf32>
    %352 = arith.mulf %347, %351 : vector<2x5xf32>
    %cst_115 = arith.constant dense<0.000000e+00> : vector<2x4xf32>
    %353 = tpu.matmul %352, %341, %cst_115 {dimension_numbers = #tpu.dot_dimension_numbers<[1], [0], [0], [1], [0, 0, 1, 1], [], []>} : vector<2x5xf32>, vector<5x4xf32>, vector<2x4xf32> -> vector<2x4xf32>
    %354 = vector.extract_strided_slice %2 {offsets = [0, 28], sizes = [2, 4], strides = [1, 1]} : vector<2x40xf32> to vector<2x4xf32>
    %355 = vector.extract_strided_slice %247 {offsets = [0, 28], sizes = [5, 4], strides = [1, 1]} : vector<5x40xf32> to vector<5x4xf32>
    %356 = vector.extract_strided_slice %248 {offsets = [0, 28], sizes = [5, 4], strides = [1, 1]} : vector<5x40xf32> to vector<5x4xf32>
    %cst_116 = arith.constant dense<0.000000e+00> : vector<2x5xf32>
    %357 = tpu.matmul %354, %355, %cst_116 {dimension_numbers = #tpu.dot_dimension_numbers<[1], [1], [0], [0], [0, 0, 1, 0], [], []>} : vector<2x4xf32>, vector<5x4xf32>, vector<2x5xf32> -> vector<2x5xf32>
    %cst_117 = arith.constant dense<0xFF800000> : vector<2xf32>
    %358 = vector.multi_reduction <maximumf>, %357, %cst_117 [1] : vector<2x5xf32> to vector<2xf32>
    %359 = vector.shape_cast %358 : vector<2xf32> to vector<2x1xf32>
    %360 = vector.broadcast %359 : vector<2x1xf32> to vector<2x5xf32>
    %361 = arith.subf %357, %360 : vector<2x5xf32>
    %362 = math.exp %361 : vector<2x5xf32>
    %cst_118 = arith.constant dense<0.000000e+00> : vector<2xf32>
    %363 = vector.multi_reduction <add>, %362, %cst_118 [1] : vector<2x5xf32> to vector<2xf32>
    %364 = vector.shape_cast %363 : vector<2xf32> to vector<2x1xf32>
    %365 = tpu.reciprocal %364 {approx = true} : vector<2x1xf32> -> vector<2x1xf32>
    %366 = vector.broadcast %365 : vector<2x1xf32> to vector<2x5xf32>
    %367 = arith.mulf %362, %366 : vector<2x5xf32>
    %cst_119 = arith.constant dense<0.000000e+00> : vector<2x4xf32>
    %368 = tpu.matmul %367, %356, %cst_119 {dimension_numbers = #tpu.dot_dimension_numbers<[1], [0], [0], [1], [0, 0, 1, 1], [], []>} : vector<2x5xf32>, vector<5x4xf32>, vector<2x4xf32> -> vector<2x4xf32>
    %369 = vector.extract_strided_slice %2 {offsets = [0, 32], sizes = [2, 4], strides = [1, 1]} : vector<2x40xf32> to vector<2x4xf32>
    %370 = vector.extract_strided_slice %247 {offsets = [0, 32], sizes = [5, 4], strides = [1, 1]} : vector<5x40xf32> to vector<5x4xf32>
    %371 = vector.extract_strided_slice %248 {offsets = [0, 32], sizes = [5, 4], strides = [1, 1]} : vector<5x40xf32> to vector<5x4xf32>
    %cst_120 = arith.constant dense<0.000000e+00> : vector<2x5xf32>
    %372 = tpu.matmul %369, %370, %cst_120 {dimension_numbers = #tpu.dot_dimension_numbers<[1], [1], [0], [0], [0, 0, 1, 0], [], []>} : vector<2x4xf32>, vector<5x4xf32>, vector<2x5xf32> -> vector<2x5xf32>
    %cst_121 = arith.constant dense<0xFF800000> : vector<2xf32>
    %373 = vector.multi_reduction <maximumf>, %372, %cst_121 [1] : vector<2x5xf32> to vector<2xf32>
    %374 = vector.shape_cast %373 : vector<2xf32> to vector<2x1xf32>
    %375 = vector.broadcast %374 : vector<2x1xf32> to vector<2x5xf32>
    %376 = arith.subf %372, %375 : vector<2x5xf32>
    %377 = math.exp %376 : vector<2x5xf32>
    %cst_122 = arith.constant dense<0.000000e+00> : vector<2xf32>
    %378 = vector.multi_reduction <add>, %377, %cst_122 [1] : vector<2x5xf32> to vector<2xf32>
    %379 = vector.shape_cast %378 : vector<2xf32> to vector<2x1xf32>
    %380 = tpu.reciprocal %379 {approx = true} : vector<2x1xf32> -> vector<2x1xf32>
    %381 = vector.broadcast %380 : vector<2x1xf32> to vector<2x5xf32>
    %382 = arith.mulf %377, %381 : vector<2x5xf32>
    %cst_123 = arith.constant dense<0.000000e+00> : vector<2x4xf32>
    %383 = tpu.matmul %382, %371, %cst_123 {dimension_numbers = #tpu.dot_dimension_numbers<[1], [0], [0], [1], [0, 0, 1, 1], [], []>} : vector<2x5xf32>, vector<5x4xf32>, vector<2x4xf32> -> vector<2x4xf32>
    %384 = vector.extract_strided_slice %2 {offsets = [0, 36], sizes = [2, 4], strides = [1, 1]} : vector<2x40xf32> to vector<2x4xf32>
    %385 = vector.extract_strided_slice %247 {offsets = [0, 36], sizes = [5, 4], strides = [1, 1]} : vector<5x40xf32> to vector<5x4xf32>
    %386 = vector.extract_strided_slice %248 {offsets = [0, 36], sizes = [5, 4], strides = [1, 1]} : vector<5x40xf32> to vector<5x4xf32>
    %cst_124 = arith.constant dense<0.000000e+00> : vector<2x5xf32>
    %387 = tpu.matmul %384, %385, %cst_124 {dimension_numbers = #tpu.dot_dimension_numbers<[1], [1], [0], [0], [0, 0, 1, 0], [], []>} : vector<2x4xf32>, vector<5x4xf32>, vector<2x5xf32> -> vector<2x5xf32>
    %cst_125 = arith.constant dense<0xFF800000> : vector<2xf32>
    %388 = vector.multi_reduction <maximumf>, %387, %cst_125 [1] : vector<2x5xf32> to vector<2xf32>
    %389 = vector.shape_cast %388 : vector<2xf32> to vector<2x1xf32>
    %390 = vector.broadcast %389 : vector<2x1xf32> to vector<2x5xf32>
    %391 = arith.subf %387, %390 : vector<2x5xf32>
    %392 = math.exp %391 : vector<2x5xf32>
    %cst_126 = arith.constant dense<0.000000e+00> : vector<2xf32>
    %393 = vector.multi_reduction <add>, %392, %cst_126 [1] : vector<2x5xf32> to vector<2xf32>
    %394 = vector.shape_cast %393 : vector<2xf32> to vector<2x1xf32>
    %395 = tpu.reciprocal %394 {approx = true} : vector<2x1xf32> -> vector<2x1xf32>
    %396 = vector.broadcast %395 : vector<2x1xf32> to vector<2x5xf32>
    %397 = arith.mulf %392, %396 : vector<2x5xf32>
    %cst_127 = arith.constant dense<0.000000e+00> : vector<2x4xf32>
    %398 = tpu.matmul %397, %386, %cst_127 {dimension_numbers = #tpu.dot_dimension_numbers<[1], [0], [0], [1], [0, 0, 1, 1], [], []>} : vector<2x5xf32>, vector<5x4xf32>, vector<2x4xf32> -> vector<2x4xf32>
    %399 = tpu.concatenate %263, %278, %293, %308, %323, %338, %353, %368, %383, %398 in 1 : vector<2x4xf32>, vector<2x4xf32>, vector<2x4xf32>, vector<2x4xf32>, vector<2x4xf32>, vector<2x4xf32>, vector<2x4xf32>, vector<2x4xf32>, vector<2x4xf32>, vector<2x4xf32> -> vector<2x40xf32>
    %cst_128 = arith.constant dense<0.000000e+00> : vector<2x40xf32>
    %400 = tpu.matmul %399, %4, %cst_128 {dimension_numbers = #tpu.dot_dimension_numbers<[1], [0], [0], [1], [0, 0, 1, 1], [], []>} : vector<2x40xf32>, vector<40x40xf32>, vector<2x40xf32> -> vector<2x40xf32>
    %cst_129 = arith.constant dense<0.000000e+00> : vector<2xf32>
    %401 = vector.multi_reduction <add>, %400, %cst_129 [1] : vector<2x40xf32> to vector<2xf32>
    %402 = vector.shape_cast %401 : vector<2xf32> to vector<2x1xf32>
    %cst_130 = arith.constant 4.000000e+01 : f32
    %403 = vector.broadcast %cst_130 : f32 to vector<2x1xf32>
    %404 = arith.divf %402, %403 : vector<2x1xf32>
    %405 = vector.broadcast %404 : vector<2x1xf32> to vector<2x40xf32>
    %406 = arith.subf %400, %405 : vector<2x40xf32>
    %407 = arith.mulf %406, %406 : vector<2x40xf32>
    %cst_131 = arith.constant dense<0.000000e+00> : vector<2xf32>
    %408 = vector.multi_reduction <add>, %407, %cst_131 [1] : vector<2x40xf32> to vector<2xf32>
    %409 = vector.shape_cast %408 : vector<2xf32> to vector<2x1xf32>
    %cst_132 = arith.constant 4.000000e+01 : f32
    %410 = vector.broadcast %cst_132 : f32 to vector<2x1xf32>
    %411 = arith.divf %409, %410 : vector<2x1xf32>
    %412 = vector.broadcast %404 : vector<2x1xf32> to vector<2x40xf32>
    %413 = arith.subf %400, %412 : vector<2x40xf32>
    %cst_133 = arith.constant 9.99999997E-7 : f32
    %414 = vector.broadcast %cst_133 : f32 to vector<2x1xf32>
    %415 = arith.addf %411, %414 : vector<2x1xf32>
    %416 = math.rsqrt %415 : vector<2x1xf32>
    %417 = vector.broadcast %416 : vector<2x1xf32> to vector<2x40xf32>
    %418 = arith.mulf %413, %417 : vector<2x40xf32>
    %419 = vector.broadcast %7 : vector<1x40xf32> to vector<2x40xf32>
    %420 = arith.mulf %418, %419 : vector<2x40xf32>
    %421 = vector.broadcast %8 : vector<1x40xf32> to vector<2x40xf32>
    %422 = arith.addf %420, %421 : vector<2x40xf32>
    %c1_134 = arith.constant 1 : index
    %c0_135 = arith.constant 0 : index
    %c0_136 = arith.constant 0 : index
    %423 = vector.load %arg12[%c1_134, %c0_135, %c0_136] : memref<2x2x40xf32, #tpu.memory_space<vmem>>, vector<1x2x40xf32>
    %424 = vector.shape_cast %423 : vector<1x2x40xf32> to vector<2x40xf32>
    %425 = vector.shape_cast %422 : vector<2x40xf32> to vector<1x2x40xf32>
    tpu.vector_store %arg12[%c1_134, %c0_135, %c0_136], %425 {strides = array<i32>} : memref<2x2x40xf32, #tpu.memory_space<vmem>>, vector<1x2x40xf32>,
    %cst_137 = arith.constant dense<0.000000e+00> : vector<2x8xf32>
    %426 = tpu.matmul %422, %9, %cst_137 {dimension_numbers = #tpu.dot_dimension_numbers<[1], [0], [0], [1], [0, 0, 1, 1], [], []>} : vector<2x40xf32>, vector<40x8xf32>, vector<2x8xf32> -> vector<2x8xf32>
    %427 = vector.broadcast %10 : vector<1x8xf32> to vector<2x8xf32>
    %428 = arith.addf %426, %427 : vector<2x8xf32>
    %429 = vector.extract_strided_slice %428 {offsets = [0, 0], sizes = [1, 3], strides = [1, 1]} : vector<2x8xf32> to vector<1x3xf32>
    %430 = vector.extract_strided_slice %428 {offsets = [1, 3], sizes = [1, 5], strides = [1, 1]} : vector<2x8xf32> to vector<1x5xf32>
    %431 = tpu.concatenate %429, %430 in 1 : vector<1x3xf32>, vector<1x5xf32> -> vector<1x8xf32>
    %c1_138 = arith.constant 1 : index
    %c0_139 = arith.constant 0 : index
    %432 = vector.load %arg13[%c1_138, %c0_139] : memref<2x8xf32, #tpu.memory_space<vmem>>, vector<1x8xf32>
    tpu.vector_store %arg13[%c1_138, %c0_139], %431 {strides = array<i32>} : memref<2x8xf32, #tpu.memory_space<vmem>>, vector<1x8xf32>,
    return
  }
  func.func @transform_0(%arg0: i32) -> (i32, i32, i32) {
    %c0_i32 = arith.constant 0 : i32
    %c0_i32_0 = arith.constant 0 : i32
    %c0_i32_1 = arith.constant 0 : i32
    %c0_i32_2 = arith.constant 0 : i32
    return %c0_i32, %c0_i32_0, %c0_i32_1 : i32, i32, i32
  }
  func.func @transform_1(%arg0: i32) -> (i32, i32) {
    %c0_i32 = arith.constant 0 : i32
    %c0_i32_0 = arith.constant 0 : i32
    %c0_i32_1 = arith.constant 0 : i32
    return %c0_i32, %c0_i32_0 : i32, i32
  }
  func.func @transform_2(%arg0: i32) -> (i32, i32) {
    %c0_i32 = arith.constant 0 : i32
    %c0_i32_0 = arith.constant 0 : i32
    %c0_i32_1 = arith.constant 0 : i32
    return %c0_i32, %c0_i32_0 : i32, i32
  }
  func.func @transform_3(%arg0: i32) -> (i32, i32) {
    %c0_i32 = arith.constant 0 : i32
    %c0_i32_0 = arith.constant 0 : i32
    %c0_i32_1 = arith.constant 0 : i32
    return %c0_i32, %c0_i32_0 : i32, i32
  }
  func.func @transform_4(%arg0: i32) -> (i32, i32) {
    %c0_i32 = arith.constant 0 : i32
    %c0_i32_0 = arith.constant 0 : i32
    %c0_i32_1 = arith.constant 0 : i32
    return %c0_i32, %c0_i32_0 : i32, i32
  }
  func.func @transform_5(%arg0: i32) -> (i32, i32) {
    %c0_i32 = arith.constant 0 : i32
    %c0_i32_0 = arith.constant 0 : i32
    %c0_i32_1 = arith.constant 0 : i32
    return %c0_i32, %c0_i32_0 : i32, i32
  }
  func.func @transform_6(%arg0: i32) -> (i32, i32) {
    %c0_i32 = arith.constant 0 : i32
    %c0_i32_0 = arith.constant 0 : i32
    %c0_i32_1 = arith.constant 0 : i32
    return %c0_i32, %c0_i32_0 : i32, i32
  }
  func.func @transform_7(%arg0: i32) -> (i32, i32) {
    %c0_i32 = arith.constant 0 : i32
    %c0_i32_0 = arith.constant 0 : i32
    %c0_i32_1 = arith.constant 0 : i32
    return %c0_i32, %c0_i32_0 : i32, i32
  }
  func.func @transform_8(%arg0: i32) -> (i32, i32) {
    %c0_i32 = arith.constant 0 : i32
    %c0_i32_0 = arith.constant 0 : i32
    %c0_i32_1 = arith.constant 0 : i32
    return %c0_i32, %c0_i32_0 : i32, i32
  }
  func.func @transform_9(%arg0: i32) -> (i32, i32) {
    %c0_i32 = arith.constant 0 : i32
    %c0_i32_0 = arith.constant 0 : i32
    %c0_i32_1 = arith.constant 0 : i32
    return %c0_i32, %c0_i32_0 : i32, i32
  }
  func.func @transform_10(%arg0: i32) -> (i32, i32) {
    %c0_i32 = arith.constant 0 : i32
    %c0_i32_0 = arith.constant 0 : i32
    %c0_i32_1 = arith.constant 0 : i32
    return %c0_i32, %c0_i32_0 : i32, i32
  }
  func.func @transform_11(%arg0: i32) -> (i32, i32, i32) {
    %c0_i32 = arith.constant 0 : i32
    %c0_i32_0 = arith.constant 0 : i32
    %c0_i32_1 = arith.constant 0 : i32
    %c0_i32_2 = arith.constant 0 : i32
    return %c0_i32, %c0_i32_0, %c0_i32_1 : i32, i32, i32
  }
  func.func @transform_12(%arg0: i32) -> (i32, i32) {
    %c0_i32 = arith.constant 0 : i32
    %c0_i32_0 = arith.constant 0 : i32
    %c0_i32_1 = arith.constant 0 : i32
    return %c0_i32, %c0_i32_0 : i32, i32
  }
}

</mosaic_0001>

<bundles_post_ra>
// kernel: extractor_ap_forward.4
= control target key start
LH: loop header
LB: loop body
LE: loop exit
PB: predicated region body
PF: predicated region fallthrough
CT: control target
= control target key end

     0   :  { %v234_v0 = vmov 0.0   ;;  %vm58_vm0 = vcmask 523264   ;;  %vm135_vm1 = vcmask 1040384   ;;  %vm137_vm2 = vcmask 258048   ;;  %s409_s1 = inlined_call_operand.vmem [shape: f32[192,32], index: 1, kind: input, shape index: {}]   ;;  %s410_s0 = inlined_call_operand.vmem [shape: f32[2,4,192], index: 0, kind: input, shape index: {}]   ;;  %s411_s2 = inlined_call_operand.vmem [shape: f32[1,32], index: 2, kind: input, shape index: {}]   ;;  %s412_s3 = inlined_call_operand.vmem [shape: f32[1,32], index: 3, kind: input, shape index: {}]   ;;  %s413_s4 = inlined_call_operand.vmem [shape: f32[5,32], index: 4, kind: input, shape index: {}]   ;;  %s414_s5 = inlined_call_operand.vmem [shape: f32[2,5,32], index: 5, kind: output, shape index: {}]  }
   0x1   :  { %61 = vmatprep.subr.mxu0 %v234_v0  ;;  %145 = vmatprep.subr.mxu1 %v234_v0  ;;  %v35_v1 = vld [vmem:[%s409_s1 + $0x78] sm:$0xff]  ;;  %v34_v2 = vld [vmem:[%s409_s1 + $0x70] sm:$0xff]  ;;  %v33_v3 = vld [vmem:[%s409_s1 + $0x68] sm:$0xff] }
   0x2   :  { %62 = vmatpush1.msra.mxu0 %v35_v1  ;;  %146 = vmatpush1.msra.mxu1 %v35_v1  ;;  %v32_v4 = vld [vmem:[%s409_s1 + $0x60] sm:$0xff]  ;;  %v31_v5 = vld [vmem:[%s409_s1 + $0x58] sm:$0xff]  ;;  %v30_v6 = vld [vmem:[%s409_s1 + $0x50] sm:$0xff] }
   0x3   :  { %63 = vmatprep.subr.mxu0 %v234_v0  ;;  %147 = vmatprep.subr.mxu1 %v234_v0  ;;  %v29_v7 = vld [vmem:[%s409_s1 + $0x48] sm:$0xff]  ;;  %v28_v8 = vld [vmem:[%s409_s1 + $0x40] sm:$0xff]  ;;  %v27_v9 = vld [vmem:[%s409_s1 + $0x38] sm:$0xff] }
   0x4   :  { %64 = vmatpush1.msra.mxu0 %v34_v2  ;;  %148 = vmatpush1.msra.mxu1 %v34_v2  ;;  %v26_v10 = vld [vmem:[%s409_s1 + $0x30] sm:$0xff]  ;;  %v25_v11 = vld [vmem:[%s409_s1 + $0x28] sm:$0xff]  ;;  %v24_v12 = vld [vmem:[%s409_s1 + $0x20] sm:$0xff] }
   0x5   :  { %65 = vmatprep.subr.mxu0 %v234_v0  ;;  %149 = vmatprep.subr.mxu1 %v234_v0  ;;  %v23_v13 = vld [vmem:[%s409_s1 + $0x18] sm:$0xff]  ;;  %v22_v14 = vld [vmem:[%s409_s1 + $0x10] sm:$0xff]  ;;  %v21_v15 = vld [vmem:[%s409_s1 + $0x8] sm:$0xff] }
   0x6   :  { %66 = vmatpush1.msra.mxu0 %v33_v3  ;;  %150 = vmatpush1.msra.mxu1 %v33_v3  ;;  %v20_v16 = vld [vmem:[%s409_s1] sm:$0xff]  ;;  %v43_v17 = vld [vmem:[%s409_s1 + $0xb8] sm:$0xff]  ;;  %v42_v18 = vld [vmem:[%s409_s1 + $0xb0] sm:$0xff] }
   0x7   :  { %67 = vmatprep.subr.mxu0 %v234_v0  ;;  %151 = vmatprep.subr.mxu1 %v234_v0  ;;  %v41_v19 = vld [vmem:[%s409_s1 + $0xa8] sm:$0xff]  ;;  %v40_v20 = vld [vmem:[%s409_s1 + $0xa0] sm:$0xff]  ;;  %v39_v21 = vld [vmem:[%s409_s1 + $0x98] sm:$0xff] }
   0x8   :  { %68 = vmatpush1.msra.mxu0 %v32_v4  ;;  %152 = vmatpush1.msra.mxu1 %v32_v4  ;;  %v38_v22 = vld [vmem:[%s409_s1 + $0x90] sm:$0xff]  ;;  %v49_v23 = vld [vmem:[%s410_s0] sm:$0xff]  ;;  %v228_v24 = vld [vmem:[%s410_s0 + $0x8] sm:$0xff] }
   0x9   :  { %69 = vmatprep.subr.mxu0 %v234_v0  ;;  %153 = vmatprep.subr.mxu1 %v234_v0  ;;  %v37_v25 = vld [vmem:[%s409_s1 + $0x88] sm:$0xff]  ;;  %v57_v26 = vcombine.high %v49_v23, %v49_v23  ;;  %v36_v27 = vld [vmem:[%s409_s1 + $0x80] sm:$0xff]  ;;  %v142_v28 = vcombine.high %v228_v24, %v228_v24 }
   0xa   :  { %70 = vmatpush1.msra.mxu0 %v31_v5  ;;  %154 = vmatpush1.msra.mxu1 %v31_v5  ;;  %v226_v29 = vld [vmem:[%s411_s2] ss:$0 sm:$0xff]  ;;  %v48_v32 = vld [vmem:[%s413_s4 + $0x1] sm:$0xf] }
   0xb   :  { %71 = vmatprep.subr.mxu0 %v234_v0  ;;  %155 = vmatprep.subr.mxu1 %v234_v0  ;;  %v45_v30 = vld [vmem:[%s412_s3] sm:$0x1] }
   0xc   :  { %72 = vmatpush1.msra.mxu0 %v30_v6  ;;  %156 = vmatpush1.msra.mxu1 %v30_v6  ;;  %v46_v31 = vld [vmem:[%s413_s4] sm:$0x1] }
   0xd   :  { %73 = vmatprep.subr.mxu0 %v234_v0  ;;  %157 = vmatprep.subr.mxu1 %v234_v0  ;;  %v47_v39 = vadd.f32 %v46_v31, %v45_v30 }
   0xe   :  { %74 = vmatpush1.msra.mxu0 %v29_v7  ;;  %158 = vmatpush1.msra.mxu1 %v29_v7 }
   0xf   :  { %75 = vmatprep.subr.mxu0 %v234_v0  ;;  %159 = vmatprep.subr.mxu1 %v234_v0 }
  0x10   :  { %76 = vmatpush1.msra.mxu0 %v28_v8  ;;  %160 = vmatpush1.msra.mxu1 %v28_v8 }
  0x11   :  { %77 = vmatprep.subr.mxu0 %v234_v0  ;;  %161 = vmatprep.subr.mxu1 %v234_v0 }
  0x12   :  { %78 = vmatpush1.msra.mxu0 %v27_v9  ;;  %162 = vmatpush1.msra.mxu1 %v27_v9 }
  0x13   :  { %79 = vmatprep.subr.mxu0 %v234_v0  ;;  %163 = vmatprep.subr.mxu1 %v234_v0 }
  0x14   :  { %80 = vmatpush1.msra.mxu0 %v26_v10  ;;  %164 = vmatpush1.msra.mxu1 %v26_v10 }
  0x15   :  { %81 = vmatprep.subr.mxu0 %v234_v0  ;;  %165 = vmatprep.subr.mxu1 %v234_v0 }
  0x16   :  { %82 = vmatpush1.msra.mxu0 %v25_v11  ;;  %166 = vmatpush1.msra.mxu1 %v25_v11 }
  0x17   :  { %83 = vmatprep.subr.mxu0 %v234_v0  ;;  %167 = vmatprep.subr.mxu1 %v234_v0 }
  0x18   :  { %84 = vmatpush1.msra.mxu0 %v24_v12  ;;  %168 = vmatpush1.msra.mxu1 %v24_v12 }
  0x19   :  { %85 = vmatprep.subr.mxu0 %v234_v0  ;;  %169 = vmatprep.subr.mxu1 %v234_v0 }
  0x1a   :  { %86 = vmatpush1.msra.mxu0 %v23_v13  ;;  %170 = vmatpush1.msra.mxu1 %v23_v13 }
  0x1b   :  { %87 = vmatprep.subr.mxu0 %v234_v0  ;;  %171 = vmatprep.subr.mxu1 %v234_v0 }
  0x1c   :  { %88 = vmatpush1.msra.mxu0 %v22_v14  ;;  %172 = vmatpush1.msra.mxu1 %v22_v14 }
  0x1d   :  { %89 = vmatprep.subr.mxu0 %v234_v0  ;;  %173 = vmatprep.subr.mxu1 %v234_v0 }
  0x1e   :  { %90 = vmatpush1.msra.mxu0 %v21_v15  ;;  %174 = vmatpush1.msra.mxu1 %v21_v15 }
  0x1f   :  { %91 = vmatprep.subr.mxu0 %v234_v0  ;;  %175 = vmatprep.subr.mxu1 %v234_v0 }
  0x20   :  { %92 = vmatpush1.msra.mxu0 %v20_v16  ;;  %176 = vmatpush1.msra.mxu1 %v20_v16 }
  0x21   :  { %109 = vmatprep.subr.mxu0 %v234_v0  ;;  %193 = vmatprep.subr.mxu1 %v234_v0 }
  0x22   :  { %110 = vmatpush2.msra.mxu0 %v43_v17  ;;  %194 = vmatpush2.msra.mxu1 %v43_v17 }
  0x23   :  { %111 = vmatprep.subr.mxu0 %v234_v0  ;;  %195 = vmatprep.subr.mxu1 %v234_v0 }
  0x24   :  { %112 = vmatpush2.msra.mxu0 %v42_v18  ;;  %196 = vmatpush2.msra.mxu1 %v42_v18 }
  0x25   :  { %113 = vmatprep.subr.mxu0 %v234_v0  ;;  %197 = vmatprep.subr.mxu1 %v234_v0 }
  0x26   :  { %114 = vmatpush2.msra.mxu0 %v41_v19  ;;  %198 = vmatpush2.msra.mxu1 %v41_v19 }
  0x27   :  { %115 = vmatprep.subr.mxu0 %v234_v0  ;;  %199 = vmatprep.subr.mxu1 %v234_v0 }
  0x28   :  { %116 = vmatpush2.msra.mxu0 %v40_v20  ;;  %200 = vmatpush2.msra.mxu1 %v40_v20 }
  0x29   :  { %117 = vmatprep.subr.mxu0 %v234_v0  ;;  %201 = vmatprep.subr.mxu1 %v234_v0 }
  0x2a   :  { %118 = vmatpush2.msra.mxu0 %v39_v21  ;;  %202 = vmatpush2.msra.mxu1 %v39_v21 }
  0x2b   :  { %119 = vmatprep.subr.mxu0 %v234_v0  ;;  %203 = vmatprep.subr.mxu1 %v234_v0 }
  0x2c   :  { %120 = vmatpush2.msra.mxu0 %v38_v22  ;;  %204 = vmatpush2.msra.mxu1 %v38_v22 }
  0x2d   :  { %121 = vmatprep.subr.mxu0 %v234_v0  ;;  %205 = vmatprep.subr.mxu1 %v234_v0 }
  0x2e   :  { %122 = vmatpush2.msra.mxu0 %v37_v25  ;;  %206 = vmatpush2.msra.mxu1 %v37_v25 }
  0x2f   :  { %123 = vmatprep.subr.mxu0 %v234_v0  ;;  %207 = vmatprep.subr.mxu1 %v234_v0 }
  0x30   :  { %124 = vmatpush2.msra.mxu0 %v36_v27  ;;  %227 = vmatprep.mubr.msk.f32.mxu0 %vm58_vm0, %v57_v26 }
  0x31   :  { %208 = vmatpush2.msra.mxu1 %v36_v27  ;;  %229 = vmatprep.mubr.msk.f32.mxu1 %vm58_vm0, %v142_v28 }
  0x32   :  { %126 = vmatmul.mubr.f32.vlgmr.msra.gmra.mxu0 %v49_v23  ;;  %210 = vmatmul.mubr.f32.vlgmr.msra.gmra.mxu1 %v228_v24 }
  0xf2   :  { %v127_v33 = vpop.f32.mrf.mxu0  ;;  %v211_v34 = vpop.f32.mrf.mxu1 }
  0xf3   :  { %v128_v35 = vadd.f32 %v226_v29, %v127_v33  ;;  %v212_v36 = vadd.f32 %v226_v29, %v211_v34 }
  0xf4   :  { %v129_v37 = vpop.f32.mrf.mxu0  ;;  %v213_v38 = vpop.f32.mrf.mxu1 }
  0xf5   :  { %v131_v40 = vadd.f32 %v128_v35, %v48_v32  ;;  %v215_v41 = vadd.f32 %v212_v36, %v48_v32 }
  0xf7   :  { %v133_v42 = vrot.slane %v131_v40, 7  ;;  %v217_v43 = vrot.slane %v215_v41, 7 }
  0xf9   :  { %v136_v44 = vsel %vm135_vm1, %v47_v39, %v133_v42  ;;  %v219_v45 = vsel %vm135_vm1, %v47_v39, %v217_v43 }
  0xfa   :  { %138 = vst.msk [vmem:[%s414_s5] sm:$0x1f] %vm137_vm2, %v136_v44  ;;  %230 = vst.msk [vmem:[%s414_s5 + $0x8] sm:$0x1f] %vm137_vm2, %v219_v45 }

// kernel: extractor_ap_forward.5
= control target key start
LH: loop header
LB: loop body
LE: loop exit
PB: predicated region body
PF: predicated region fallthrough
CT: control target
= control target key end

     0   :  { %vm73_vm0 = vcmask 258048   ;;  %v2576_v7 = vmov 0.0   ;;  %vm2577_vm1 = vmmov 0   ;;  %vm108_vm2 = vcmask 261120   ;;  %s2580_s23 = smov 88   ;;  %s2581_s24 = smov 80   ;;  %s3117_s0 = inlined_call_operand.vmem [shape: f32[2,5,32], index: 0, kind: input, shape index: {}]   ;;  %s3118_s3 = inlined_call_operand.vmem [shape: f32[32,96], index: 3, kind: input, shape index: {}]   ;;  %s3119_s1 = inlined_call_operand.vmem [shape: f32[1,32], index: 1, kind: input, shape index: {}]   ;;  %s3120_s2 = inlined_call_operand.vmem [shape: f32[1,32], index: 2, kind: input, shape index: {}]   ;;  %s3121_s4 = inlined_call_operand.vmem [shape: f32[1,96], index: 4, kind: input, shape index: {}]   ;;  %s3122_s5 = inlined_call_operand.vmem [shape: f32[32,32], index: 5, kind: input, shape index: {}]   ;;  %s3123_s6 = inlined_call_operand.vmem [shape: f32[1,32], index: 6, kind: input, shape index: {}]   ;;  %s3124_s9 = inlined_call_operand.vmem [shape: f32[32,64], index: 9, kind: input, shape index: {}]   ;;  %s3125_s7 = inlined_call_operand.vmem [shape: f32[1,32], index: 7, kind: input, shape index: {}]   ;;  %s3126_s8 = inlined_call_operand.vmem [shape: f32[1,32], index: 8, kind: input, shape index: {}]   ;;  %s3127_s11 = inlined_call_operand.vmem [shape: f32[64,32], index: 11, kind: input, shape index: {}]   ;;  %s3128_s10 = inlined_call_operand.vmem [shape: f32[1,64], index: 10, kind: input, shape index: {}]   ;;  %s3129_s12 = inlined_call_operand.vmem [shape: f32[1,32], index: 12, kind: input, shape index: {}]   ;;  %s3130_s13 = inlined_call_operand.vmem [shape: f32[2,5,32], index: 13, kind: output, shape index: {}]  }
   0x1   :  { %v2665_v0 = vld [vmem:[%s3117_s0] sm:$0x1f]  ;;  %2328 = vmatprep.subr.mxu1 %v2576_v7  ;;  %v2675_v8 = vld [vmem:[%s3118_s3 + $0x18] sm:$0xff]  ;;  %v2680_v9 = vld [vmem:[%s3118_s3 + $0x10] sm:$0xff]  ;;  %2336 = vmatprep.mubr.msk.f32.mxu1 %vm2577_vm1, %v2576_v7  ;;  %s2583_s25 = smov 72   ;;  %s2584_s26 = smov 104  }
   0x2   :  { %v74_v1 = vsel %vm73_vm0, %v2665_v0, 0.0  ;;  %2329 = vmatpush3.msra.mxu1 %v2675_v8  ;;  %2349 = vmatprep.subr.mxu0 %v2576_v7  ;;  %v2690_v10 = vld [vmem:[%s3118_s3 + $0x8] sm:$0xff]  ;;  %v2699_v11 = vld [vmem:[%s3118_s3] sm:$0xff]  ;;  %vm185_vm3 = vcmask 64512   ;;  %vm260_vm4 = vcmask 36864   ;;  %s2585_s27 = smov 64  }
   0x3   :  { %75 = vadd.xlane.f32.xlu0 %v74_v1  ;;  %2330 = vmatprep.subr.mxu1 %v2576_v7  ;;  %v2708_v16 = vld [vmem:[%s3119_s1] ss:$0 sm:$0xff]  ;;  %s2578_s1 = smov 120   ;;  %vm278_vm5 = vcmask 1044480   ;;  %s2586_s28 = smov 48   ;;  %vm274_vm6 = vcmask 39936  }
   0x4   :  { %2351 = vmatprep.mubr.msk.f32.mxu0 %vm2577_vm1, %v2576_v7  ;;  %2331 = vmatpush3.msra.mxu1 %v2680_v9  ;;  %v2713_v18 = vld [vmem:[%s3120_s2] ss:$0 sm:$0xff]  ;;  %s2579_s2 = smov 96   ;;  %s2587_s29 = smov 40   ;;  %vm862_vm7 = vcmask 130048   ;;  %vm864_vm8 = vcmask 195584  }
   0x5   :  { %2332 = vmatprep.subr.mxu1 %v2576_v7  ;;  %v2723_v21 = vld [vmem:[%s3121_s4] ss:$0 sm:$0xff]  ;;  %s2582_s4 = smov 112   ;;  %s2588_s30 = smov 56   ;;  %vm1085_vm10 = vcmask 523264  }
   0x6   :  { %2333 = vmatpush3.msra.mxu1 %v2690_v10  ;;  %s2589_s21 = smov 8   ;;  %s2590_s22 = smov 16  }
   0x7   :  { %2334 = vmatprep.subr.mxu1 %v2576_v7  ;;  %s2591_s14 = smov 24  }
   0x8   :  { %2335 = vmatpush3.msra.mxu1 %v2699_v11 }
   0x9   :  { %2339 = vmatprep.subr.mxu1 %v2576_v7 }
  0x8c   :  { %v76_v2 = vpop.xlane.xlu0 %75 }
  0x8d   :  { %v78_v3 = vmul.f32 0.03125, %v76_v2 }
  0x8f   :  { %v79_v4 = vsub.f32 %v2665_v0, %v78_v3 }
  0x91   :  { %v80_v5 = vmul.f32 %v79_v4, %v79_v4 }
  0x93   :  { %v81_v6 = vsel %vm73_vm0, %v80_v5, 0.0 }
  0x94   :  { %82 = vadd.xlane.f32.xlu0 %v81_v6 }
 0x11d   :  { %v83_v12 = vpop.xlane.xlu0 %82 }
 0x11e   :  { %v84_v13 = vmul.f32 0.03125, %v83_v12 }
 0x120   :  { %v85_v14 = vadd.f32 1e-06, %v84_v13 }
 0x122   :  { %2528 = vrsqrt.f32 %v85_v14 }
 0x12f   :  { %v2529_v15 = vpop.eup %2528 }
 0x130   :  { %v87_v17 = vmul.f32 %v2529_v15, %v79_v4 }
 0x132   :  { %v94_v19 = vmul.f32 %v2708_v16, %v87_v17 }
 0x134   :  { %v101_v20 = vadd.f32 %v2713_v18, %v94_v19 }
 0x136   :  { %2337 = vmatmul.mubr.msk.f32.vlgmr.msra.gmra.mxu1 %vm108_vm2, %v101_v20 }
 0x137   :  { %2341 = vmatprep.mubr.msk.f32.mxu1 %vm2577_vm1, %v2576_v7 }
 0x1f6   :  { %v178_v22 = vpop.f32.mrf.mxu1 }
 0x1f7   :  { %v2726_v23 = vadd.f32 %v2723_v21, %v178_v22 }
 0x1f8   :  { %v2338_v24 = vpop.f32.mrf.mxu1 }
 0x1f9   :  { %351 = vrot.lane.b32.xlu0 %v2726_v23, %s2578_s1  ;;  %183 = vrot.lane.b32.xlu1 %v2726_v23, %s2579_s2 }
 0x1fd   :  { %353 = vrot.lane.b32.xlu1 %v2726_v23, %s2580_s23 }
 0x201   :  { %519 = vrot.lane.b32.xlu1 %v2726_v23, %s2581_s24 }
 0x205   :  { %517 = vrot.lane.b32.xlu1 %v2726_v23, %s2582_s4 }
 0x209   :  { %685 = vrot.lane.b32.xlu1 %v2726_v23, %s2583_s25 }
 0x20d   :  { %683 = vrot.lane.b32.xlu1 %v2726_v23, %s2584_s26 }
 0x26b   :  { %v184_v25 = vpop.permute.xlu1 %183  ;;  %v352_v27 = vpop.permute.xlu0 %351 }
 0x26c   :  { %2340 = vmatpush3.xpose.msk.msra.mxu1 %vm185_vm3, %v184_v25  ;;  %v2802_v25 = vld [vmem:[%s3122_s5 + $0x18] sm:$0xff] }
 0x26d   :  { %2344 = vmatprep.subr.mxu1 %v2576_v7 }
 0x26f   :  { %2342 = vmatmul.mubr.msk.f32.vlgmr.msra.gmra.mxu1 %vm185_vm3, %v2726_v23  ;;  %v354_v26 = vpop.permute.xlu1 %353 }
 0x270   :  { %2350 = vmatpush3.xpose.msk.msra.mxu0 %vm185_vm3, %v354_v26  ;;  %2346 = vmatprep.mubr.msk.f32.mxu1 %vm2577_vm1, %v2576_v7  ;;  %v2807_v26 = vld [vmem:[%s3122_s5 + $0x10] sm:$0xff] }
 0x271   :  { %2359 = vmatprep.subr.mxu0 %v2576_v7 }
 0x273   :  { %2352 = vmatmul.mubr.msk.f32.vlgmr.msra.gmra.mxu0 %vm185_vm3, %v352_v27  ;;  %v520_v28 = vpop.permute.xlu1 %519 }
 0x274   :  { %2360 = vmatpush3.xpose.msk.msra.mxu0 %vm185_vm3, %v520_v28  ;;  %2361 = vmatprep.mubr.msk.f32.mxu0 %vm2577_vm1, %v2576_v7  ;;  %v2814_v28 = vld [vmem:[%s3122_s5 + $0x8] sm:$0xff] }
 0x275   :  { %2369 = vmatprep.subr.mxu0 %v2576_v7 }
 0x277   :  { %v518_v29 = vpop.permute.xlu1 %517 }
 0x278   :  { %2362 = vmatmul.mubr.msk.f32.vlgmr.msra.gmra.mxu0 %vm185_vm3, %v518_v29 }
 0x279   :  { %2371 = vmatprep.mubr.msk.f32.mxu0 %vm2577_vm1, %v2576_v7 }
 0x27b   :  { %v686_v30 = vpop.permute.xlu1 %685 }
 0x27c   :  { %2370 = vmatpush3.xpose.msk.msra.mxu0 %vm185_vm3, %v686_v30  ;;  %v2823_v30 = vld [vmem:[%s3122_s5] sm:$0xff] }
 0x27d   :  { %2379 = vmatprep.subr.mxu0 %v2576_v7 }
 0x27f   :  { %v684_v31 = vpop.permute.xlu1 %683 }
 0x280   :  { %2372 = vmatmul.mubr.msk.f32.vlgmr.msra.gmra.mxu0 %vm185_vm3, %v684_v31 }
 0x281   :  { %2387 = vmatprep.mubr.msk.f32.mxu0 %vm2577_vm1, %v2576_v7  ;;  %2380 = vmatpush3.msra.mxu0 %v2802_v25 }
 0x282   :  { %2381 = vmatprep.subr.mxu0 %v2576_v7 }
 0x283   :  { %2382 = vmatpush3.msra.mxu0 %v2807_v26 }
 0x284   :  { %2383 = vmatprep.subr.mxu0 %v2576_v7 }
 0x285   :  { %2384 = vmatpush3.msra.mxu0 %v2814_v28 }
 0x286   :  { %2385 = vmatprep.subr.mxu0 %v2576_v7 }
 0x287   :  { %2386 = vmatpush3.msra.mxu0 %v2823_v30 }
 0x288   :  { %2401 = vmatprep.subr.mxu0 %v2576_v7 }
 0x32f   :  { %v256_v32 = vpop.f32.mrf.mxu1 }
 0x330   :  { %v261_v33 = vsel %vm260_vm4, %v256_v32, -inf }
 0x331   :  { %262 = vmax.xlane.f32.xlu1 %v261_v33  ;;  %v2343_v34 = vpop.f32.mrf.mxu1 }
 0x333   :  { %v425_v35 = vpop.f32.mrf.mxu0 }
 0x334   :  { %v429_v36 = vsel %vm260_vm4, %v425_v35, -inf }
 0x335   :  { %430 = vmax.xlane.f32.xlu0 %v429_v36  ;;  %v2353_v37 = vpop.f32.mrf.mxu0 }
 0x336   :  { %v2833_v37 = vld [vmem:[%s3117_s0 + $0x8] sm:$0x1f] }
 0x338   :  { %v591_v38 = vpop.f32.mrf.mxu0 }
 0x339   :  { %v595_v39 = vsel %vm260_vm4, %v591_v38, -inf }
 0x33a   :  { %v2363_v40 = vpop.f32.mrf.mxu0  ;;  %596 = vmax.xlane.f32.xlu1 %v595_v39 }
 0x340   :  { %v757_v41 = vpop.f32.mrf.mxu0 }
 0x341   :  { %v761_v42 = vsel %vm260_vm4, %v757_v41, -inf }
 0x342   :  { %762 = vmax.xlane.f32.xlu0 %v761_v42  ;;  %v2373_v43 = vpop.f32.mrf.mxu0 }
 0x34b   :  { %272 = vrot.lane.b32.xlu1 %v2726_v23, %s2585_s27 }
 0x3ba   :  { %v263_v44 = vpop.xlane.xlu1 %262 }
 0x3bb   :  { %v264_v45 = vsub.f32 %v256_v32, %v263_v44 }
 0x3bd   :  { %v265_v46 = vmul.f32 1.442695, %v264_v45 }
 0x3be   :  { %v431_v47 = vpop.xlane.xlu0 %430 }
 0x3bf   :  { %2530 = vpow2.f32 %v265_v46  ;;  %v432_v48 = vsub.f32 %v425_v35, %v431_v47  ;;  %v2846_v47 = vld [vmem:[%s3123_s6] ss:$0 sm:$0xff] }
 0x3c1   :  { %v433_v49 = vmul.f32 1.442695, %v432_v48 }
 0x3c3   :  { %2532 = vpow2.f32 %v433_v49  ;;  %v597_v50 = vpop.xlane.xlu1 %596 }
 0x3c4   :  { %v598_v51 = vsub.f32 %v591_v38, %v597_v50  ;;  %v1163_v38 = vsel %vm73_vm0, %v2833_v37, 0.0 }
 0x3c6   :  { %v599_v52 = vmul.f32 1.442695, %v598_v51 }
 0x3c7   :  { %v273_v53 = vpop.permute.xlu1 %272 }
 0x3c8   :  { %2534 = vpow2.f32 %v599_v52  ;;  %2345 = vmatpush3.msk.msra.mxu1 %vm278_vm5, %v273_v53 }
 0x3c9   :  { %2354 = vmatprep.subr.mxu1 %v2576_v7 }
 0x3cb   :  { %v763_v54 = vpop.xlane.xlu0 %762 }
 0x3cc   :  { %v2531_v55 = vpop.eup %2530  ;;  %v764_v56 = vsub.f32 %v757_v41, %v763_v54 }
 0x3cd   :  { %v267_v57 = vsel %vm260_vm4, %v2531_v55, 0.0 }
 0x3ce   :  { %v765_v58 = vmul.f32 1.442695, %v764_v56  ;;  %268 = vadd.xlane.f32.xlu1 %v267_v57 }
 0x3d0   :  { %v2533_v59 = vpop.eup %2532  ;;  %2536 = vpow2.f32 %v765_v58 }
 0x3d1   :  { %v435_v60 = vsel %vm260_vm4, %v2533_v59, 0.0 }
 0x3d2   :  { %436 = vadd.xlane.f32.xlu0 %v435_v60 }
 0x3d5   :  { %v2535_v61 = vpop.eup %2534 }
 0x3d6   :  { %v601_v62 = vsel %vm260_vm4, %v2535_v61, 0.0 }
 0x3d7   :  { %602 = vadd.xlane.f32.xlu1 %v601_v62  ;;  %v2873_v62 = vld [vmem:[%s3124_s9 + $0x8] sm:$0xff] }
 0x3dd   :  { %v2537_v63 = vpop.eup %2536 }
 0x3de   :  { %v767_v1 = vsel %vm260_vm4, %v2537_v63, 0.0 }
 0x3df   :  { %768 = vadd.xlane.f32.xlu0 %v767_v1 }
 0x3e8   :  { %606 = vrot.lane.b32.xlu1 %v2726_v23, %s2586_s28 }
 0x3ec   :  { %772 = vrot.lane.b32.xlu1 %v2726_v23, %s2587_s29 }
 0x3f5   :  { %440 = vrot.lane.b32.xlu0 %v2726_v23, %s2588_s30 }
 0x457   :  { %v269_v2 = vpop.xlane.xlu1 %268 }
 0x458   :  { %2538 = vrcp.f32 %v269_v2 }
 0x45b   :  { %v437_v3 = vpop.xlane.xlu0 %436 }
 0x45c   :  { %2540 = vrcp.f32 %v437_v3 }
 0x460   :  { %v603_v4 = vpop.xlane.xlu1 %602 }
 0x461   :  { %2542 = vrcp.f32 %v603_v4 }
 0x464   :  { %v607_v14 = vpop.permute.xlu1 %606 }
 0x465   :  { %v2539_v5 = vpop.eup %2538 }
 0x466   :  { %v271_v6 = vmul.f32 %v2539_v5, %v2531_v55 }
 0x468   :  { %v769_v12 = vpop.xlane.xlu0 %768  ;;  %2347 = vmatmul.mubr.msk.f32.vlgmr.msra.gmra.mxu1 %vm274_vm6, %v271_v6  ;;  %v773_v22 = vpop.permute.xlu1 %772 }
 0x469   :  { %v2541_v13 = vpop.eup %2540  ;;  %2544 = vrcp.f32 %v769_v12  ;;  %2356 = vmatprep.mubr.msk.f32.mxu1 %vm2577_vm1, %v2576_v7 }
 0x46a   :  { %v439_v17 = vmul.f32 %v2541_v13, %v2533_v59  ;;  %v2889_v13 = vld [vmem:[%s3125_s7] ss:$0 sm:$0xff] }
 0x46c   :  { %v441_v15 = vpop.permute.xlu0 %440 }
 0x46d   :  { %2355 = vmatpush3.msk.msra.mxu1 %vm278_vm5, %v441_v15 }
 0x46e   :  { %v2543_v19 = vpop.eup %2542  ;;  %2357 = vmatmul.mubr.msk.f32.vlgmr.msra.gmra.mxu1 %vm274_vm6, %v439_v17  ;;  %2364 = vmatprep.subr.mxu1 %v2576_v7  ;;  %v2894_v17 = vld [vmem:[%s3126_s8] ss:$0 sm:$0xff] }
 0x46f   :  { %2365 = vmatpush3.msk.msra.mxu1 %vm278_vm5, %v607_v14  ;;  %2366 = vmatprep.mubr.msk.f32.mxu1 %vm2577_vm1, %v2576_v7  ;;  %v605_v20 = vmul.f32 %v2543_v19, %v2535_v61  ;;  %v2868_v61 = vld [vmem:[%s3124_s9 + $0x10] sm:$0xff] }
 0x470   :  { %2374 = vmatprep.subr.mxu1 %v2576_v7 }
 0x472   :  { %2367 = vmatmul.mubr.msk.f32.vlgmr.msra.gmra.mxu1 %vm274_vm6, %v605_v20 }
 0x473   :  { %2375 = vmatpush3.msk.msra.mxu1 %vm278_vm5, %v773_v22  ;;  %2376 = vmatprep.mubr.msk.f32.mxu1 %vm2577_vm1, %v2576_v7 }
 0x474   :  { %2390 = vmatprep.subr.mxu1 %v2576_v7 }
 0x476   :  { %v2545_v23 = vpop.eup %2544 }
 0x477   :  { %v771_v24 = vmul.f32 %v2545_v23, %v2537_v63  ;;  %v2880_v63 = vld [vmem:[%s3124_s9] sm:$0xff] }
 0x479   :  { %2377 = vmatmul.mubr.msk.f32.vlgmr.msra.gmra.mxu1 %vm274_vm6, %v771_v24 }
 0x47a   :  { %2398 = vmatprep.mubr.msk.f32.mxu1 %vm2577_vm1, %v2576_v7 }
 0x528   :  { %v347_v27 = vpop.f32.mrf.mxu1 }
 0x52a   :  { %v2348_v29 = vpop.f32.mrf.mxu1 }
 0x52b   :  { %v2965_v29 = vld [vmem:[%s3127_s11] sm:$0xff] }
 0x52e   :  { %v513_v31 = vpop.f32.mrf.mxu1 }
 0x52f   :  { %850 = vrot.lane.b32.xlu0 %v513_v31, %s2589_s21  ;;  %v2973_v31 = vld [vmem:[%s3128_s10] ss:$0 sm:$0xff] }
 0x530   :  { %v2358_v32 = vpop.f32.mrf.mxu1 }
 0x532   :  { %v679_v33 = vpop.f32.mrf.mxu1 }
 0x533   :  { %854 = vrot.lane.b32.xlu1 %v679_v33, %s2590_s22 }
 0x534   :  { %v2368_v34 = vpop.f32.mrf.mxu1 }
 0x539   :  { %v845_v35 = vpop.f32.mrf.mxu1 }
 0x53a   :  { %858 = vrot.lane.b32.xlu0 %v845_v35, %s2591_s14 }
 0x53b   :  { %v2378_v36 = vpop.f32.mrf.mxu1 }
 0x559   :  { %1164 = vadd.xlane.f32.xlu0 %v1163_v38 }
 0x5a1   :  { %v851_v39 = vpop.permute.xlu0 %850 }
 0x5a2   :  { %v861_v41 = vsel %vm185_vm3, %v347_v27, %v851_v39  ;;  %v2959_v27 = vld [vmem:[%s3127_s11 + $0x8] sm:$0xff] }
 0x5a5   :  { %v855_v40 = vpop.permute.xlu1 %854 }
 0x5a6   :  { %v863_v42 = vsel %vm862_vm7, %v861_v41, %v855_v40 }
 0x5ac   :  { %v859_v43 = vpop.permute.xlu0 %858 }
 0x5ad   :  { %v865_v44 = vsel %vm864_vm8, %v863_v42, %v859_v43 }
 0x5ae   :  { %2388 = vmatmul.mubr.msk.f32.vlgmr.msra.gmra.mxu0 %vm108_vm2, %v865_v44 }
 0x5af   :  { %2417 = vmatprep.mubr.msk.f32.mxu0 %vm2577_vm1, %v2576_v7 }
 0x5e2   :  { %v1165_v45 = vpop.xlane.xlu0 %1164 }
 0x5e3   :  { %v1166_v46 = vmul.f32 0.03125, %v1165_v45 }
 0x5e5   :  { %v1167_v48 = vsub.f32 %v2833_v37, %v1166_v46 }
 0x5e7   :  { %v1168_v53 = vmul.f32 %v1167_v48, %v1167_v48 }
 0x5e9   :  { %v1169_v55 = vsel %vm73_vm0, %v1168_v53, 0.0 }
 0x66e   :  { %v941_v49 = vpop.f32.mrf.mxu0 }
 0x66f   :  { %v942_v50 = vadd.f32 %v2846_v47, %v941_v49 }
 0x670   :  { %v2389_v51 = vpop.f32.mrf.mxu0 }
 0x671   :  { %v2851_v52 = vadd.f32 %v942_v50, %v2665_v0  ;;  %v2861_v0 = vld [vmem:[%s3124_s9 + $0x18] sm:$0xff] }
 0x672   :  { %2391 = vmatpush3.msra.mxu1 %v2861_v0 }
 0x673   :  { %v946_v54 = vsel %vm73_vm0, %v2851_v52, 0.0  ;;  %2392 = vmatprep.subr.mxu1 %v2576_v7 }
 0x674   :  { %947 = vadd.xlane.f32.xlu1 %v946_v54  ;;  %2393 = vmatpush3.msra.mxu1 %v2868_v61 }
 0x675   :  { %2394 = vmatprep.subr.mxu1 %v2576_v7 }
 0x676   :  { %2395 = vmatpush3.msra.mxu1 %v2873_v62 }
 0x677   :  { %2396 = vmatprep.subr.mxu1 %v2576_v7 }
 0x678   :  { %1170 = vadd.xlane.f32.xlu1 %v1169_v55  ;;  %2397 = vmatpush3.msra.mxu1 %v2880_v63 }
 0x679   :  { %2420 = vmatprep.subr.mxu1 %v2576_v7 }
 0x6fd   :  { %v948_v56 = vpop.xlane.xlu1 %947 }
 0x6fe   :  { %v949_v57 = vmul.f32 0.03125, %v948_v56 }
 0x700   :  { %v950_v58 = vsub.f32 %v2851_v52, %v949_v57 }
 0x701   :  { %v1171_v1 = vpop.xlane.xlu1 %1170 }
 0x702   :  { %v951_v59 = vmul.f32 %v950_v58, %v950_v58  ;;  %v1172_v2 = vmul.f32 0.03125, %v1171_v1 }
 0x704   :  { %v952_v60 = vsel %vm73_vm0, %v951_v59, 0.0  ;;  %v1173_v5 = vadd.f32 1e-06, %v1172_v2 }
 0x705   :  { %953 = vadd.xlane.f32.xlu0 %v952_v60 }
 0x78e   :  { %v954_v3 = vpop.xlane.xlu0 %953 }
 0x78f   :  { %v955_v4 = vmul.f32 0.03125, %v954_v3 }
 0x791   :  { %v956_v6 = vadd.f32 1e-06, %v955_v4 }
 0x793   :  { %2546 = vrsqrt.f32 %v956_v6 }
 0x794   :  { %2548 = vrsqrt.f32 %v1173_v5 }
 0x7a0   :  { %v2547_v12 = vpop.eup %2546 }
 0x7a1   :  { %v958_v14 = vmul.f32 %v2547_v12, %v950_v58  ;;  %v2549_v15 = vpop.eup %2548 }
 0x7a2   :  { %v1175_v20 = vmul.f32 %v2549_v15, %v1167_v48 }
 0x7a3   :  { %v965_v19 = vmul.f32 %v2889_v13, %v958_v14 }
 0x7a4   :  { %v1176_v23 = vmul.f32 %v2708_v16, %v1175_v20  ;;  %v2945_v16 = vld [vmem:[%s3127_s11 + $0x18] sm:$0xff] }
 0x7a5   :  { %v972_v22 = vadd.f32 %v2894_v17, %v965_v19 }
 0x7a6   :  { %v1177_v24 = vadd.f32 %v2713_v18, %v1176_v23  ;;  %v2952_v18 = vld [vmem:[%s3127_s11 + $0x10] sm:$0xff] }
 0x7a7   :  { %2399 = vmatmul.mubr.msk.f32.vlgmr.msra.gmra.mxu1 %vm108_vm2, %v972_v22 }
 0x7a8   :  { %2421 = vmatpush3.msra.mxu1 %v2675_v8  ;;  %2428 = vmatprep.mubr.msk.f32.mxu1 %vm2577_vm1, %v2576_v7  ;;  %v2917_v8 = vld [vmem:[%s3127_s11 + $0x38] sm:$0xff] }
 0x7a9   :  { %2422 = vmatprep.subr.mxu1 %v2576_v7  ;;  %2402 = vmatpush3.msra.mxu0 %v2917_v8 }
 0x7aa   :  { %2423 = vmatpush3.msra.mxu1 %v2680_v9  ;;  %2403 = vmatprep.subr.mxu0 %v2576_v7  ;;  %v2924_v9 = vld [vmem:[%s3127_s11 + $0x30] sm:$0xff] }
 0x7ab   :  { %2424 = vmatprep.subr.mxu1 %v2576_v7  ;;  %2404 = vmatpush3.msra.mxu0 %v2924_v9 }
 0x7ac   :  { %2425 = vmatpush3.msra.mxu1 %v2690_v10  ;;  %2405 = vmatprep.subr.mxu0 %v2576_v7  ;;  %v2931_v10 = vld [vmem:[%s3127_s11 + $0x28] sm:$0xff] }
 0x7ad   :  { %2426 = vmatprep.subr.mxu1 %v2576_v7  ;;  %2406 = vmatpush3.msra.mxu0 %v2931_v10 }
 0x7ae   :  { %2427 = vmatpush3.msra.mxu1 %v2699_v11  ;;  %2407 = vmatprep.subr.mxu0 %v2576_v7  ;;  %v2938_v11 = vld [vmem:[%s3127_s11 + $0x20] sm:$0xff] }
 0x7af   :  { %2429 = vmatmul.mubr.msk.f32.vlgmr.msra.gmra.mxu1 %vm108_vm2, %v1177_v24  ;;  %2431 = vmatprep.subr.mxu1 %v2576_v7 }
 0x7b0   :  { %2433 = vmatprep.mubr.msk.f32.mxu1 %vm2577_vm1, %v2576_v7  ;;  %2408 = vmatpush3.msra.mxu0 %v2938_v11 }
 0x7b1   :  { %2409 = vmatprep.subr.mxu0 %v2576_v7 }
 0x7b2   :  { %2410 = vmatpush3.msra.mxu0 %v2945_v16 }
 0x7b3   :  { %2411 = vmatprep.subr.mxu0 %v2576_v7 }
 0x7b4   :  { %2412 = vmatpush3.msra.mxu0 %v2952_v18 }
 0x7b5   :  { %2413 = vmatprep.subr.mxu0 %v2576_v7 }
 0x7b6   :  { %2414 = vmatpush3.msra.mxu0 %v2959_v27 }
 0x7b7   :  { %2415 = vmatprep.subr.mxu0 %v2576_v7 }
 0x7b8   :  { %2416 = vmatpush3.msra.mxu0 %v2965_v29 }
 0x7b9   :  { %2441 = vmatprep.subr.mxu0 %v2576_v7 }
 0x867   :  { %v1048_v32 = vpop.f32.mrf.mxu1 }
 0x868   :  { %v1049_v33 = vadd.f32 %v2973_v31, %v1048_v32 }
 0x869   :  { %v2400_v34 = vpop.f32.mrf.mxu1 }
 0x86a   :  { %v1053_v35 = vmul.f32 0.70710677, %v1049_v33  ;;  %v1052_v2 = vmul.f32 0.5, %v1049_v33 }
 0x86c   :  { %v1054_v36 = vand.u32 2147483647, %v1053_v35  ;;  %vm1074_vm9 = vcmp.ge.f32.partialorder %v1053_v35, 0.0 }
 0x86e   :  { %v1055_v38 = vmul.f32 0.3275911, %v1054_v36  ;;  %v1068_v43 = vmul.f32 %v1054_v36, %v1054_v36 }
 0x86f   :  { %v1247_v39 = vpop.f32.mrf.mxu1 }
 0x870   :  { %v1056_v40 = vadd.f32 1.0, %v1055_v38  ;;  %v2977_v41 = vadd.f32 %v2723_v21, %v1247_v39  ;;  %v1069_v21 = vsub.f32 0.0, %v1068_v43 }
 0x871   :  { %v2430_v42 = vpop.f32.mrf.mxu1 }
 0x872   :  { %2550 = vrcp.f32 %v1056_v40  ;;  %1418 = vrot.lane.b32.xlu1 %v2977_v41, %s2580_s23  ;;  %1252 = vrot.lane.b32.xlu0 %v2977_v41, %s2579_s2  ;;  %v1070_v46 = vmul.f32 1.442695, %v1069_v21 }
 0x874   :  { %2552 = vpow2.f32 %v1070_v46 }
 0x876   :  { %1416 = vrot.lane.b32.xlu1 %v2977_v41, %s2578_s1  ;;  %1584 = vrot.lane.b32.xlu0 %v2977_v41, %s2581_s24 }
 0x87a   :  { %1582 = vrot.lane.b32.xlu1 %v2977_v41, %s2582_s4  ;;  %1750 = vrot.lane.b32.xlu0 %v2977_v41, %s2583_s25 }
 0x87e   :  { %1748 = vrot.lane.b32.xlu1 %v2977_v41, %s2584_s26 }
 0x87f   :  { %v2551_v44 = vpop.eup %2550 }
 0x880   :  { %v1059_v45 = vmul.f32 1.0614054, %v2551_v44 }
 0x881   :  { %v2553_v57 = vpop.eup %2552 }
 0x882   :  { %v1060_v48 = vadd.f32 -1.4531521, %v1059_v45 }
 0x884   :  { %v1061_v49 = vmul.f32 %v2551_v44, %v1060_v48 }
 0x886   :  { %v1062_v50 = vadd.f32 1.4214138, %v1061_v49 }
 0x888   :  { %v1063_v51 = vmul.f32 %v2551_v44, %v1062_v50 }
 0x88a   :  { %v1064_v53 = vadd.f32 -0.28449672, %v1063_v51 }
 0x88c   :  { %v1065_v54 = vmul.f32 %v2551_v44, %v1064_v53 }
 0x88e   :  { %v1066_v55 = vadd.f32 0.2548296, %v1065_v54 }
 0x890   :  { %v1067_v56 = vmul.f32 %v2551_v44, %v1066_v55 }
 0x892   :  { %v1072_v58 = vmul.f32 %v2553_v57, %v1067_v56 }
 0x894   :  { %v1073_v59 = vsub.f32 1.0, %v1072_v58 }
 0x896   :  { %v1075_v60 = vsub.f32 0.0, %v1073_v59 }
 0x898   :  { %v1076_v1 = vsel %vm1074_vm9, %v1073_v59, %v1075_v60 }
 0x899   :  { %v1077_v3 = vadd.f32 1.0, %v1076_v1 }
 0x89b   :  { %v1078_v4 = vmul.f32 %v1077_v3, %v1052_v2 }
 0x89d   :  { %2418 = vmatmul.mubr.msk.f32.vlgmr.msra.gmra.mxu0 %vm1085_vm10, %v1078_v4 }
 0x89e   :  { %2443 = vmatprep.mubr.msk.f32.mxu0 %vm2577_vm1, %v2576_v7 }
 0x8e4   :  { %v1419_v5 = vpop.permute.xlu1 %1418  ;;  %v1253_v6 = vpop.permute.xlu0 %1252 }
 0x8e5   :  { %2432 = vmatpush3.xpose.msk.msra.mxu1 %vm185_vm3, %v1253_v6  ;;  %2442 = vmatpush3.xpose.msk.msra.mxu0 %vm185_vm3, %v1419_v5 }
 0x8e6   :  { %2451 = vmatprep.subr.mxu0 %v2576_v7  ;;  %2436 = vmatprep.subr.mxu1 %v2576_v7 }
 0x8e8   :  { %v1417_v12 = vpop.permute.xlu1 %1416  ;;  %2434 = vmatmul.mubr.msk.f32.vlgmr.msra.gmra.mxu1 %vm185_vm3, %v2977_v41  ;;  %v1585_v14 = vpop.permute.xlu0 %1584 }
 0x8e9   :  { %2444 = vmatmul.mubr.msk.f32.vlgmr.msra.gmra.mxu0 %vm185_vm3, %v1417_v12  ;;  %2438 = vmatprep.mubr.msk.f32.mxu1 %vm2577_vm1, %v2576_v7 }
 0x8ea   :  { %2452 = vmatpush3.xpose.msk.msra.mxu0 %vm185_vm3, %v1585_v14  ;;  %2453 = vmatprep.mubr.msk.f32.mxu0 %vm2577_vm1, %v2576_v7 }
 0x8eb   :  { %2461 = vmatprep.subr.mxu0 %v2576_v7 }
 0x8ec   :  { %v1583_v15 = vpop.permute.xlu1 %1582  ;;  %v1751_v19 = vpop.permute.xlu0 %1750 }
 0x8ed   :  { %2454 = vmatmul.mubr.msk.f32.vlgmr.msra.gmra.mxu0 %vm185_vm3, %v1583_v15 }
 0x8ee   :  { %2462 = vmatpush3.xpose.msk.msra.mxu0 %vm185_vm3, %v1751_v19  ;;  %2463 = vmatprep.mubr.msk.f32.mxu0 %vm2577_vm1, %v2576_v7 }
 0x8ef   :  { %2471 = vmatprep.subr.mxu0 %v2576_v7 }
 0x8f0   :  { %v1749_v20 = vpop.permute.xlu1 %1748 }
 0x8f1   :  { %2464 = vmatmul.mubr.msk.f32.vlgmr.msra.gmra.mxu0 %vm185_vm3, %v1749_v20 }
 0x8f2   :  { %2472 = vmatpush3.msra.mxu0 %v2802_v25  ;;  %2479 = vmatprep.mubr.msk.f32.mxu0 %vm2577_vm1, %v2576_v7  ;;  %v3028_v25 = vld [vmem:[%s3129_s12] ss:$0 sm:$0xff] }
 0x8f3   :  { %2473 = vmatprep.subr.mxu0 %v2576_v7 }
 0x8f4   :  { %2474 = vmatpush3.msra.mxu0 %v2807_v26 }
 0x8f5   :  { %2475 = vmatprep.subr.mxu0 %v2576_v7 }
 0x8f6   :  { %2476 = vmatpush3.msra.mxu0 %v2814_v28 }
 0x8f7   :  { %2477 = vmatprep.subr.mxu0 %v2576_v7 }
 0x8f8   :  { %2478 = vmatpush3.msra.mxu0 %v2823_v30 }
 0x8f9   :  { %2493 = vmatprep.subr.mxu0 %v2576_v7 }
 0x95d   :  { %v1155_v22 = vpop.f32.mrf.mxu0 }
 0x95e   :  { %v1156_v23 = vadd.f32 %v3028_v25, %v1155_v22 }
 0x95f   :  { %v2419_v24 = vpop.f32.mrf.mxu0 }
 0x960   :  { %v1159_v26 = vadd.f32 %v1156_v23, %v2851_v52 }
 0x962   :  { %1160 = vst.msk [vmem:[%s3130_s13] sm:$0x1f] %vm73_vm0, %v1159_v26 }
 0x9a8   :  { %v1324_v28 = vpop.f32.mrf.mxu1 }
 0x9a9   :  { %v1490_v30 = vpop.f32.mrf.mxu0  ;;  %v1328_v32 = vsel %vm260_vm4, %v1324_v28, -inf }
 0x9aa   :  { %1329 = vmax.xlane.f32.xlu0 %v1328_v32  ;;  %v2435_v33 = vpop.f32.mrf.mxu1  ;;  %v1494_v34 = vsel %vm260_vm4, %v1490_v30, -inf }
 0x9ab   :  { %1495 = vmax.xlane.f32.xlu1 %v1494_v34  ;;  %v2445_v35 = vpop.f32.mrf.mxu0 }
 0x9ad   :  { %v1656_v36 = vpop.f32.mrf.mxu0 }
 0x9ae   :  { %v1660_v38 = vsel %vm260_vm4, %v1656_v36, -inf }
 0x9af   :  { %v2455_v39 = vpop.f32.mrf.mxu0  ;;  %1661 = vmax.xlane.f32.xlu0 %v1660_v38 }
 0x9b1   :  { %v1822_v52 = vpop.f32.mrf.mxu0 }
 0x9b2   :  { %v1826_v40 = vsel %vm260_vm4, %v1822_v52, -inf }
 0x9b3   :  { %v2465_v42 = vpop.f32.mrf.mxu0  ;;  %1827 = vmax.xlane.f32.xlu0 %v1826_v40 }
 0x9bc   :  { %1339 = vrot.lane.b32.xlu1 %v2977_v41, %s2585_s27 }
 0xa33   :  { %v1330_v43 = vpop.xlane.xlu0 %1329 }
 0xa34   :  { %v1331_v21 = vsub.f32 %v1324_v28, %v1330_v43  ;;  %v1496_v44 = vpop.xlane.xlu1 %1495 }
 0xa35   :  { %v1497_v45 = vsub.f32 %v1490_v30, %v1496_v44 }
 0xa36   :  { %v1332_v46 = vmul.f32 1.442695, %v1331_v21 }
 0xa37   :  { %v1498_v48 = vmul.f32 1.442695, %v1497_v45 }
 0xa38   :  { %2554 = vpow2.f32 %v1332_v46  ;;  %v1340_v49 = vpop.permute.xlu1 %1339  ;;  %v1662_v50 = vpop.xlane.xlu0 %1661 }
 0xa39   :  { %2556 = vpow2.f32 %v1498_v48  ;;  %v1663_v51 = vsub.f32 %v1656_v36, %v1662_v50  ;;  %2437 = vmatpush3.msk.msra.mxu1 %vm278_vm5, %v1340_v49 }
 0xa3a   :  { %2446 = vmatprep.subr.mxu1 %v2576_v7 }
 0xa3b   :  { %v1664_v53 = vmul.f32 1.442695, %v1663_v51 }
 0xa3c   :  { %v1828_v54 = vpop.xlane.xlu0 %1827 }
 0xa3d   :  { %2558 = vpow2.f32 %v1664_v53  ;;  %v1829_v55 = vsub.f32 %v1822_v52, %v1828_v54 }
 0xa3f   :  { %v1830_v56 = vmul.f32 1.442695, %v1829_v55 }
 0xa41   :  { %2560 = vpow2.f32 %v1830_v56 }
 0xa45   :  { %v2555_v57 = vpop.eup %2554 }
 0xa46   :  { %v2557_v58 = vpop.eup %2556  ;;  %v1334_v59 = vsel %vm260_vm4, %v2555_v57, 0.0 }
 0xa47   :  { %1335 = vadd.xlane.f32.xlu1 %v1334_v59  ;;  %v1500_v60 = vsel %vm260_vm4, %v2557_v58, 0.0 }
 0xa48   :  { %1501 = vadd.xlane.f32.xlu0 %v1500_v60 }
 0xa4a   :  { %v2559_v1 = vpop.eup %2558 }
 0xa4b   :  { %v1666_v2 = vsel %vm260_vm4, %v2559_v1, 0.0 }
 0xa4c   :  { %1667 = vadd.xlane.f32.xlu1 %v1666_v2 }
 0xa4e   :  { %v2561_v3 = vpop.eup %2560 }
 0xa4f   :  { %v1832_v4 = vsel %vm260_vm4, %v2561_v3, 0.0 }
 0xa50   :  { %1833 = vadd.xlane.f32.xlu0 %v1832_v4 }
 0xa5d   :  { %1671 = vrot.lane.b32.xlu1 %v2977_v41, %s2586_s28 }
 0xa61   :  { %1837 = vrot.lane.b32.xlu1 %v2977_v41, %s2587_s29 }
 0xa66   :  { %1505 = vrot.lane.b32.xlu0 %v2977_v41, %s2588_s30 }
 0xad0   :  { %v1336_v5 = vpop.xlane.xlu1 %1335 }
 0xad1   :  { %2562 = vrcp.f32 %v1336_v5  ;;  %v1502_v6 = vpop.xlane.xlu0 %1501 }
 0xad2   :  { %2564 = vrcp.f32 %v1502_v6 }
 0xad5   :  { %v1668_v12 = vpop.xlane.xlu1 %1667 }
 0xad6   :  { %2566 = vrcp.f32 %v1668_v12 }
 0xad9   :  { %v1834_v14 = vpop.xlane.xlu0 %1833  ;;  %v1672_v41 = vpop.permute.xlu1 %1671 }
 0xada   :  { %2568 = vrcp.f32 %v1834_v14 }
 0xadd   :  { %v1506_v22 = vpop.permute.xlu0 %1505  ;;  %v1838_v30 = vpop.permute.xlu1 %1837 }
 0xade   :  { %v2563_v15 = vpop.eup %2562 }
 0xadf   :  { %v1338_v19 = vmul.f32 %v2563_v15, %v2555_v57  ;;  %v2565_v20 = vpop.eup %2564 }
 0xae0   :  { %v1504_v23 = vmul.f32 %v2565_v20, %v2557_v58 }
 0xae1   :  { %2439 = vmatmul.mubr.msk.f32.vlgmr.msra.gmra.mxu1 %vm274_vm6, %v1338_v19 }
 0xae2   :  { %2447 = vmatpush3.msk.msra.mxu1 %vm278_vm5, %v1506_v22  ;;  %2448 = vmatprep.mubr.msk.f32.mxu1 %vm2577_vm1, %v2576_v7 }
 0xae3   :  { %2456 = vmatprep.subr.mxu1 %v2576_v7  ;;  %v2567_v24 = vpop.eup %2566 }
 0xae4   :  { %v1670_v26 = vmul.f32 %v2567_v24, %v2559_v1 }
 0xae5   :  { %2449 = vmatmul.mubr.msk.f32.vlgmr.msra.gmra.mxu1 %vm274_vm6, %v1504_v23 }
 0xae6   :  { %2457 = vmatpush3.msk.msra.mxu1 %vm278_vm5, %v1672_v41  ;;  %2458 = vmatprep.mubr.msk.f32.mxu1 %vm2577_vm1, %v2576_v7 }
 0xae7   :  { %2466 = vmatprep.subr.mxu1 %v2576_v7  ;;  %v2569_v28 = vpop.eup %2568 }
 0xae8   :  { %v1836_v32 = vmul.f32 %v2569_v28, %v2561_v3 }
 0xae9   :  { %2459 = vmatmul.mubr.msk.f32.vlgmr.msra.gmra.mxu1 %vm274_vm6, %v1670_v26 }
 0xaea   :  { %2467 = vmatpush3.msk.msra.mxu1 %vm278_vm5, %v1838_v30  ;;  %2468 = vmatprep.mubr.msk.f32.mxu1 %vm2577_vm1, %v2576_v7 }
 0xaeb   :  { %2482 = vmatprep.subr.mxu1 %v2576_v7 }
 0xaed   :  { %2469 = vmatmul.mubr.msk.f32.vlgmr.msra.gmra.mxu1 %vm274_vm6, %v1836_v32 }
 0xaee   :  { %2483 = vmatpush3.msra.mxu1 %v2861_v0  ;;  %2490 = vmatprep.mubr.msk.f32.mxu1 %vm2577_vm1, %v2576_v7 }
 0xaef   :  { %2484 = vmatprep.subr.mxu1 %v2576_v7 }
 0xaf0   :  { %2485 = vmatpush3.msra.mxu1 %v2868_v61 }
 0xaf1   :  { %2486 = vmatprep.subr.mxu1 %v2576_v7 }
 0xaf2   :  { %2487 = vmatpush3.msra.mxu1 %v2873_v62 }
 0xaf3   :  { %2488 = vmatprep.subr.mxu1 %v2576_v7 }
 0xaf4   :  { %2489 = vmatpush3.msra.mxu1 %v2880_v63 }
 0xba1   :  { %v1412_v33 = vpop.f32.mrf.mxu1 }
 0xba3   :  { %v2440_v34 = vpop.f32.mrf.mxu1 }
 0xba5   :  { %v1578_v35 = vpop.f32.mrf.mxu1 }
 0xba6   :  { %1915 = vrot.lane.b32.xlu0 %v1578_v35, %s2589_s21 }
 0xba7   :  { %v2450_v0 = vpop.f32.mrf.mxu1 }
 0xba9   :  { %v1744_v36 = vpop.f32.mrf.mxu1 }
 0xbaa   :  { %1919 = vrot.lane.b32.xlu1 %v1744_v36, %s2590_s22 }
 0xbab   :  { %v2460_v38 = vpop.f32.mrf.mxu1 }
 0xbad   :  { %v1910_v39 = vpop.f32.mrf.mxu1 }
 0xbae   :  { %1923 = vrot.lane.b32.xlu0 %v1910_v39, %s2591_s14 }
 0xbaf   :  { %v2470_v61 = vpop.f32.mrf.mxu1 }
 0xc18   :  { %v1916_v52 = vpop.permute.xlu0 %1915 }
 0xc19   :  { %v1926_v40 = vsel %vm185_vm3, %v1412_v33, %v1916_v52 }
 0xc1c   :  { %v1920_v62 = vpop.permute.xlu1 %1919 }
 0xc1d   :  { %v1927_v63 = vsel %vm862_vm7, %v1926_v40, %v1920_v62 }
 0xc20   :  { %v1924_v42 = vpop.permute.xlu0 %1923 }
 0xc21   :  { %v1928_v43 = vsel %vm864_vm8, %v1927_v63, %v1924_v42 }
 0xc22   :  { %2480 = vmatmul.mubr.msk.f32.vlgmr.msra.gmra.mxu0 %vm108_vm2, %v1928_v43 }
 0xc23   :  { %2494 = vmatpush3.msra.mxu0 %v2917_v8  ;;  %2509 = vmatprep.mubr.msk.f32.mxu0 %vm2577_vm1, %v2576_v7 }
 0xc24   :  { %2495 = vmatprep.subr.mxu0 %v2576_v7 }
 0xc25   :  { %2496 = vmatpush3.msra.mxu0 %v2924_v9 }
 0xc26   :  { %2497 = vmatprep.subr.mxu0 %v2576_v7 }
 0xc27   :  { %2498 = vmatpush3.msra.mxu0 %v2931_v10 }
 0xc28   :  { %2499 = vmatprep.subr.mxu0 %v2576_v7 }
 0xc29   :  { %2500 = vmatpush3.msra.mxu0 %v2938_v11 }
 0xc2a   :  { %2501 = vmatprep.subr.mxu0 %v2576_v7 }
 0xc2b   :  { %2502 = vmatpush3.msra.mxu0 %v2945_v16 }
 0xc2c   :  { %2503 = vmatprep.subr.mxu0 %v2576_v7 }
 0xc2d   :  { %2504 = vmatpush3.msra.mxu0 %v2952_v18 }
 0xc2e   :  { %2505 = vmatprep.subr.mxu0 %v2576_v7 }
 0xc2f   :  { %2506 = vmatpush3.msra.mxu0 %v2959_v27 }
 0xc30   :  { %2507 = vmatprep.subr.mxu0 %v2576_v7 }
 0xc31   :  { %2508 = vmatpush3.msra.mxu0 %v2965_v29 }
 0xce2   :  { %v1998_v8 = vpop.f32.mrf.mxu0 }
 0xce3   :  { %v1999_v9 = vadd.f32 %v2846_v47, %v1998_v8 }
 0xce4   :  { %v2481_v10 = vpop.f32.mrf.mxu0 }
 0xce5   :  { %v2002_v11 = vadd.f32 %v2833_v37, %v1999_v9 }
 0xce7   :  { %v2003_v16 = vsel %vm73_vm0, %v2002_v11, 0.0 }
 0xce8   :  { %2004 = vadd.xlane.f32.xlu1 %v2003_v16 }
 0xd71   :  { %v2005_v21 = vpop.xlane.xlu1 %2004 }
 0xd72   :  { %v2006_v44 = vmul.f32 0.03125, %v2005_v21 }
 0xd74   :  { %v2007_v18 = vsub.f32 %v2002_v11, %v2006_v44 }
 0xd76   :  { %v2008_v45 = vmul.f32 %v2007_v18, %v2007_v18 }
 0xd78   :  { %v2009_v46 = vsel %vm73_vm0, %v2008_v45, 0.0 }
 0xd79   :  { %2010 = vadd.xlane.f32.xlu0 %v2009_v46 }
 0xe02   :  { %v2011_v27 = vpop.xlane.xlu0 %2010 }
 0xe03   :  { %v2012_v7 = vmul.f32 0.03125, %v2011_v27 }
 0xe05   :  { %v2013_v48 = vadd.f32 1e-06, %v2012_v7 }
 0xe07   :  { %2570 = vrsqrt.f32 %v2013_v48 }
 0xe14   :  { %v2571_v29 = vpop.eup %2570 }
 0xe15   :  { %v2015_v49 = vmul.f32 %v2571_v29, %v2007_v18 }
 0xe17   :  { %v2016_v47 = vmul.f32 %v2889_v13, %v2015_v49 }
 0xe19   :  { %v2017_v37 = vadd.f32 %v2894_v17, %v2016_v47 }
 0xe1b   :  { %2491 = vmatmul.mubr.msk.f32.vlgmr.msra.gmra.mxu1 %vm108_vm2, %v2017_v37 }
 0xedb   :  { %v2087_v50 = vpop.f32.mrf.mxu1 }
 0xedc   :  { %v2088_v51 = vadd.f32 %v2973_v31, %v2087_v50 }
 0xedd   :  { %v2492_v53 = vpop.f32.mrf.mxu1 }
 0xede   :  { %v2092_v54 = vmul.f32 0.70710677, %v2088_v51  ;;  %v2091_v41 = vmul.f32 0.5, %v2088_v51 }
 0xee0   :  { %v2093_v55 = vand.u32 2147483647, %v2092_v54  ;;  %vm2113_vm11 = vcmp.ge.f32.partialorder %v2092_v54, 0.0 }
 0xee2   :  { %v2094_v56 = vmul.f32 0.3275911, %v2093_v55  ;;  %v2107_v58 = vmul.f32 %v2093_v55, %v2093_v55 }
 0xee4   :  { %v2095_v57 = vadd.f32 1.0, %v2094_v56  ;;  %v2108_v59 = vsub.f32 0.0, %v2107_v58 }
 0xee6   :  { %2572 = vrcp.f32 %v2095_v57  ;;  %v2109_v2 = vmul.f32 1.442695, %v2108_v59 }
 0xee8   :  { %2574 = vpow2.f32 %v2109_v2 }
 0xef3   :  { %v2573_v60 = vpop.eup %2572 }
 0xef4   :  { %v2098_v1 = vmul.f32 1.0614054, %v2573_v60 }
 0xef5   :  { %v2575_v14 = vpop.eup %2574 }
 0xef6   :  { %v2099_v3 = vadd.f32 -1.4531521, %v2098_v1 }
 0xef8   :  { %v2100_v13 = vmul.f32 %v2573_v60, %v2099_v3 }
 0xefa   :  { %v2101_v17 = vadd.f32 1.4214138, %v2100_v13 }
 0xefc   :  { %v2102_v4 = vmul.f32 %v2573_v60, %v2101_v17 }
 0xefe   :  { %v2103_v5 = vadd.f32 -0.28449672, %v2102_v4 }
 0xf00   :  { %v2104_v6 = vmul.f32 %v2573_v60, %v2103_v5 }
 0xf02   :  { %v2105_v12 = vadd.f32 0.2548296, %v2104_v6 }
 0xf04   :  { %v2106_v31 = vmul.f32 %v2573_v60, %v2105_v12 }
 0xf06   :  { %v2111_v15 = vmul.f32 %v2575_v14, %v2106_v31 }
 0xf08   :  { %v2112_v19 = vsub.f32 1.0, %v2111_v15 }
 0xf0a   :  { %v2114_v20 = vsub.f32 0.0, %v2112_v19 }
 0xf0c   :  { %v2115_v22 = vsel %vm2113_vm11, %v2112_v19, %v2114_v20 }
 0xf0d   :  { %v2116_v23 = vadd.f32 1.0, %v2115_v22 }
 0xf0f   :  { %v2117_v24 = vmul.f32 %v2116_v23, %v2091_v41 }
 0xf11   :  { %2510 = vmatmul.mubr.msk.f32.vlgmr.msra.gmra.mxu0 %vm1085_vm10, %v2117_v24 }
 0xfd1   :  { %v2187_v26 = vpop.f32.mrf.mxu0 }
 0xfd2   :  { %v2188_v28 = vadd.f32 %v3028_v25, %v2187_v26 }
 0xfd3   :  { %v2511_v30 = vpop.f32.mrf.mxu0 }
 0xfd4   :  { %v2191_v32 = vadd.f32 %v2188_v28, %v2002_v11 }
 0xfd6   :  { %2247 = vst.msk [vmem:[%s3130_s13 + $0x8] sm:$0x1f] %vm73_vm0, %v2191_v32 }

// kernel: extractor_ap_forward.7
= control target key start
LH: loop header
LB: loop body
LE: loop exit
PB: predicated region body
PF: predicated region fallthrough
CT: control target
= control target key end

     0   :  { %vm140_vm0 = vcmask 258048   ;;  %v4695_v7 = vmov 0.0   ;;  %vm4696_vm1 = vmmov 0   ;;  %vm46_vm2 = vcmask 326656   ;;  %s4699_s26 = smov 108   ;;  %s4700_s27 = smov 104   ;;  %s5553_s0 = inlined_call_operand.vmem [shape: f32[2,5,32], index: 0, kind: input, shape index: {}]   ;;  %s5554_s4 = inlined_call_operand.vmem [shape: f32[40,40], index: 4, kind: input, shape index: {}]   ;;  %s5555_s5 = inlined_call_operand.vmem [shape: f32[32,80], index: 5, kind: input, shape index: {}]   ;;  %s5556_s3 = inlined_call_operand.vmem [shape: f32[2,40], index: 3, kind: input, shape index: {}]   ;;  %s5557_s1 = inlined_call_operand.vmem [shape: f32[1,32], index: 1, kind: input, shape index: {}]   ;;  %s5558_s2 = inlined_call_operand.vmem [shape: f32[1,32], index: 2, kind: input, shape index: {}]   ;;  %s5559_s6 = inlined_call_operand.vmem [shape: f32[40,40], index: 6, kind: input, shape index: {}]   ;;  %s5560_s9 = inlined_call_operand.vmem [shape: f32[40,8], index: 9, kind: input, shape index: {}]   ;;  %s5561_s7 = inlined_call_operand.vmem [shape: f32[1,40], index: 7, kind: input, shape index: {}]   ;;  %s5562_s8 = inlined_call_operand.vmem [shape: f32[1,40], index: 8, kind: input, shape index: {}]   ;;  %s5563_s11 = inlined_call_operand.vmem [shape: f32[2,2,40], index: 11, kind: output, shape index: {0}]   ;;  %s5564_s10 = inlined_call_operand.vmem [shape: f32[1,8], index: 10, kind: input, shape index: {}]   ;;  %s5565_s12 = inlined_call_operand.vmem [shape: f32[2,8], index: 12, kind: output, shape index: {1}]  }
   0x1   :  { %v139_v0 = vld [vmem:[%s5553_s0] sm:$0x1f]  ;;  %4290 = vmatprep.subr.mxu0 %v4695_v7  ;;  %v44_v9 = vld [vmem:[%s5554_s4 + $0x18] sm:$0xff]  ;;  %4303 = vmatprep.subr.mxu1 %v4695_v7  ;;  %v43_v11 = vld [vmem:[%s5554_s4 + $0x10] sm:$0xff]  ;;  %vm169_vm3 = vcmask 261120   ;;  %vm243_vm4 = vcmask 31744  }
   0x2   :  { %v141_v1 = vsel %vm140_vm0, %v139_v0, 0.0  ;;  %v45_v8 = vld [vmem:[%s5554_s4 + $0x20] sm:$0xff]  ;;  %4300 = vmatprep.mubr.msk.f32.mxu0 %vm4696_vm1, %v4695_v7  ;;  %v4808_v10 = vld [vmem:[%s5555_s5 + $0x18] sm:$0xff]  ;;  %v4818_v12 = vld [vmem:[%s5555_s5 + $0x10] sm:$0xff]  ;;  %4311 = vmatprep.mubr.msk.f32.mxu1 %vm4696_vm1, %v4695_v7  ;;  %s4701_s28 = smov 116   ;;  %s4702_s29 = smov 100  }
   0x3   :  { %142 = vadd.xlane.f32.xlu0 %v141_v1  ;;  %4291 = vmatpush3.msra.mxu0 %v45_v8  ;;  %v4824_v13 = vld [vmem:[%s5555_s5 + $0x8] sm:$0xff]  ;;  %v4835_v15 = vld [vmem:[%s5555_s5] sm:$0xff]  ;;  %s4703_s30 = smov 112   ;;  %s4704_s13 = smov 96   ;;  %vm338_vm5 = vcmask 1044480   ;;  %vm320_vm6 = vcmask 33792  }
   0x4   :  { %4292 = vmatprep.subr.mxu0 %v4695_v7  ;;  %4304 = vmatpush3.msra.mxu1 %v4808_v10  ;;  %v42_v14 = vld [vmem:[%s5554_s4 + $0x8] sm:$0xff]  ;;  %v41_v16 = vld [vmem:[%s5554_s4] sm:$0xff]  ;;  %s4705_s14 = smov 92   ;;  %s4706_s15 = smov 84   ;;  %vm334_vm7 = vcmask 39936   ;;  %vm1942_vm8 = vcmask 64512  }
   0x5   :  { %4293 = vmatpush3.msra.mxu0 %v44_v9  ;;  %4305 = vmatprep.subr.mxu1 %v4695_v7  ;;  %v40_v17 = vld [vmem:[%s5556_s3] sm:$0x3]  ;;  %s4707_s16 = smov 88   ;;  %s4708_s17 = smov 76   ;;  %vm1944_vm9 = vcmask 97280   ;;  %vm1946_vm10 = vcmask 130048  }
   0x6   :  { %4294 = vmatprep.subr.mxu0 %v4695_v7  ;;  %4306 = vmatpush3.msra.mxu1 %v4818_v12  ;;  %v4858_v22 = vld [vmem:[%s5557_s1] ss:$0 sm:$0xff]  ;;  %s4697_s1 = smov 124   ;;  %s4709_s18 = smov 80   ;;  %vm1948_vm11 = vcmask 162816   ;;  %vm1950_vm12 = vcmask 195584  }
   0x7   :  { %4295 = vmatpush3.msra.mxu0 %v43_v11  ;;  %4307 = vmatprep.subr.mxu1 %v4695_v7  ;;  %v4863_v24 = vld [vmem:[%s5558_s2] ss:$0 sm:$0xff]  ;;  %s4698_s2 = smov 120   ;;  %s4710_s19 = smov 68   ;;  %vm1952_vm13 = vcmask 228352   ;;  %vm1955_vm14 = vcmask 293888  }
   0x8   :  { %4296 = vmatprep.subr.mxu0 %v4695_v7  ;;  %4308 = vmatpush3.msra.mxu1 %v4824_v13  ;;  %s4711_s20 = smov 64   ;;  %s4712_s21 = smov 60   ;;  %vm5575_vm15 = vcmask 320512  }
   0x9   :  { %4297 = vmatpush3.msra.mxu0 %v42_v14  ;;  %4309 = vmatprep.subr.mxu1 %v4695_v7  ;;  %s5567_s22 = smov 72   ;;  %s5569_s23 = smov 56  }
   0xa   :  { %4298 = vmatprep.subr.mxu0 %v4695_v7  ;;  %4310 = vmatpush3.msra.mxu1 %v4835_v15  ;;  %s5566_s24 = smov 52   ;;  %s5568_s3 = smov 4  }
   0xb   :  { %4299 = vmatpush3.msra.mxu0 %v41_v16  ;;  %4314 = vmatprep.subr.mxu1 %v4695_v7  ;;  %s4717_s4 = smov 8   ;;  %s5571_s5 = smov 12  }
   0xc   :  { %4301 = vmatmul.mubr.msk.f32.vlgmr.msra.gmra.mxu0 %vm46_vm2, %v40_v17  ;;  %4319 = vmatprep.subr.mxu0 %v4695_v7  ;;  %s5570_s25 = smov 16  }
   0xd   :  { %4321 = vmatprep.mubr.msk.f32.mxu0 %vm4696_vm1, %v4695_v7 }
  0x8c   :  { %v143_v2 = vpop.xlane.xlu0 %142 }
  0x8d   :  { %v145_v3 = vmul.f32 0.03125, %v143_v2 }
  0x8f   :  { %v146_v4 = vsub.f32 %v139_v0, %v145_v3 }
  0x91   :  { %v147_v5 = vmul.f32 %v146_v4, %v146_v4 }
  0x93   :  { %v148_v6 = vsel %vm140_vm0, %v147_v5, 0.0 }
  0x94   :  { %149 = vadd.xlane.f32.xlu0 %v148_v6 }
  0xcc   :  { %v4870_v27 = vpop.f32.mrf.mxu0 }
  0xcd   :  { %411 = vrot.lane.b32.xlu1 %v4870_v27, %s4697_s1 }
  0xce   :  { %v4302_v28 = vpop.f32.mrf.mxu0 }
 0x11d   :  { %v150_v18 = vpop.xlane.xlu0 %149 }
 0x11e   :  { %v151_v19 = vmul.f32 0.03125, %v150_v18 }
 0x120   :  { %v152_v20 = vadd.f32 1e-06, %v151_v19 }
 0x122   :  { %4607 = vrsqrt.f32 %v152_v20 }
 0x12f   :  { %v4608_v21 = vpop.eup %4607 }
 0x130   :  { %v154_v23 = vmul.f32 %v4608_v21, %v146_v4 }
 0x132   :  { %v161_v25 = vmul.f32 %v4858_v22, %v154_v23 }
 0x134   :  { %v168_v26 = vadd.f32 %v4863_v24, %v161_v25 }
 0x136   :  { %4312 = vmatmul.mubr.msk.f32.vlgmr.msra.gmra.mxu1 %vm169_vm3, %v168_v26 }
 0x137   :  { %4316 = vmatprep.mubr.msk.f32.mxu1 %vm4696_vm1, %v4695_v7 }
 0x13f   :  { %v4921_v31 = vpop.permute.xlu1 %411 }
 0x1f6   :  { %v4874_v29 = vpop.f32.mrf.mxu1 }
 0x1f7   :  { %579 = vrot.lane.b32.xlu0 %v4874_v29, %s4698_s2  ;;  %413 = vrot.lane.b32.xlu1 %v4874_v29, %s4697_s1 }
 0x1f8   :  { %4315 = vmatpush3.xpose.msk.msra.mxu1 %vm243_vm4, %v4874_v29  ;;  %v4313_v30 = vpop.f32.mrf.mxu1 }
 0x1f9   :  { %4324 = vmatprep.subr.mxu1 %v4695_v7 }
 0x1fb   :  { %4317 = vmatmul.mubr.msk.f32.vlgmr.msra.gmra.mxu1 %vm243_vm4, %v4870_v27  ;;  %1075 = vrot.lane.b32.xlu0 %v4870_v27, %s4699_s26 }
 0x1fc   :  { %577 = vrot.lane.b32.xlu1 %v4870_v27, %s4698_s2  ;;  %4326 = vmatprep.mubr.msk.f32.mxu1 %vm4696_vm1, %v4695_v7 }
 0x1ff   :  { %1241 = vrot.lane.b32.xlu0 %v4870_v27, %s4700_s27 }
 0x200   :  { %743 = vrot.lane.b32.xlu1 %v4870_v27, %s4701_s28 }
 0x203   :  { %1407 = vrot.lane.b32.xlu0 %v4870_v27, %s4702_s29 }
 0x204   :  { %909 = vrot.lane.b32.xlu1 %v4870_v27, %s4703_s30 }
 0x207   :  { %1573 = vrot.lane.b32.xlu0 %v4870_v27, %s4704_s13 }
 0x208   :  { %745 = vrot.lane.b32.xlu1 %v4874_v29, %s4701_s28 }
 0x20b   :  { %1739 = vrot.lane.b32.xlu0 %v4870_v27, %s4705_s14 }
 0x20c   :  { %911 = vrot.lane.b32.xlu1 %v4874_v29, %s4703_s30 }
 0x20f   :  { %500 = vrot.lane.b32.xlu0 %v4874_v29, %s4706_s15 }
 0x210   :  { %1077 = vrot.lane.b32.xlu1 %v4874_v29, %s4699_s26 }
 0x214   :  { %1243 = vrot.lane.b32.xlu1 %v4874_v29, %s4700_s27 }
 0x218   :  { %1409 = vrot.lane.b32.xlu1 %v4874_v29, %s4702_s29 }
 0x21c   :  { %1575 = vrot.lane.b32.xlu1 %v4874_v29, %s4704_s13 }
 0x220   :  { %1741 = vrot.lane.b32.xlu1 %v4874_v29, %s4705_s14 }
 0x224   :  { %332 = vrot.lane.b32.xlu1 %v4874_v29, %s4707_s16 }
 0x269   :  { %v414_v32 = vpop.permute.xlu1 %413  ;;  %v580_v33 = vpop.permute.xlu0 %579 }
 0x26a   :  { %4325 = vmatpush3.xpose.msk.msra.mxu1 %vm243_vm4, %v414_v32 }
 0x26b   :  { %4334 = vmatprep.subr.mxu1 %v4695_v7 }
 0x26d   :  { %4327 = vmatmul.mubr.msk.f32.vlgmr.msra.gmra.mxu1 %vm243_vm4, %v4921_v31  ;;  %v4943_v38 = vpop.permute.xlu0 %1075 }
 0x26e   :  { %v4927_v34 = vpop.permute.xlu1 %577  ;;  %4335 = vmatpush3.xpose.msk.msra.mxu1 %vm243_vm4, %v580_v33  ;;  %4336 = vmatprep.mubr.msk.f32.mxu1 %vm4696_vm1, %v4695_v7 }
 0x26f   :  { %4344 = vmatprep.subr.mxu1 %v4695_v7 }
 0x271   :  { %4337 = vmatmul.mubr.msk.f32.vlgmr.msra.gmra.mxu1 %vm243_vm4, %v4927_v34  ;;  %v4953_v41 = vpop.permute.xlu0 %1241 }
 0x272   :  { %v4935_v35 = vpop.permute.xlu1 %743  ;;  %4346 = vmatprep.mubr.msk.f32.mxu1 %vm4696_vm1, %v4695_v7 }
 0x275   :  { %v4965_v43 = vpop.permute.xlu0 %1407 }
 0x276   :  { %v4939_v36 = vpop.permute.xlu1 %909 }
 0x279   :  { %v4975_v46 = vpop.permute.xlu0 %1573 }
 0x27a   :  { %v746_v37 = vpop.permute.xlu1 %745 }
 0x27b   :  { %4345 = vmatpush3.xpose.msk.msra.mxu1 %vm243_vm4, %v746_v37 }
 0x27c   :  { %4354 = vmatprep.subr.mxu1 %v4695_v7 }
 0x27d   :  { %v4987_v48 = vpop.permute.xlu0 %1739 }
 0x27e   :  { %v912_v39 = vpop.permute.xlu1 %911  ;;  %4347 = vmatmul.mubr.msk.f32.vlgmr.msra.gmra.mxu1 %vm243_vm4, %v4935_v35 }
 0x27f   :  { %4355 = vmatpush3.xpose.msk.msra.mxu1 %vm243_vm4, %v912_v39  ;;  %4356 = vmatprep.mubr.msk.f32.mxu1 %vm4696_vm1, %v4695_v7 }
 0x280   :  { %4364 = vmatprep.subr.mxu1 %v4695_v7 }
 0x281   :  { %v5028_v30 = vpop.permute.xlu0 %500 }
 0x282   :  { %v1078_v40 = vpop.permute.xlu1 %1077  ;;  %4357 = vmatmul.mubr.msk.f32.vlgmr.msra.gmra.mxu1 %vm243_vm4, %v4939_v36 }
 0x283   :  { %4365 = vmatpush3.xpose.msk.msra.mxu1 %vm243_vm4, %v1078_v40  ;;  %4366 = vmatprep.mubr.msk.f32.mxu1 %vm4696_vm1, %v4695_v7 }
 0x284   :  { %4374 = vmatprep.subr.mxu1 %v4695_v7 }
 0x286   :  { %v1244_v42 = vpop.permute.xlu1 %1243  ;;  %4367 = vmatmul.mubr.msk.f32.vlgmr.msra.gmra.mxu1 %vm243_vm4, %v4943_v38 }
 0x287   :  { %4375 = vmatpush3.xpose.msk.msra.mxu1 %vm243_vm4, %v1244_v42  ;;  %4376 = vmatprep.mubr.msk.f32.mxu1 %vm4696_vm1, %v4695_v7 }
 0x288   :  { %4384 = vmatprep.subr.mxu1 %v4695_v7 }
 0x28a   :  { %v1410_v44 = vpop.permute.xlu1 %1409  ;;  %4377 = vmatmul.mubr.msk.f32.vlgmr.msra.gmra.mxu1 %vm243_vm4, %v4953_v41 }
 0x28b   :  { %4385 = vmatpush3.xpose.msk.msra.mxu1 %vm243_vm4, %v1410_v44  ;;  %4386 = vmatprep.mubr.msk.f32.mxu1 %vm4696_vm1, %v4695_v7 }
 0x28c   :  { %4394 = vmatprep.subr.mxu1 %v4695_v7 }
 0x28e   :  { %v1576_v45 = vpop.permute.xlu1 %1575  ;;  %4387 = vmatmul.mubr.msk.f32.vlgmr.msra.gmra.mxu1 %vm243_vm4, %v4965_v43 }
 0x28f   :  { %4395 = vmatpush3.xpose.msk.msra.mxu1 %vm243_vm4, %v1576_v45  ;;  %4396 = vmatprep.mubr.msk.f32.mxu1 %vm4696_vm1, %v4695_v7 }
 0x290   :  { %4404 = vmatprep.subr.mxu1 %v4695_v7 }
 0x292   :  { %v1742_v47 = vpop.permute.xlu1 %1741  ;;  %4397 = vmatmul.mubr.msk.f32.vlgmr.msra.gmra.mxu1 %vm243_vm4, %v4975_v46 }
 0x293   :  { %4405 = vmatpush3.xpose.msk.msra.mxu1 %vm243_vm4, %v1742_v47  ;;  %4406 = vmatprep.mubr.msk.f32.mxu1 %vm4696_vm1, %v4695_v7 }
 0x294   :  { %4414 = vmatprep.subr.mxu1 %v4695_v7 }
 0x296   :  { %v333_v49 = vpop.permute.xlu1 %332  ;;  %4407 = vmatmul.mubr.msk.f32.vlgmr.msra.gmra.mxu1 %vm243_vm4, %v4987_v48 }
 0x297   :  { %4320 = vmatpush3.msk.msra.mxu0 %vm338_vm5, %v333_v49  ;;  %4424 = vmatprep.mubr.msk.f32.mxu1 %vm4696_vm1, %v4695_v7 }
 0x298   :  { %4329 = vmatprep.subr.mxu0 %v4695_v7 }
 0x2bb   :  { %v316_v50 = vpop.f32.mrf.mxu1 }
 0x2bc   :  { %v321_v51 = vsel %vm320_vm6, %v316_v50, -inf }
 0x2bd   :  { %322 = vmax.xlane.f32.xlu1 %v321_v51  ;;  %v4318_v52 = vpop.f32.mrf.mxu1 }
 0x32d   :  { %v485_v53 = vpop.f32.mrf.mxu1 }
 0x32e   :  { %v489_v54 = vsel %vm320_vm6, %v485_v53, -inf }
 0x32f   :  { %490 = vmax.xlane.f32.xlu0 %v489_v54  ;;  %v4328_v55 = vpop.f32.mrf.mxu1 }
 0x331   :  { %v651_v56 = vpop.f32.mrf.mxu1 }
 0x332   :  { %v655_v57 = vsel %vm320_vm6, %v651_v56, -inf }
 0x333   :  { %656 = vmax.xlane.f32.xlu0 %v655_v57  ;;  %v4338_v58 = vpop.f32.mrf.mxu1 }
 0x33e   :  { %v817_v59 = vpop.f32.mrf.mxu1 }
 0x33f   :  { %v821_v60 = vsel %vm320_vm6, %v817_v59, -inf }
 0x340   :  { %822 = vmax.xlane.f32.xlu1 %v821_v60  ;;  %v4348_v61 = vpop.f32.mrf.mxu1 }
 0x342   :  { %v983_v62 = vpop.f32.mrf.mxu1 }
 0x343   :  { %v987_v63 = vsel %vm320_vm6, %v983_v62, -inf }
 0x344   :  { %988 = vmax.xlane.f32.xlu0 %v987_v63  ;;  %v4358_v0 = vpop.f32.mrf.mxu1 }
 0x346   :  { %v5000_v1 = vpop.f32.mrf.mxu1  ;;  %v323_v21 = vpop.xlane.xlu1 %322 }
 0x347   :  { %v1153_v2 = vsel %vm320_vm6, %v5000_v1, -inf  ;;  %v324_v23 = vsub.f32 %v316_v50, %v323_v21 }
 0x348   :  { %1154 = vmax.xlane.f32.xlu1 %v1153_v2  ;;  %v4368_v3 = vpop.f32.mrf.mxu1 }
 0x349   :  { %v325_v25 = vmul.f32 1.442695, %v324_v23 }
 0x34a   :  { %v5004_v4 = vpop.f32.mrf.mxu1 }
 0x34b   :  { %v1319_v5 = vsel %vm320_vm6, %v5004_v4, -inf  ;;  %4609 = vpow2.f32 %v325_v25 }
 0x34c   :  { %1320 = vmax.xlane.f32.xlu0 %v1319_v5  ;;  %v4378_v6 = vpop.f32.mrf.mxu1 }
 0x34e   :  { %v5008_v8 = vpop.f32.mrf.mxu1 }
 0x34f   :  { %v1485_v9 = vsel %vm320_vm6, %v5008_v8, -inf }
 0x350   :  { %1486 = vmax.xlane.f32.xlu1 %v1485_v9  ;;  %v4388_v11 = vpop.f32.mrf.mxu1 }
 0x352   :  { %v5012_v14 = vpop.f32.mrf.mxu1 }
 0x353   :  { %v1651_v16 = vsel %vm320_vm6, %v5012_v14, -inf }
 0x354   :  { %1652 = vmax.xlane.f32.xlu0 %v1651_v16  ;;  %v4398_v17 = vpop.f32.mrf.mxu1 }
 0x356   :  { %v5016_v18 = vpop.f32.mrf.mxu1 }
 0x357   :  { %v1817_v19 = vsel %vm320_vm6, %v5016_v18, -inf }
 0x358   :  { %1818 = vmax.xlane.f32.xlu1 %v1817_v19  ;;  %v4408_v20 = vpop.f32.mrf.mxu1  ;;  %v5024_v26 = vpop.eup %4609 }
 0x359   :  { %v327_v28 = vsel %vm320_vm6, %v5024_v26, 0.0 }
 0x369   :  { %832 = vrot.lane.b32.xlu1 %v4874_v29, %s4708_s17 }
 0x36a   :  { %666 = vrot.lane.b32.xlu0 %v4874_v29, %s4709_s18 }
 0x389   :  { %328 = vadd.xlane.f32.xlu0 %v327_v28 }
 0x3b8   :  { %v491_v32 = vpop.xlane.xlu0 %490 }
 0x3b9   :  { %v492_v33 = vsub.f32 %v485_v53, %v491_v32 }
 0x3bb   :  { %v493_v37 = vmul.f32 1.442695, %v492_v33 }
 0x3bc   :  { %v657_v39 = vpop.xlane.xlu0 %656 }
 0x3bd   :  { %4611 = vpow2.f32 %v493_v37  ;;  %v658_v40 = vsub.f32 %v651_v56, %v657_v39 }
 0x3bf   :  { %v659_v42 = vmul.f32 1.442695, %v658_v40 }
 0x3c1   :  { %4613 = vpow2.f32 %v659_v42 }
 0x3c9   :  { %v823_v44 = vpop.xlane.xlu1 %822 }
 0x3ca   :  { %v5030_v45 = vpop.eup %4611  ;;  %v824_v47 = vsub.f32 %v817_v59, %v823_v44 }
 0x3cb   :  { %v495_v49 = vsel %vm320_vm6, %v5030_v45, 0.0 }
 0x3cc   :  { %v825_v50 = vmul.f32 1.442695, %v824_v47  ;;  %496 = vadd.xlane.f32.xlu1 %v495_v49 }
 0x3cd   :  { %v989_v51 = vpop.xlane.xlu0 %988 }
 0x3ce   :  { %v5034_v52 = vpop.eup %4613  ;;  %4615 = vpow2.f32 %v825_v50  ;;  %v990_v53 = vsub.f32 %v983_v62, %v989_v51 }
 0x3cf   :  { %v661_v54 = vsel %vm320_vm6, %v5034_v52, 0.0 }
 0x3d0   :  { %v991_v55 = vmul.f32 1.442695, %v990_v53  ;;  %662 = vadd.xlane.f32.xlu0 %v661_v54 }
 0x3d1   :  { %v1155_v60 = vpop.xlane.xlu1 %1154 }
 0x3d2   :  { %4617 = vpow2.f32 %v991_v55  ;;  %v1156_v0 = vsub.f32 %v5000_v1, %v1155_v60 }
 0x3d4   :  { %v1157_v9 = vmul.f32 1.442695, %v1156_v0 }
 0x3d5   :  { %v1321_v61 = vpop.xlane.xlu0 %1320 }
 0x3d6   :  { %v1322_v62 = vsub.f32 %v5004_v4, %v1321_v61 }
 0x3d8   :  { %v1323_v2 = vmul.f32 1.442695, %v1322_v62 }
 0x3d9   :  { %v1487_v63 = vpop.xlane.xlu1 %1486 }
 0x3da   :  { %v1488_v3 = vsub.f32 %v5008_v8, %v1487_v63  ;;  %4619 = vpow2.f32 %v1323_v2 }
 0x3db   :  { %v5038_v56 = vpop.eup %4615  ;;  %4621 = vpow2.f32 %v1157_v9 }
 0x3dc   :  { %v827_v57 = vsel %vm320_vm6, %v5038_v56, 0.0  ;;  %v1489_v16 = vmul.f32 1.442695, %v1488_v3 }
 0x3dd   :  { %828 = vadd.xlane.f32.xlu1 %v827_v57  ;;  %v1653_v5 = vpop.xlane.xlu0 %1652 }
 0x3de   :  { %v1654_v11 = vsub.f32 %v5012_v14, %v1653_v5  ;;  %4623 = vpow2.f32 %v1489_v16 }
 0x3df   :  { %v5042_v58 = vpop.eup %4617 }
 0x3e0   :  { %v993_v59 = vsel %vm320_vm6, %v5042_v58, 0.0  ;;  %v1655_v19 = vmul.f32 1.442695, %v1654_v11 }
 0x3e1   :  { %994 = vadd.xlane.f32.xlu0 %v993_v59  ;;  %v1819_v6 = vpop.xlane.xlu1 %1818  ;;  %v667_v4 = vpop.permute.xlu0 %666 }
 0x3e2   :  { %v1820_v17 = vsub.f32 %v5016_v18, %v1819_v6  ;;  %4625 = vpow2.f32 %v1655_v19 }
 0x3e4   :  { %v1821_v20 = vmul.f32 1.442695, %v1820_v17 }
 0x3e5   :  { %v833_v42 = vpop.permute.xlu1 %832 }
 0x3e6   :  { %4627 = vpow2.f32 %v1821_v20 }
 0x3e7   :  { %v5059_v1 = vpop.eup %4619 }
 0x3e8   :  { %v5061_v8 = vpop.eup %4621  ;;  %v1325_v14 = vsel %vm320_vm6, %v5059_v1, 0.0 }
 0x3e9   :  { %v1159_v28 = vsel %vm320_vm6, %v5061_v8, 0.0 }
 0x3eb   :  { %v5065_v23 = vpop.eup %4623 }
 0x3ec   :  { %v1491_v25 = vsel %vm320_vm6, %v5065_v23, 0.0 }
 0x3ee   :  { %1164 = vrot.lane.b32.xlu1 %v4874_v29, %s4710_s19 }
 0x3ef   :  { %v5067_v18 = vpop.eup %4625 }
 0x3f0   :  { %v1657_v33 = vsel %vm320_vm6, %v5067_v18, 0.0 }
 0x3f2   :  { %1330 = vrot.lane.b32.xlu1 %v4874_v29, %s4711_s20 }
 0x3f3   :  { %v5073_v32 = vpop.eup %4627 }
 0x3f4   :  { %v1823_v37 = vsel %vm320_vm6, %v5073_v32, 0.0 }
 0x3f6   :  { %1496 = vrot.lane.b32.xlu1 %v4874_v29, %s4712_s21 }
 0x3f7   :  { %998 = vrot.lane.b32.xlu0 %v4874_v29, %s5567_s22  ;;  %s5574_s22 = smov 28  }
 0x412   :  { %v329_v21 = vpop.xlane.xlu0 %328 }
 0x413   :  { %4629 = vrcp.f32 %v329_v21 }
 0x416   :  { %1326 = vadd.xlane.f32.xlu0 %v1325_v14 }
 0x41a   :  { %1492 = vadd.xlane.f32.xlu0 %v1491_v25  ;;  %1160 = vadd.xlane.f32.xlu1 %v1159_v28 }
 0x41e   :  { %1658 = vadd.xlane.f32.xlu1 %v1657_v33  ;;  %1824 = vadd.xlane.f32.xlu0 %v1823_v37  ;;  %v5151_v37 = vld [vmem:[%s5559_s6 + $0x20] sm:$0xff] }
 0x41f   :  { %4415 = vmatpush3.msra.mxu1 %v5151_v37 }
 0x420   :  { %v4630_v39 = vpop.eup %4629  ;;  %4416 = vmatprep.subr.mxu1 %v4695_v7 }
 0x421   :  { %v331_v40 = vmul.f32 %v4630_v39, %v5024_v26  ;;  %v5156_v39 = vld [vmem:[%s5559_s6 + $0x18] sm:$0xff] }
 0x422   :  { %4417 = vmatpush3.msra.mxu1 %v5156_v39 }
 0x423   :  { %4322 = vmatmul.mubr.msk.f32.vlgmr.msra.gmra.mxu0 %vm334_vm7, %v331_v40  ;;  %4418 = vmatprep.subr.mxu1 %v4695_v7 }
 0x424   :  { %4330 = vmatpush3.msk.msra.mxu0 %vm338_vm5, %v5028_v30  ;;  %4331 = vmatprep.mubr.msk.f32.mxu0 %vm4696_vm1, %v4695_v7 }
 0x425   :  { %4339 = vmatprep.subr.mxu0 %v4695_v7 }
 0x42f   :  { %1662 = vrot.lane.b32.xlu1 %v4874_v29, %s5569_s23  ;;  %s4720_s23 = smov 20  }
 0x434   :  { %1828 = vrot.lane.b32.xlu0 %v4874_v29, %s5566_s24  ;;  %s5573_s24 = smov 32  }
 0x455   :  { %v497_v26 = vpop.xlane.xlu1 %496 }
 0x456   :  { %4631 = vrcp.f32 %v497_v26  ;;  %v5170_v26 = vld [vmem:[%s5559_s6 + $0x8] sm:$0xff] }
 0x459   :  { %v663_v44 = vpop.xlane.xlu0 %662 }
 0x45a   :  { %4633 = vrcp.f32 %v663_v44 }
 0x463   :  { %v4632_v47 = vpop.eup %4631 }
 0x464   :  { %v499_v30 = vmul.f32 %v4632_v47, %v5030_v45 }
 0x466   :  { %v829_v49 = vpop.xlane.xlu1 %828  ;;  %4332 = vmatmul.mubr.msk.f32.vlgmr.msra.gmra.mxu0 %vm334_vm7, %v499_v30  ;;  %v5180_v30 = vld [vmem:[%s5559_s6] sm:$0xff] }
 0x467   :  { %v4634_v50 = vpop.eup %4633  ;;  %4635 = vrcp.f32 %v829_v49  ;;  %4340 = vmatpush3.msk.msra.mxu0 %vm338_vm5, %v667_v4  ;;  %4341 = vmatprep.mubr.msk.f32.mxu0 %vm4696_vm1, %v4695_v7 }
 0x468   :  { %4349 = vmatprep.subr.mxu0 %v4695_v7  ;;  %v665_v29 = vmul.f32 %v4634_v50, %v5034_v52 }
 0x46a   :  { %v995_v51 = vpop.xlane.xlu0 %994  ;;  %4342 = vmatmul.mubr.msk.f32.vlgmr.msra.gmra.mxu0 %vm334_vm7, %v665_v29  ;;  %v1165_v57 = vpop.permute.xlu1 %1164 }
 0x46b   :  { %4637 = vrcp.f32 %v995_v51  ;;  %4350 = vmatpush3.msk.msra.mxu0 %vm338_vm5, %v833_v42  ;;  %4351 = vmatprep.mubr.msk.f32.mxu0 %vm4696_vm1, %v4695_v7  ;;  %v5165_v42 = vld [vmem:[%s5559_s6 + $0x10] sm:$0xff]  ;;  %s5572_s6 = smov 36  }
 0x46c   :  { %4359 = vmatprep.subr.mxu0 %v4695_v7  ;;  %4419 = vmatpush3.msra.mxu1 %v5165_v42 }
 0x46d   :  { %4420 = vmatprep.subr.mxu1 %v4695_v7 }
 0x46e   :  { %v999_v54 = vpop.permute.xlu0 %998  ;;  %4421 = vmatpush3.msra.mxu1 %v5170_v26 }
 0x46f   :  { %4422 = vmatprep.subr.mxu1 %v4695_v7 }
 0x470   :  { %4423 = vmatpush3.msra.mxu1 %v5180_v30 }
 0x471   :  { %4440 = vmatprep.subr.mxu1 %v4695_v7 }
 0x474   :  { %v4636_v45 = vpop.eup %4635 }
 0x475   :  { %v831_v53 = vmul.f32 %v4636_v45, %v5038_v56  ;;  %v1331_v56 = vpop.permute.xlu1 %1330 }
 0x477   :  { %4352 = vmatmul.mubr.msk.f32.vlgmr.msra.gmra.mxu0 %vm334_vm7, %v831_v53 }
 0x478   :  { %v4638_v55 = vpop.eup %4637  ;;  %4360 = vmatpush3.msk.msra.mxu0 %vm338_vm5, %v999_v54  ;;  %4361 = vmatprep.mubr.msk.f32.mxu0 %vm4696_vm1, %v4695_v7 }
 0x479   :  { %4369 = vmatprep.subr.mxu0 %v4695_v7  ;;  %v997_v52 = vmul.f32 %v4638_v55, %v5042_v58  ;;  %v1497_v59 = vpop.permute.xlu1 %1496  ;;  %v4125_v55 = vld [vmem:[%s5553_s0 + $0x8] sm:$0x1f] }
 0x47b   :  { %4362 = vmatmul.mubr.msk.f32.vlgmr.msra.gmra.mxu0 %vm334_vm7, %v997_v52  ;;  %v2148_v52 = vsel %vm140_vm0, %v4125_v55, 0.0 }
 0x47c   :  { %4370 = vmatpush3.msk.msra.mxu0 %vm338_vm5, %v1165_v57  ;;  %4371 = vmatprep.mubr.msk.f32.mxu0 %vm4696_vm1, %v4695_v7 }
 0x47d   :  { %4379 = vmatprep.subr.mxu0 %v4695_v7 }
 0x49f   :  { %v1327_v60 = vpop.xlane.xlu0 %1326 }
 0x4a3   :  { %v1161_v61 = vpop.xlane.xlu1 %1160  ;;  %v1493_v62 = vpop.xlane.xlu0 %1492 }
 0x4a4   :  { %4639 = vrcp.f32 %v1161_v61 }
 0x4a5   :  { %4641 = vrcp.f32 %v1327_v60 }
 0x4a6   :  { %4643 = vrcp.f32 %v1493_v62 }
 0x4a7   :  { %v1659_v63 = vpop.xlane.xlu1 %1658  ;;  %v1825_v58 = vpop.xlane.xlu0 %1824 }
 0x4a8   :  { %4645 = vrcp.f32 %v1659_v63 }
 0x4a9   :  { %4647 = vrcp.f32 %v1825_v58 }
 0x4ab   :  { %v1663_v16 = vpop.permute.xlu1 %1662  ;;  %v1829_v20 = vpop.permute.xlu0 %1828 }
 0x4b1   :  { %v4640_v0 = vpop.eup %4639 }
 0x4b2   :  { %v1163_v2 = vmul.f32 %v4640_v0, %v5061_v8  ;;  %v4642_v3 = vpop.eup %4641 }
 0x4b3   :  { %v1329_v5 = vmul.f32 %v4642_v3, %v5059_v1  ;;  %v4644_v6 = vpop.eup %4643 }
 0x4b4   :  { %4372 = vmatmul.mubr.msk.f32.vlgmr.msra.gmra.mxu0 %vm334_vm7, %v1163_v2  ;;  %v1495_v9 = vmul.f32 %v4644_v6, %v5065_v23 }
 0x4b5   :  { %4380 = vmatpush3.msk.msra.mxu0 %vm338_vm5, %v1331_v56  ;;  %4381 = vmatprep.mubr.msk.f32.mxu0 %vm4696_vm1, %v4695_v7  ;;  %v4646_v11 = vpop.eup %4645 }
 0x4b6   :  { %4389 = vmatprep.subr.mxu0 %v4695_v7  ;;  %v1661_v17 = vmul.f32 %v4646_v11, %v5067_v18  ;;  %v4648_v19 = vpop.eup %4647 }
 0x4b7   :  { %v1827_v4 = vmul.f32 %v4648_v19, %v5073_v32 }
 0x4b8   :  { %4382 = vmatmul.mubr.msk.f32.vlgmr.msra.gmra.mxu0 %vm334_vm7, %v1329_v5 }
 0x4b9   :  { %4390 = vmatpush3.msk.msra.mxu0 %vm338_vm5, %v1497_v59  ;;  %4391 = vmatprep.mubr.msk.f32.mxu0 %vm4696_vm1, %v4695_v7 }
 0x4ba   :  { %4399 = vmatprep.subr.mxu0 %v4695_v7 }
 0x4bc   :  { %4392 = vmatmul.mubr.msk.f32.vlgmr.msra.gmra.mxu0 %vm334_vm7, %v1495_v9 }
 0x4bd   :  { %4400 = vmatpush3.msk.msra.mxu0 %vm338_vm5, %v1663_v16  ;;  %4401 = vmatprep.mubr.msk.f32.mxu0 %vm4696_vm1, %v4695_v7 }
 0x4be   :  { %4409 = vmatprep.subr.mxu0 %v4695_v7 }
 0x4c0   :  { %4402 = vmatmul.mubr.msk.f32.vlgmr.msra.gmra.mxu0 %vm334_vm7, %v1661_v17 }
 0x4c1   :  { %4410 = vmatpush3.msk.msra.mxu0 %vm338_vm5, %v1829_v20  ;;  %4411 = vmatprep.mubr.msk.f32.mxu0 %vm4696_vm1, %v4695_v7 }
 0x4c2   :  { %4427 = vmatprep.subr.mxu0 %v4695_v7 }
 0x4c4   :  { %4412 = vmatmul.mubr.msk.f32.vlgmr.msra.gmra.mxu0 %vm334_vm7, %v1827_v4 }
 0x4c5   :  { %4437 = vmatprep.mubr.msk.f32.mxu0 %vm4696_vm1, %v4695_v7 }
 0x4e3   :  { %v5142_v1 = vpop.f32.mrf.mxu0 }
 0x4e5   :  { %v4323_v21 = vpop.f32.mrf.mxu0 }
 0x526   :  { %v573_v8 = vpop.f32.mrf.mxu0 }
 0x527   :  { %1906 = vrot.lane.b32.xlu1 %v573_v8, %s5568_s3 }
 0x528   :  { %v4333_v14 = vpop.f32.mrf.mxu0 }
 0x52a   :  { %v739_v23 = vpop.f32.mrf.mxu0 }
 0x52b   :  { %1910 = vrot.lane.b32.xlu0 %v739_v23, %s4717_s4 }
 0x52c   :  { %v4343_v18 = vpop.f32.mrf.mxu0 }
 0x537   :  { %v905_v25 = vpop.f32.mrf.mxu0 }
 0x538   :  { %1914 = vrot.lane.b32.xlu1 %v905_v25, %s5571_s5 }
 0x539   :  { %v4353_v28 = vpop.f32.mrf.mxu0 }
 0x53b   :  { %v1071_v32 = vpop.f32.mrf.mxu0 }
 0x53c   :  { %1918 = vrot.lane.b32.xlu0 %v1071_v32, %s5570_s25  ;;  %s4721_s25 = smov 24  }
 0x53d   :  { %v4363_v33 = vpop.f32.mrf.mxu0 }
 0x574   :  { %v1237_v40 = vpop.f32.mrf.mxu0 }
 0x575   :  { %1922 = vrot.lane.b32.xlu1 %v1237_v40, %s4720_s23 }
 0x576   :  { %v4373_v44 = vpop.f32.mrf.mxu0 }
 0x578   :  { %v1403_v47 = vpop.f32.mrf.mxu0 }
 0x579   :  { %1926 = vrot.lane.b32.xlu0 %v1403_v47, %s4721_s25 }
 0x57a   :  { %v4383_v49 = vpop.f32.mrf.mxu0 }
 0x57c   :  { %v1569_v50 = vpop.f32.mrf.mxu0 }
 0x57d   :  { %1930 = vrot.lane.b32.xlu1 %v1569_v50, %s5574_s22  ;;  %v5224_v50 = vld [vmem:[%s5560_s9 + $0x20] sm:$0xff] }
 0x57e   :  { %v4393_v29 = vpop.f32.mrf.mxu0  ;;  %4428 = vmatpush3.msra.mxu0 %v5224_v50 }
 0x57f   :  { %4429 = vmatprep.subr.mxu0 %v4695_v7  ;;  %v5243_v29 = vld [vmem:[%s5560_s9 + $0x8] sm:$0xff] }
 0x580   :  { %v1735_v51 = vpop.f32.mrf.mxu0 }
 0x581   :  { %1934 = vrot.lane.b32.xlu0 %v1735_v51, %s5573_s24  ;;  %v5250_v51 = vld [vmem:[%s5560_s9] sm:$0xff] }
 0x582   :  { %v4403_v45 = vpop.f32.mrf.mxu0 }
 0x584   :  { %v1901_v53 = vpop.f32.mrf.mxu0 }
 0x585   :  { %1938 = vrot.lane.b32.xlu1 %v1901_v53, %s5572_s6 }
 0x586   :  { %v4413_v54 = vpop.f32.mrf.mxu0 }
 0x599   :  { %v1907_v57 = vpop.permute.xlu1 %1906 }
 0x59a   :  { %v1941_v62 = vsel %vm243_vm4, %v5142_v1, %v1907_v57 }
 0x59d   :  { %v1911_v56 = vpop.permute.xlu0 %1910 }
 0x59e   :  { %v1943_v58 = vsel %vm1942_vm8, %v1941_v62, %v1911_v56  ;;  %v5279_v56 = vld [vmem:[%s5561_s7] ss:$0 sm:$0xff] }
 0x5a0   :  { %2149 = vadd.xlane.f32.xlu0 %v2148_v52 }
 0x5aa   :  { %v1915_v59 = vpop.permute.xlu1 %1914 }
 0x5ab   :  { %v1945_v0 = vsel %vm1944_vm9, %v1943_v58, %v1915_v59 }
 0x5ae   :  { %v1919_v60 = vpop.permute.xlu0 %1918 }
 0x5af   :  { %v1947_v2 = vsel %vm1946_vm10, %v1945_v0, %v1919_v60  ;;  %v5284_v60 = vld [vmem:[%s5562_s8] ss:$0 sm:$0xff] }
 0x5e7   :  { %v1923_v61 = vpop.permute.xlu1 %1922 }
 0x5e8   :  { %v1949_v5 = vsel %vm1948_vm11, %v1947_v2, %v1923_v61 }
 0x5eb   :  { %v1927_v63 = vpop.permute.xlu0 %1926 }
 0x5ec   :  { %v1951_v9 = vsel %vm1950_vm12, %v1949_v5, %v1927_v63 }
 0x5ef   :  { %v1931_v3 = vpop.permute.xlu1 %1930 }
 0x5f0   :  { %v1953_v11 = vsel %vm1952_vm13, %v1951_v9, %v1931_v3 }
 0x5f3   :  { %v1935_v6 = vpop.permute.xlu0 %1934 }
 0x5f4   :  { %v1954_v16 = vsel %vm169_vm3, %v1953_v11, %v1935_v6 }
 0x5f7   :  { %v1939_v17 = vpop.permute.xlu1 %1938 }
 0x5f8   :  { %v1956_v19 = vsel %vm1955_vm14, %v1954_v16, %v1939_v17 }
 0x5f9   :  { %4425 = vmatmul.mubr.msk.f32.vlgmr.msra.gmra.mxu1 %vm46_vm2, %v1956_v19 }
 0x5fa   :  { %4441 = vmatpush3.msra.mxu1 %v4808_v10  ;;  %4448 = vmatprep.mubr.msk.f32.mxu1 %vm4696_vm1, %v4695_v7 }
 0x5fb   :  { %4442 = vmatprep.subr.mxu1 %v4695_v7 }
 0x5fc   :  { %4443 = vmatpush3.msra.mxu1 %v4818_v12 }
 0x5fd   :  { %4444 = vmatprep.subr.mxu1 %v4695_v7 }
 0x5fe   :  { %4445 = vmatpush3.msra.mxu1 %v4824_v13 }
 0x5ff   :  { %4446 = vmatprep.subr.mxu1 %v4695_v7 }
 0x600   :  { %4447 = vmatpush3.msra.mxu1 %v4835_v15 }
 0x601   :  { %4461 = vmatprep.subr.mxu1 %v4695_v7 }
 0x629   :  { %v2150_v20 = vpop.xlane.xlu0 %2149 }
 0x62a   :  { %v2151_v4 = vmul.f32 0.03125, %v2150_v20 }
 0x62c   :  { %v2152_v10 = vsub.f32 %v4125_v55, %v2151_v4 }
 0x62e   :  { %v2153_v1 = vmul.f32 %v2152_v10, %v2152_v10 }
 0x630   :  { %v2154_v21 = vsel %vm140_vm0, %v2153_v1, 0.0  ;;  %vm2142_vm0 = vcmask 23552  }
 0x631   :  { %2155 = vadd.xlane.f32.xlu1 %v2154_v21 }
 0x6b9   :  { %v2026_v8 = vpop.f32.mrf.mxu1 }
 0x6ba   :  { %v2156_v12 = vpop.xlane.xlu1 %2155  ;;  %v2031_v14 = vsel %vm5575_vm15, %v2026_v8, 0.0 }
 0x6bb   :  { %v2157_v23 = vmul.f32 0.03125, %v2156_v12  ;;  %2032 = vadd.xlane.f32.xlu0 %v2031_v14  ;;  %v4426_v13 = vpop.f32.mrf.mxu1 }
 0x6bd   :  { %v2158_v18 = vadd.f32 1e-06, %v2157_v23 }
 0x6bf   :  { %4649 = vrsqrt.f32 %v2158_v18 }
 0x6cc   :  { %v4650_v15 = vpop.eup %4649 }
 0x6cd   :  { %v2160_v25 = vmul.f32 %v4650_v15, %v2152_v10 }
 0x6cf   :  { %v2161_v28 = vmul.f32 %v4858_v22, %v2160_v25  ;;  %v5231_v22 = vld [vmem:[%s5560_s9 + $0x18] sm:$0xff] }
 0x6d0   :  { %4430 = vmatpush3.msra.mxu0 %v5231_v22 }
 0x6d1   :  { %v2162_v32 = vadd.f32 %v4863_v24, %v2161_v28  ;;  %4431 = vmatprep.subr.mxu0 %v4695_v7  ;;  %v5238_v24 = vld [vmem:[%s5560_s9 + $0x10] sm:$0xff] }
 0x6d2   :  { %4432 = vmatpush3.msra.mxu0 %v5238_v24 }
 0x6d3   :  { %4449 = vmatmul.mubr.msk.f32.vlgmr.msra.gmra.mxu1 %vm169_vm3, %v2162_v32  ;;  %4433 = vmatprep.subr.mxu0 %v4695_v7 }
 0x6d4   :  { %4463 = vmatprep.mubr.msk.f32.mxu1 %vm4696_vm1, %v4695_v7  ;;  %4434 = vmatpush3.msra.mxu0 %v5243_v29 }
 0x6d5   :  { %4435 = vmatprep.subr.mxu0 %v4695_v7 }
 0x6d6   :  { %4436 = vmatpush3.msra.mxu0 %v5250_v51 }
 0x6d7   :  { %4451 = vmatprep.subr.mxu0 %v4695_v7 }
 0x744   :  { %v2033_v33 = vpop.xlane.xlu0 %2032 }
 0x745   :  { %v2035_v40 = vmul.f32 0.025, %v2033_v33 }
 0x747   :  { %v2036_v44 = vsub.f32 %v2026_v8, %v2035_v40 }
 0x749   :  { %v2037_v47 = vmul.f32 %v2036_v44, %v2036_v44 }
 0x74b   :  { %v2038_v49 = vsel %vm5575_vm15, %v2037_v47, 0.0 }
 0x74c   :  { %2039 = vadd.xlane.f32.xlu0 %v2038_v49 }
 0x793   :  { %v5256_v45 = vpop.f32.mrf.mxu1 }
 0x794   :  { %2559 = vrot.lane.b32.xlu0 %v5256_v45, %s4698_s2  ;;  %2397 = vrot.lane.b32.xlu1 %v5256_v45, %s4697_s1 }
 0x795   :  { %v4450_v53 = vpop.f32.mrf.mxu1 }
 0x798   :  { %3045 = vrot.lane.b32.xlu0 %v5256_v45, %s4699_s26  ;;  %2721 = vrot.lane.b32.xlu1 %v5256_v45, %s4701_s28 }
 0x79c   :  { %3369 = vrot.lane.b32.xlu0 %v5256_v45, %s4702_s29  ;;  %2883 = vrot.lane.b32.xlu1 %v5256_v45, %s4703_s30 }
 0x7a0   :  { %3693 = vrot.lane.b32.xlu0 %v5256_v45, %s4705_s14  ;;  %3207 = vrot.lane.b32.xlu1 %v5256_v45, %s4700_s27  ;;  %s5578_s14 = smov 52  }
 0x7a4   :  { %3531 = vrot.lane.b32.xlu1 %v5256_v45, %s4704_s13  ;;  %s5577_s13 = smov 72  }
 0x7d5   :  { %v2040_v54 = vpop.xlane.xlu0 %2039 }
 0x7d6   :  { %v2041_v55 = vmul.f32 0.025, %v2040_v54 }
 0x7d8   :  { %v2042_v52 = vadd.f32 1e-06, %v2041_v55 }
 0x7da   :  { %4651 = vrsqrt.f32 %v2042_v52 }
 0x7e7   :  { %v4652_v57 = vpop.eup %4651 }
 0x7e8   :  { %v2044_v59 = vmul.f32 %v4652_v57, %v2036_v44 }
 0x7ea   :  { %v2051_v61 = vmul.f32 %v5279_v56, %v2044_v59 }
 0x7ec   :  { %v2058_v62 = vadd.f32 %v5284_v60, %v2051_v61 }
 0x7ee   :  { %2059 = vst.msk [vmem:[%s5563_s11] sm:$0x3] %vm5575_vm15, %v2058_v62  ;;  %4438 = vmatmul.mubr.msk.f32.vlgmr.msra.gmra.mxu0 %vm46_vm2, %v2058_v62  ;;  %vm2144_vm15 = vcmask 57344  }
 0x7ef   :  { %4452 = vmatpush3.xpose.msk.msra.mxu0 %vm243_vm4, %v5256_v45  ;;  %4453 = vmatprep.mubr.msk.f32.mxu0 %vm4696_vm1, %v4695_v7 }
 0x7f0   :  { %4456 = vmatprep.subr.mxu0 %v4695_v7 }
 0x7f2   :  { %4454 = vmatmul.mubr.msk.f32.vlgmr.msra.gmra.mxu0 %vm243_vm4, %v4870_v27 }
 0x7f3   :  { %4458 = vmatprep.mubr.msk.f32.mxu0 %vm4696_vm1, %v4695_v7 }
 0x806   :  { %v2398_v63 = vpop.permute.xlu1 %2397  ;;  %v2560_v58 = vpop.permute.xlu0 %2559 }
 0x807   :  { %4462 = vmatpush3.xpose.msk.msra.mxu1 %vm243_vm4, %v2398_v63 }
 0x808   :  { %4471 = vmatprep.subr.mxu1 %v4695_v7 }
 0x80a   :  { %4464 = vmatmul.mubr.msk.f32.vlgmr.msra.gmra.mxu1 %vm243_vm4, %v4921_v31  ;;  %v2722_v0 = vpop.permute.xlu1 %2721  ;;  %v3046_v31 = vpop.permute.xlu0 %3045 }
 0x80b   :  { %4472 = vmatpush3.xpose.msk.msra.mxu1 %vm243_vm4, %v2560_v58  ;;  %4473 = vmatprep.mubr.msk.f32.mxu1 %vm4696_vm1, %v4695_v7 }
 0x80c   :  { %4481 = vmatprep.subr.mxu1 %v4695_v7 }
 0x80e   :  { %4474 = vmatmul.mubr.msk.f32.vlgmr.msra.gmra.mxu1 %vm243_vm4, %v4927_v34  ;;  %v2884_v27 = vpop.permute.xlu1 %2883 }
 0x80f   :  { %4482 = vmatpush3.xpose.msk.msra.mxu1 %vm243_vm4, %v2722_v0  ;;  %4483 = vmatprep.mubr.msk.f32.mxu1 %vm4696_vm1, %v4695_v7 }
 0x810   :  { %4491 = vmatprep.subr.mxu1 %v4695_v7 }
 0x812   :  { %4484 = vmatmul.mubr.msk.f32.vlgmr.msra.gmra.mxu1 %vm243_vm4, %v4935_v35  ;;  %v3208_v34 = vpop.permute.xlu1 %3207  ;;  %v3370_v35 = vpop.permute.xlu0 %3369 }
 0x813   :  { %4492 = vmatpush3.xpose.msk.msra.mxu1 %vm243_vm4, %v2884_v27  ;;  %4493 = vmatprep.mubr.msk.f32.mxu1 %vm4696_vm1, %v4695_v7 }
 0x814   :  { %4501 = vmatprep.subr.mxu1 %v4695_v7 }
 0x816   :  { %4494 = vmatmul.mubr.msk.f32.vlgmr.msra.gmra.mxu1 %vm243_vm4, %v4939_v36  ;;  %v3532_v36 = vpop.permute.xlu1 %3531 }
 0x817   :  { %4502 = vmatpush3.xpose.msk.msra.mxu1 %vm243_vm4, %v3046_v31  ;;  %4503 = vmatprep.mubr.msk.f32.mxu1 %vm4696_vm1, %v4695_v7 }
 0x818   :  { %4511 = vmatprep.subr.mxu1 %v4695_v7 }
 0x81a   :  { %4504 = vmatmul.mubr.msk.f32.vlgmr.msra.gmra.mxu1 %vm243_vm4, %v4943_v38  ;;  %v3694_v38 = vpop.permute.xlu0 %3693 }
 0x81b   :  { %4512 = vmatpush3.xpose.msk.msra.mxu1 %vm243_vm4, %v3208_v34  ;;  %4513 = vmatprep.mubr.msk.f32.mxu1 %vm4696_vm1, %v4695_v7 }
 0x81c   :  { %4521 = vmatprep.subr.mxu1 %v4695_v7 }
 0x81e   :  { %4514 = vmatmul.mubr.msk.f32.vlgmr.msra.gmra.mxu1 %vm243_vm4, %v4953_v41  ;;  %v5368_v41 = vld [vmem:[%s5564_s10] ss:$0 sm:$0xff]  ;;  %s5576_s10 = smov 56  }
 0x81f   :  { %4522 = vmatpush3.xpose.msk.msra.mxu1 %vm243_vm4, %v3370_v35  ;;  %4523 = vmatprep.mubr.msk.f32.mxu1 %vm4696_vm1, %v4695_v7 }
 0x820   :  { %4531 = vmatprep.subr.mxu1 %v4695_v7 }
 0x822   :  { %4524 = vmatmul.mubr.msk.f32.vlgmr.msra.gmra.mxu1 %vm243_vm4, %v4965_v43 }
 0x823   :  { %4532 = vmatpush3.xpose.msk.msra.mxu1 %vm243_vm4, %v3532_v36  ;;  %4533 = vmatprep.mubr.msk.f32.mxu1 %vm4696_vm1, %v4695_v7 }
 0x824   :  { %4541 = vmatprep.subr.mxu1 %v4695_v7 }
 0x826   :  { %4534 = vmatmul.mubr.msk.f32.vlgmr.msra.gmra.mxu1 %vm243_vm4, %v4975_v46 }
 0x827   :  { %4542 = vmatpush3.xpose.msk.msra.mxu1 %vm243_vm4, %v3694_v38  ;;  %4543 = vmatprep.mubr.msk.f32.mxu1 %vm4696_vm1, %v4695_v7 }
 0x828   :  { %4551 = vmatprep.subr.mxu1 %v4695_v7 }
 0x82a   :  { %4544 = vmatmul.mubr.msk.f32.vlgmr.msra.gmra.mxu1 %vm243_vm4, %v4987_v48 }
 0x82b   :  { %4552 = vmatpush3.msra.mxu1 %v5151_v37  ;;  %4561 = vmatprep.mubr.msk.f32.mxu1 %vm4696_vm1, %v4695_v7 }
 0x82c   :  { %4553 = vmatprep.subr.mxu1 %v4695_v7 }
 0x82d   :  { %4554 = vmatpush3.msra.mxu1 %v5156_v39 }
 0x82e   :  { %4555 = vmatprep.subr.mxu1 %v4695_v7 }
 0x82f   :  { %4556 = vmatpush3.msra.mxu1 %v5165_v42 }
 0x830   :  { %4557 = vmatprep.subr.mxu1 %v4695_v7 }
 0x831   :  { %4558 = vmatpush3.msra.mxu1 %v5170_v26 }
 0x832   :  { %4559 = vmatprep.subr.mxu1 %v4695_v7 }
 0x833   :  { %4560 = vmatpush3.msra.mxu1 %v5180_v30 }
 0x8ae   :  { %v2135_v43 = vpop.f32.mrf.mxu0 }
 0x8af   :  { %v2136_v46 = vadd.f32 %v5368_v41, %v2135_v43 }
 0x8b0   :  { %v4439_v48 = vpop.f32.mrf.mxu0 }
 0x8b1   :  { %v2140_v37 = vrot.slane %v2136_v46, 1 }
 0x8b2   :  { %v5371_v39 = vpop.f32.mrf.mxu0 }
 0x8b3   :  { %v2143_v42 = vsel %vm2142_vm0, %v2136_v46, %v2140_v37  ;;  %v2309_v26 = vsel %vm320_vm6, %v5371_v39, -inf }
 0x8b4   :  { %2145 = vst.msk [vmem:[%s5565_s12] sm:$0x1] %vm2144_vm15, %v2143_v42  ;;  %2310 = vmax.xlane.f32.xlu1 %v2309_v26  ;;  %v4455_v30 = vpop.f32.mrf.mxu0 }
 0x8ca   :  { %v2467_v2 = vpop.f32.mrf.mxu1 }
 0x8cb   :  { %v2471_v3 = vsel %vm320_vm6, %v2467_v2, -inf }
 0x8cc   :  { %2472 = vmax.xlane.f32.xlu0 %v2471_v3  ;;  %v4465_v5 = vpop.f32.mrf.mxu1 }
 0x8ce   :  { %v2629_v6 = vpop.f32.mrf.mxu1 }
 0x8cf   :  { %v2633_v9 = vsel %vm320_vm6, %v2629_v6, -inf }
 0x8d0   :  { %2634 = vmax.xlane.f32.xlu0 %v2633_v9  ;;  %v4475_v11 = vpop.f32.mrf.mxu1 }
 0x8d2   :  { %v2791_v16 = vpop.f32.mrf.mxu1 }
 0x8d3   :  { %v2795_v17 = vsel %vm320_vm6, %v2791_v16, -inf }
 0x8d4   :  { %2796 = vmax.xlane.f32.xlu1 %v2795_v17  ;;  %v4485_v19 = vpop.f32.mrf.mxu1 }
 0x8d6   :  { %v2953_v20 = vpop.f32.mrf.mxu1 }
 0x8d7   :  { %v2957_v4 = vsel %vm320_vm6, %v2953_v20, -inf }
 0x8d8   :  { %2958 = vmax.xlane.f32.xlu0 %v2957_v4  ;;  %v4495_v10 = vpop.f32.mrf.mxu1 }
 0x8da   :  { %v3115_v1 = vpop.f32.mrf.mxu1 }
 0x8db   :  { %v3119_v21 = vsel %vm320_vm6, %v3115_v1, -inf }
 0x8dc   :  { %3120 = vmax.xlane.f32.xlu1 %v3119_v21  ;;  %v4505_v8 = vpop.f32.mrf.mxu1 }
 0x8de   :  { %v3277_v12 = vpop.f32.mrf.mxu1 }
 0x8df   :  { %v3281_v14 = vsel %vm320_vm6, %v3277_v12, -inf }
 0x8e0   :  { %3282 = vmax.xlane.f32.xlu0 %v3281_v14  ;;  %v4515_v23 = vpop.f32.mrf.mxu1 }
 0x8e2   :  { %v3439_v13 = vpop.f32.mrf.mxu1 }
 0x8e3   :  { %v3443_v18 = vsel %vm320_vm6, %v3439_v13, -inf }
 0x8e4   :  { %3444 = vmax.xlane.f32.xlu1 %v3443_v18  ;;  %v4525_v15 = vpop.f32.mrf.mxu1 }
 0x8e6   :  { %v3601_v25 = vpop.f32.mrf.mxu1 }
 0x8e7   :  { %v3605_v28 = vsel %vm320_vm6, %v3601_v25, -inf }
 0x8e8   :  { %3606 = vmax.xlane.f32.xlu0 %v3605_v28  ;;  %v4535_v32 = vpop.f32.mrf.mxu1 }
 0x8ea   :  { %v5388_v33 = vpop.f32.mrf.mxu1 }
 0x8eb   :  { %v3767_v40 = vsel %vm320_vm6, %v5388_v33, -inf }
 0x8ec   :  { %3768 = vmax.xlane.f32.xlu1 %v3767_v40  ;;  %v4545_v44 = vpop.f32.mrf.mxu1 }
 0x93d   :  { %v2311_v54 = vpop.xlane.xlu1 %2310 }
 0x93e   :  { %v2312_v21 = vsub.f32 %v5371_v39, %v2311_v54 }
 0x940   :  { %v2313_v8 = vmul.f32 1.442695, %v2312_v21 }
 0x955   :  { %v2473_v47 = vpop.xlane.xlu0 %2472 }
 0x956   :  { %v2474_v49 = vsub.f32 %v2467_v2, %v2473_v47 }
 0x958   :  { %v2475_v53 = vmul.f32 1.442695, %v2474_v49 }
 0x959   :  { %v2635_v55 = vpop.xlane.xlu0 %2634 }
 0x95a   :  { %4653 = vpow2.f32 %v2475_v53  ;;  %v2636_v52 = vsub.f32 %v2629_v6, %v2635_v55 }
 0x95c   :  { %v2637_v57 = vmul.f32 1.442695, %v2636_v52 }
 0x95d   :  { %v2797_v59 = vpop.xlane.xlu1 %2796 }
 0x95e   :  { %4655 = vpow2.f32 %v2637_v57  ;;  %v2798_v61 = vsub.f32 %v2791_v16, %v2797_v59 }
 0x960   :  { %v2799_v62 = vmul.f32 1.442695, %v2798_v61 }
 0x961   :  { %v2959_v63 = vpop.xlane.xlu0 %2958 }
 0x962   :  { %4657 = vpow2.f32 %v2799_v62  ;;  %v2960_v58 = vsub.f32 %v2953_v20, %v2959_v63 }
 0x964   :  { %v2961_v0 = vmul.f32 1.442695, %v2960_v58 }
 0x965   :  { %v3121_v27 = vpop.xlane.xlu1 %3120 }
 0x966   :  { %4659 = vpow2.f32 %v2961_v0  ;;  %v3122_v31 = vsub.f32 %v3115_v1, %v3121_v27 }
 0x967   :  { %v5392_v34 = vpop.eup %4653 }
 0x968   :  { %v3123_v35 = vmul.f32 1.442695, %v3122_v31  ;;  %v2477_v36 = vsel %vm320_vm6, %v5392_v34, 0.0 }
 0x969   :  { %v3283_v38 = vpop.xlane.xlu0 %3282  ;;  %2478 = vadd.xlane.f32.xlu1 %v2477_v36 }
 0x96a   :  { %4661 = vpow2.f32 %v3123_v35  ;;  %v3284_v43 = vsub.f32 %v3277_v12, %v3283_v38 }
 0x96b   :  { %v5396_v46 = vpop.eup %4655 }
 0x96c   :  { %v3285_v48 = vmul.f32 1.442695, %v3284_v43  ;;  %v2639_v37 = vsel %vm320_vm6, %v5396_v46, 0.0 }
 0x96d   :  { %v3445_v42 = vpop.xlane.xlu1 %3444  ;;  %2640 = vadd.xlane.f32.xlu0 %v2639_v37 }
 0x96e   :  { %4663 = vpow2.f32 %v3285_v48  ;;  %v3446_v26 = vsub.f32 %v3439_v13, %v3445_v42 }
 0x96f   :  { %v5400_v30 = vpop.eup %4657 }
 0x970   :  { %v3447_v2 = vmul.f32 1.442695, %v3446_v26  ;;  %v2801_v3 = vsel %vm320_vm6, %v5400_v30, 0.0 }
 0x971   :  { %2802 = vadd.xlane.f32.xlu1 %v2801_v3  ;;  %v3607_v4 = vpop.xlane.xlu0 %3606 }
 0x972   :  { %4665 = vpow2.f32 %v3447_v2  ;;  %v3608_v10 = vsub.f32 %v3601_v25, %v3607_v4 }
 0x973   :  { %v5404_v5 = vpop.eup %4659 }
 0x974   :  { %v2963_v6 = vsel %vm320_vm6, %v5404_v5, 0.0  ;;  %v3609_v1 = vmul.f32 1.442695, %v3608_v10 }
 0x975   :  { %2964 = vadd.xlane.f32.xlu0 %v2963_v6  ;;  %v3769_v39 = vpop.xlane.xlu1 %3768 }
 0x976   :  { %4667 = vpow2.f32 %v3609_v1  ;;  %v3770_v18 = vsub.f32 %v5388_v33, %v3769_v39 }
 0x977   :  { %v5408_v9 = vpop.eup %4661  ;;  %4669 = vpow2.f32 %v2313_v8 }
 0x978   :  { %v3125_v11 = vsel %vm320_vm6, %v5408_v9, 0.0  ;;  %v3771_v15 = vmul.f32 1.442695, %v3770_v18 }
 0x979   :  { %3126 = vadd.xlane.f32.xlu1 %v3125_v11 }
 0x97a   :  { %4671 = vpow2.f32 %v3771_v15 }
 0x97b   :  { %v5412_v16 = vpop.eup %4663 }
 0x97c   :  { %v3287_v17 = vsel %vm320_vm6, %v5412_v16, 0.0 }
 0x97d   :  { %3288 = vadd.xlane.f32.xlu0 %v3287_v17 }
 0x97f   :  { %v5416_v19 = vpop.eup %4665 }
 0x980   :  { %v3449_v20 = vsel %vm320_vm6, %v5416_v19, 0.0 }
 0x981   :  { %3450 = vadd.xlane.f32.xlu0 %v3449_v20 }
 0x983   :  { %v5425_v12 = vpop.eup %4667 }
 0x984   :  { %v3611_v14 = vsel %vm320_vm6, %v5425_v12, 0.0  ;;  %v4670_v23 = vpop.eup %4669 }
 0x985   :  { %v2315_v13 = vsel %vm320_vm6, %v4670_v23, 0.0 }
 0x987   :  { %v5443_v25 = vpop.eup %4671 }
 0x988   :  { %v3773_v28 = vsel %vm320_vm6, %v5443_v25, 0.0 }
 0x98a   :  { %2320 = vrot.lane.b32.xlu1 %v5256_v45, %s4707_s16  ;;  %s5580_s16 = smov 12  }
 0x997   :  { %2482 = vrot.lane.b32.xlu0 %v5256_v45, %s4706_s15  ;;  %s5579_s15 = smov 4  }
 0x9ae   :  { %3612 = vadd.xlane.f32.xlu1 %v3611_v14 }
 0x9b6   :  { %2316 = vadd.xlane.f32.xlu0 %v2315_v13 }
 0x9bf   :  { %2806 = vrot.lane.b32.xlu1 %v5256_v45, %s4708_s17  ;;  %s5581_s17 = smov 16  }
 0x9c3   :  { %3130 = vrot.lane.b32.xlu1 %v5256_v45, %s4710_s19  ;;  %s5583_s19 = smov 32  }
 0x9c7   :  { %3292 = vrot.lane.b32.xlu1 %v5256_v45, %s4711_s20  ;;  %s5584_s20 = smov 36  }
 0x9cb   :  { %3454 = vrot.lane.b32.xlu1 %v5256_v45, %s4712_s21 }
 0x9cc   :  { %2644 = vrot.lane.b32.xlu0 %v5256_v45, %s4709_s18  ;;  %s5582_s18 = smov 28  }
 0x9cf   :  { %3616 = vrot.lane.b32.xlu1 %v5256_v45, %s5576_s10 }
 0x9eb   :  { %3774 = vadd.xlane.f32.xlu0 %v3773_v28 }
 0x9f2   :  { %v2479_v32 = vpop.xlane.xlu1 %2478 }
 0x9f6   :  { %v2641_v33 = vpop.xlane.xlu0 %2640 }
 0x9fa   :  { %v2803_v40 = vpop.xlane.xlu1 %2802 }
 0x9fe   :  { %v2965_v49 = vpop.xlane.xlu0 %2964 }
 0xa01   :  { %2968 = vrot.lane.b32.xlu0 %v5256_v45, %s5577_s13 }
 0xa02   :  { %v3127_v44 = vpop.xlane.xlu1 %3126 }
 0xa05   :  { %3778 = vrot.lane.b32.xlu0 %v5256_v45, %s5578_s14 }
 0xa06   :  { %v2321_v47 = vpop.permute.xlu1 %2320  ;;  %v3289_v53 = vpop.xlane.xlu0 %3288 }
 0xa07   :  { %4457 = vmatpush3.msk.msra.mxu0 %vm338_vm5, %v2321_v47 }
 0xa08   :  { %4466 = vmatprep.subr.mxu0 %v4695_v7 }
 0xa0a   :  { %v3451_v54 = vpop.xlane.xlu0 %3450 }
 0xa0e   :  { %v2483_v55 = vpop.permute.xlu0 %2482 }
 0xa37   :  { %v3613_v45 = vpop.xlane.xlu1 %3612 }
 0xa3b   :  { %v2807_v31 = vpop.permute.xlu1 %2806 }
 0xa3f   :  { %v2317_v52 = vpop.xlane.xlu0 %2316  ;;  %v3131_v35 = vpop.permute.xlu1 %3130 }
 0xa40   :  { %4673 = vrcp.f32 %v2317_v52 }
 0xa41   :  { %4675 = vrcp.f32 %v2479_v32 }
 0xa42   :  { %4677 = vrcp.f32 %v2641_v33 }
 0xa43   :  { %4679 = vrcp.f32 %v2803_v40  ;;  %v2645_v58 = vpop.permute.xlu0 %2644  ;;  %v3293_v37 = vpop.permute.xlu1 %3292 }
 0xa44   :  { %4681 = vrcp.f32 %v2965_v49 }
 0xa45   :  { %4683 = vrcp.f32 %v3127_v44 }
 0xa46   :  { %4685 = vrcp.f32 %v3289_v53 }
 0xa47   :  { %4687 = vrcp.f32 %v3451_v54 }
 0xa48   :  { %4689 = vrcp.f32 %v3613_v45 }
 0xa4d   :  { %v4674_v57 = vpop.eup %4673 }
 0xa4e   :  { %v2319_v59 = vmul.f32 %v4674_v57, %v4670_v23  ;;  %v4676_v61 = vpop.eup %4675 }
 0xa4f   :  { %v2481_v62 = vmul.f32 %v4676_v61, %v5392_v34  ;;  %v4678_v63 = vpop.eup %4677 }
 0xa50   :  { %4459 = vmatmul.mubr.msk.f32.vlgmr.msra.gmra.mxu0 %vm334_vm7, %v2319_v59  ;;  %v2643_v0 = vmul.f32 %v4678_v63, %v5396_v46  ;;  %v4680_v27 = vpop.eup %4679 }
 0xa51   :  { %4467 = vmatpush3.msk.msra.mxu0 %vm338_vm5, %v2483_v55  ;;  %4468 = vmatprep.mubr.msk.f32.mxu0 %vm4696_vm1, %v4695_v7  ;;  %v2805_v34 = vmul.f32 %v4680_v27, %v5400_v30  ;;  %v4682_v38 = vpop.eup %4681  ;;  %v3455_v30 = vpop.permute.xlu1 %3454 }
 0xa52   :  { %4476 = vmatprep.subr.mxu0 %v4695_v7  ;;  %v2967_v46 = vmul.f32 %v4682_v38, %v5404_v5  ;;  %v4684_v48 = vpop.eup %4683 }
 0xa53   :  { %v3129_v42 = vmul.f32 %v4684_v48, %v5408_v9  ;;  %v4686_v26 = vpop.eup %4685 }
 0xa54   :  { %4469 = vmatmul.mubr.msk.f32.vlgmr.msra.gmra.mxu0 %vm334_vm7, %v2481_v62  ;;  %v3291_v2 = vmul.f32 %v4686_v26, %v5412_v16  ;;  %v4688_v3 = vpop.eup %4687 }
 0xa55   :  { %4477 = vmatpush3.msk.msra.mxu0 %vm338_vm5, %v2645_v58  ;;  %4478 = vmatprep.mubr.msk.f32.mxu0 %vm4696_vm1, %v4695_v7  ;;  %v3453_v5 = vmul.f32 %v4688_v3, %v5416_v19  ;;  %v4690_v6 = vpop.eup %4689  ;;  %v3617_v9 = vpop.permute.xlu1 %3616 }
 0xa56   :  { %4486 = vmatprep.subr.mxu0 %v4695_v7  ;;  %v3615_v11 = vmul.f32 %v4690_v6, %v5425_v12 }
 0xa58   :  { %4479 = vmatmul.mubr.msk.f32.vlgmr.msra.gmra.mxu0 %vm334_vm7, %v2643_v0 }
 0xa59   :  { %4487 = vmatpush3.msk.msra.mxu0 %vm338_vm5, %v2807_v31  ;;  %4488 = vmatprep.mubr.msk.f32.mxu0 %vm4696_vm1, %v4695_v7 }
 0xa5a   :  { %4496 = vmatprep.subr.mxu0 %v4695_v7 }
 0xa5c   :  { %4489 = vmatmul.mubr.msk.f32.vlgmr.msra.gmra.mxu0 %vm334_vm7, %v2805_v34 }
 0xa5d   :  { %4498 = vmatprep.mubr.msk.f32.mxu0 %vm4696_vm1, %v4695_v7 }
 0xa74   :  { %v3775_v36 = vpop.xlane.xlu0 %3774 }
 0xa75   :  { %4691 = vrcp.f32 %v3775_v36 }
 0xa78   :  { %v2969_v43 = vpop.permute.xlu0 %2968 }
 0xa79   :  { %4497 = vmatpush3.msk.msra.mxu0 %vm338_vm5, %v2969_v43 }
 0xa7a   :  { %4499 = vmatmul.mubr.msk.f32.vlgmr.msra.gmra.mxu0 %vm334_vm7, %v2967_v46  ;;  %4506 = vmatprep.subr.mxu0 %v4695_v7 }
 0xa7b   :  { %4507 = vmatpush3.msk.msra.mxu0 %vm338_vm5, %v3131_v35  ;;  %4508 = vmatprep.mubr.msk.f32.mxu0 %vm4696_vm1, %v4695_v7 }
 0xa7c   :  { %4516 = vmatprep.subr.mxu0 %v4695_v7  ;;  %v3779_v17 = vpop.permute.xlu0 %3778 }
 0xa7e   :  { %4509 = vmatmul.mubr.msk.f32.vlgmr.msra.gmra.mxu0 %vm334_vm7, %v3129_v42 }
 0xa7f   :  { %4517 = vmatpush3.msk.msra.mxu0 %vm338_vm5, %v3293_v37  ;;  %4518 = vmatprep.mubr.msk.f32.mxu0 %vm4696_vm1, %v4695_v7 }
 0xa80   :  { %4526 = vmatprep.subr.mxu0 %v4695_v7 }
 0xa82   :  { %4519 = vmatmul.mubr.msk.f32.vlgmr.msra.gmra.mxu0 %vm334_vm7, %v3291_v2  ;;  %v4692_v16 = vpop.eup %4691 }
 0xa83   :  { %4527 = vmatpush3.msk.msra.mxu0 %vm338_vm5, %v3455_v30  ;;  %4528 = vmatprep.mubr.msk.f32.mxu0 %vm4696_vm1, %v4695_v7  ;;  %v3777_v19 = vmul.f32 %v4692_v16, %v5443_v25 }
 0xa84   :  { %4536 = vmatprep.subr.mxu0 %v4695_v7 }
 0xa86   :  { %4529 = vmatmul.mubr.msk.f32.vlgmr.msra.gmra.mxu0 %vm334_vm7, %v3453_v5 }
 0xa87   :  { %4537 = vmatpush3.msk.msra.mxu0 %vm338_vm5, %v3617_v9  ;;  %4538 = vmatprep.mubr.msk.f32.mxu0 %vm4696_vm1, %v4695_v7 }
 0xa88   :  { %4546 = vmatprep.subr.mxu0 %v4695_v7 }
 0xa8a   :  { %4539 = vmatmul.mubr.msk.f32.vlgmr.msra.gmra.mxu0 %vm334_vm7, %v3615_v11 }
 0xa8b   :  { %4547 = vmatpush3.msk.msra.mxu0 %vm338_vm5, %v3779_v17  ;;  %4548 = vmatprep.mubr.msk.f32.mxu0 %vm4696_vm1, %v4695_v7 }
 0xa8c   :  { %4564 = vmatprep.subr.mxu0 %v4695_v7 }
 0xa8e   :  { %4549 = vmatmul.mubr.msk.f32.vlgmr.msra.gmra.mxu0 %vm334_vm7, %v3777_v19 }
 0xa8f   :  { %4565 = vmatpush3.msra.mxu0 %v5224_v50  ;;  %4574 = vmatprep.mubr.msk.f32.mxu0 %vm4696_vm1, %v4695_v7  ;;  %vm5585_vm1 = vcmask 320512  }
 0xa90   :  { %4566 = vmatprep.subr.mxu0 %v4695_v7 }
 0xa91   :  { %4567 = vmatpush3.msra.mxu0 %v5231_v22 }
 0xa92   :  { %4568 = vmatprep.subr.mxu0 %v4695_v7 }
 0xa93   :  { %4569 = vmatpush3.msra.mxu0 %v5238_v24 }
 0xa94   :  { %4570 = vmatprep.subr.mxu0 %v4695_v7 }
 0xa95   :  { %4571 = vmatpush3.msra.mxu0 %v5243_v29 }
 0xa96   :  { %4572 = vmatprep.subr.mxu0 %v4695_v7 }
 0xa97   :  { %4573 = vmatpush3.msra.mxu0 %v5250_v51 }
 0xb10   :  { %v2393_v50 = vpop.f32.mrf.mxu0 }
 0xb12   :  { %v4460_v20 = vpop.f32.mrf.mxu0 }
 0xb14   :  { %v2555_v4 = vpop.f32.mrf.mxu0 }
 0xb15   :  { %3856 = vrot.lane.b32.xlu1 %v2555_v4, %s5579_s15 }
 0xb16   :  { %v4470_v10 = vpop.f32.mrf.mxu0 }
 0xb18   :  { %v2717_v1 = vpop.f32.mrf.mxu0 }
 0xb19   :  { %3860 = vrot.lane.b32.xlu0 %v2717_v1, %s4717_s4 }
 0xb1a   :  { %v4480_v22 = vpop.f32.mrf.mxu0 }
 0xb1c   :  { %v2879_v21 = vpop.f32.mrf.mxu0 }
 0xb1d   :  { %3864 = vrot.lane.b32.xlu1 %v2879_v21, %s5580_s16 }
 0xb1e   :  { %v4490_v24 = vpop.f32.mrf.mxu0 }
 0xb3a   :  { %v3041_v8 = vpop.f32.mrf.mxu0 }
 0xb3b   :  { %3868 = vrot.lane.b32.xlu0 %v3041_v8, %s5581_s17 }
 0xb3c   :  { %v4500_v7 = vpop.f32.mrf.mxu0 }
 0xb3e   :  { %v3203_v29 = vpop.f32.mrf.mxu0 }
 0xb3f   :  { %3872 = vrot.lane.b32.xlu1 %v3203_v29, %s4720_s23 }
 0xb40   :  { %v4510_v51 = vpop.f32.mrf.mxu0 }
 0xb42   :  { %v3365_v12 = vpop.f32.mrf.mxu0 }
 0xb43   :  { %3876 = vrot.lane.b32.xlu0 %v3365_v12, %s4721_s25 }
 0xb44   :  { %v4520_v14 = vpop.f32.mrf.mxu0 }
 0xb46   :  { %v3527_v23 = vpop.f32.mrf.mxu0 }
 0xb47   :  { %3880 = vrot.lane.b32.xlu1 %v3527_v23, %s5582_s18 }
 0xb48   :  { %v4530_v13 = vpop.f32.mrf.mxu0 }
 0xb4a   :  { %v3689_v39 = vpop.f32.mrf.mxu0 }
 0xb4b   :  { %3884 = vrot.lane.b32.xlu0 %v3689_v39, %s5583_s19 }
 0xb4c   :  { %v4540_v18 = vpop.f32.mrf.mxu0 }
 0xb4e   :  { %v3851_v15 = vpop.f32.mrf.mxu0 }
 0xb4f   :  { %3888 = vrot.lane.b32.xlu1 %v3851_v15, %s5584_s20 }
 0xb50   :  { %v4550_v25 = vpop.f32.mrf.mxu0 }
 0xb87   :  { %v3857_v28 = vpop.permute.xlu1 %3856 }
 0xb88   :  { %v3891_v33 = vsel %vm243_vm4, %v2393_v50, %v3857_v28  ;;  %vm5586_vm4 = vmmov %vm5585_vm1 }
 0xb8b   :  { %v3861_v32 = vpop.permute.xlu0 %3860 }
 0xb8c   :  { %v3892_v53 = vsel %vm1942_vm8, %v3891_v33, %v3861_v32 }
 0xb8f   :  { %v3865_v40 = vpop.permute.xlu1 %3864 }
 0xb90   :  { %v3893_v54 = vsel %vm1944_vm9, %v3892_v53, %v3865_v40 }
 0xbad   :  { %v3869_v44 = vpop.permute.xlu0 %3868 }
 0xbae   :  { %v3894_v55 = vsel %vm1946_vm10, %v3893_v54, %v3869_v44 }
 0xbb1   :  { %v3873_v47 = vpop.permute.xlu1 %3872 }
 0xbb2   :  { %v3895_v57 = vsel %vm1948_vm11, %v3894_v55, %v3873_v47 }
 0xbb5   :  { %v3877_v49 = vpop.permute.xlu0 %3876 }
 0xbb6   :  { %v3896_v61 = vsel %vm1950_vm12, %v3895_v57, %v3877_v49 }
 0xbb9   :  { %v3881_v52 = vpop.permute.xlu1 %3880 }
 0xbba   :  { %v3897_v45 = vsel %vm1952_vm13, %v3896_v61, %v3881_v52 }
 0xbbd   :  { %v3885_v59 = vpop.permute.xlu0 %3884 }
 0xbbe   :  { %v3898_v62 = vsel %vm169_vm3, %v3897_v45, %v3885_v59  ;;  %vm5587_vm3 = vmmov %vm5585_vm1 }
 0xbc1   :  { %v3889_v63 = vpop.permute.xlu1 %3888 }
 0xbc2   :  { %v3899_v58 = vsel %vm1955_vm14, %v3898_v62, %v3889_v63 }
 0xbc3   :  { %4562 = vmatmul.mubr.msk.f32.vlgmr.msra.gmra.mxu1 %vm46_vm2, %v3899_v58 }
 0xc83   :  { %v3969_v0 = vpop.f32.mrf.mxu1 }
 0xc84   :  { %v3973_v27 = vsel %vm5585_vm1, %v3969_v0, 0.0 }
 0xc85   :  { %3974 = vadd.xlane.f32.xlu0 %v3973_v27  ;;  %v4563_v31 = vpop.f32.mrf.mxu1 }
 0xd0e   :  { %v3975_v34 = vpop.xlane.xlu0 %3974 }
 0xd0f   :  { %v3976_v35 = vmul.f32 0.025, %v3975_v34 }
 0xd11   :  { %v3977_v36 = vsub.f32 %v3969_v0, %v3976_v35 }
 0xd13   :  { %v3978_v38 = vmul.f32 %v3977_v36, %v3977_v36 }
 0xd15   :  { %v3979_v43 = vsel %vm5586_vm4, %v3978_v38, 0.0 }
 0xd16   :  { %3980 = vadd.xlane.f32.xlu1 %v3979_v43 }
 0xd9f   :  { %v3981_v46 = vpop.xlane.xlu1 %3980 }
 0xda0   :  { %v3982_v48 = vmul.f32 0.025, %v3981_v46 }
 0xda2   :  { %v3983_v37 = vadd.f32 1e-06, %v3982_v48 }
 0xda4   :  { %4693 = vrsqrt.f32 %v3983_v37 }
 0xdb1   :  { %v4694_v42 = vpop.eup %4693 }
 0xdb2   :  { %v3985_v26 = vmul.f32 %v4694_v42, %v3977_v36 }
 0xdb4   :  { %v3986_v30 = vmul.f32 %v5279_v56, %v3985_v26 }
 0xdb6   :  { %v3987_v2 = vadd.f32 %v5284_v60, %v3986_v30 }
 0xdb8   :  { %4168 = vst.msk [vmem:[%s5563_s11 + $0x2] sm:$0x3] %vm5587_vm3, %v3987_v2  ;;  %4575 = vmatmul.mubr.msk.f32.vlgmr.msra.gmra.mxu0 %vm46_vm2, %v3987_v2 }
 0xe78   :  { %v4059_v3 = vpop.f32.mrf.mxu0 }
 0xe79   :  { %v4060_v5 = vadd.f32 %v5368_v41, %v4059_v3 }
 0xe7a   :  { %v4576_v6 = vpop.f32.mrf.mxu0 }
 0xe7b   :  { %v4064_v9 = vrot.slane %v4060_v5, 1 }
 0xe7d   :  { %v4066_v11 = vsel %vm2142_vm0, %v4060_v5, %v4064_v9 }
 0xe7e   :  { %4067 = vst.msk [vmem:[%s5565_s12 + $0x1] sm:$0x1] %vm2144_vm15, %v4066_v11 }

</bundles_post_ra>
